<compile_context>
chip_gen: v5e
topology: v5e:2x2
jax: 0.10.0
libtpu: 0.0.40
codegen_flags: <defaults>
</compile_context>

<pallas_src>
import functools
import math

import jax
import jax.numpy as jnp
from jax.experimental import pallas as pl
from jax.experimental.pallas import tpu as pltpu


# ----------------------------------------------------------------------------
# Single fused kernel: GRU layer 0 -> GRU layer 1 -> Linear -> softmax.
# ----------------------------------------------------------------------------
def gru_model_kernel(x_ref,
                     w0f_ref, w0b_ref, whh0_ref, b0_ref, bhn0_ref,
                     w1f_ref, w1b_ref, whh1_ref, b1_ref, bhn1_ref,
                     wlin_ref, blin_ref,
                     out_ref,
                     y0f_ref, y0b_ref, y1f_ref, y1b_ref,
                     *, hidden):
    T, B, _ = x_ref.shape
    H = hidden
    C = out_ref.shape[-1]
    bf16 = jnp.bfloat16
    f32 = jnp.float32

    def recurrence(xp_f, xp_b, whh_ref, bhn_ref, yf_ref, yb_ref):
        """Packed fwd+bwd GRU recurrence.

        xp_f / xp_b: (T, B, 6H) f32 hoisted input projections; forward gate
        columns live in xp_f (with combined biases folded in), backward gate
        columns in xp_b. Column order: r_f|r_b|z_f|z_b|n_f|n_b.
        """
        w = whh_ref[...]                                      # (2H, 6H) bf16
        bhn_b = jnp.broadcast_to(bhn_ref[...], (B, 2 * H))    # hoisted broadcast
        h = jnp.zeros((B, 2 * H), f32)                        # [h_fwd | h_bwd]
        for s in range(T):        # static T -> fully unrolled serial chain
            g_h = jnp.dot(h.astype(bf16), w, preferred_element_type=f32)
            xs = xp_f[s] + xp_b[T - 1 - s]                    # (B, 6H)
            rz = jax.nn.sigmoid(xs[:, :4 * H] + g_h[:, :4 * H])   # one sigmoid
            r = rz[:, :2 * H]
            z = rz[:, 2 * H:]
            n = jnp.tanh(xs[:, 4 * H:] + r * (g_h[:, 4 * H:] + bhn_b))
            h = n + z * (h - n)
            yf_ref[s] = h[:, :H]              # forward output at time s
            yb_ref[T - 1 - s] = h[:, H:]      # backward output at time T-1-s

    # ---- layer 0: hoisted input projection (MXU nearly idle -> free) ----
    x_bf = x_ref[...].astype(bf16).reshape(T * B, x_ref.shape[-1])
    xp0_f = (jnp.dot(x_bf, w0f_ref[...], preferred_element_type=f32)
             + b0_ref[...]).reshape(T, B, 6 * H)
    xp0_b = jnp.dot(x_bf, w0b_ref[...],
                    preferred_element_type=f32).reshape(T, B, 6 * H)
    recurrence(xp0_f, xp0_b, whh0_ref, bhn0_ref, y0f_ref, y0b_ref)

    # ---- layer 1: split-weight dots (no lane-axis concat of fwd|bwd) ----
    u_f = y0f_ref[...].astype(bf16).reshape(T * B, H)
    u_b = y0b_ref[...].astype(bf16).reshape(T * B, H)
    w1f = w1f_ref[...]
    w1b = w1b_ref[...]
    xp1_f = (jnp.dot(u_f, w1f[:H], preferred_element_type=f32)
             + jnp.dot(u_b, w1f[H:], preferred_element_type=f32)
             + b1_ref[...]).reshape(T, B, 6 * H)
    xp1_b = (jnp.dot(u_f, w1b[:H], preferred_element_type=f32)
             + jnp.dot(u_b, w1b[H:], preferred_element_type=f32)
             ).reshape(T, B, 6 * H)
    recurrence(xp1_f, xp1_b, whh1_ref, bhn1_ref, y1f_ref, y1b_ref)

    # ---- classifier + softmax epilogue (fused, exact division) ----
    v_f = y1f_ref[...].astype(bf16).reshape(T * B, H)
    v_b = y1b_ref[...].astype(bf16).reshape(T * B, H)
    wl = wlin_ref[...]
    logits = (jnp.dot(v_f, wl[:H], preferred_element_type=f32)
              + jnp.dot(v_b, wl[H:], preferred_element_type=f32)
              + blin_ref[...])
    m = jnp.max(logits, axis=-1, keepdims=True)
    e = jnp.exp(logits - m)
    probs = e / jnp.sum(e, axis=-1, keepdims=True)
    out_ref[...] = probs.reshape(T, B, C).astype(out_ref.dtype)


def gru_model_forward(params, x_btf, gru_size, num_classes):
    """x_btf: (B, T, F) batch_first like the PyTorch module. Returns (B, T, C)."""
    B, T, _ = x_btf.shape
    H = gru_size
    x_tbf = jnp.transpose(x_btf, (1, 0, 2))        # time-major for the kernel
    kernel = functools.partial(gru_model_kernel, hidden=H)
    vmem = pl.BlockSpec(memory_space=pltpu.MemorySpace.VMEM)
    args = (x_tbf,
            params["l0"]["w_ihE_f"], params["l0"]["w_ihE_b"],
            params["l0"]["w_hh"], params["l0"]["b"], params["l0"]["b_hn"],
            params["l1"]["w_ihE_f"], params["l1"]["w_ihE_b"],
            params["l1"]["w_hh"], params["l1"]["b"], params["l1"]["b_hn"],
            params["linear"]["w"], params["linear"]["b"])
    out_tbc = pl.pallas_call(
        kernel,
        out_shape=jax.ShapeDtypeStruct((T, B, num_classes), jnp.float32),
        in_specs=[vmem] * len(args),
        out_specs=vmem,
        scratch_shapes=[pltpu.VMEM((T, B, H), jnp.float32)] * 4,
    )(*args)
    return jnp.transpose(out_tbc, (1, 0, 2))


# ----------------------------------------------------------------------------
# Parameter construction: packed / embedded layouts for the kernel plus the
# raw per-direction parameters for a pure-JAX reference check.
# Packed column order: [r_f | r_b | z_f | z_b | n_f | n_b], each block width H.
# ----------------------------------------------------------------------------
def init_gru_model_params(key, num_features, num_classes, gru_size):
    H = gru_size

    def uni(k, shape, scale):
        return jax.random.uniform(k, shape, jnp.float32, -scale, scale)

    packed = {}
    raw = {"layers": []}
    in_dims = [num_features, 2 * H]
    scale = 1.0 / math.sqrt(H)
    for layer, in_dim in enumerate(in_dims):
        w_ihE = [jnp.zeros((in_dim, 6 * H), jnp.float32) for _ in range(2)]
        w_hh_p = jnp.zeros((2 * H, 6 * H), jnp.float32)     # block-diag packed
        b_p = jnp.zeros((1, 6 * H), jnp.float32)            # combined biases
        b_hn_p = jnp.zeros((1, 2 * H), jnp.float32)
        raw_dirs = []
        for d in range(2):                                   # 0 = fwd, 1 = bwd
            key, k1, k2, k3, k4 = jax.random.split(key, 5)
            w_ih = uni(k1, (in_dim, 3 * H), scale)           # cols [r|z|n]
            w_hh = uni(k2, (H, 3 * H), scale)
            b_ih = uni(k3, (3 * H,), scale)
            b_hh = uni(k4, (3 * H,), scale)
            raw_dirs.append(dict(w_ih=w_ih, w_hh=w_hh, b_ih=b_ih, b_hh=b_hh))
            for g in range(3):                               # r, z, n
                c = g * 2 * H + d * H
                w_ihE[d] = w_ihE[d].at[:, c:c + H].set(w_ih[:, g * H:(g + 1) * H])
                w_hh_p = w_hh_p.at[d * H:(d + 1) * H, c:c + H].set(
                    w_hh[:, g * H:(g + 1) * H])
                if g < 2:   # r, z: fold b_ih + b_hh into the hoisted projection
                    b_p = b_p.at[0, c:c + H].set(
                        b_ih[g * H:(g + 1) * H] + b_hh[g * H:(g + 1) * H])
                else:       # n: only b_in goes into the projection
                    b_p = b_p.at[0, c:c + H].set(b_ih[g * H:(g + 1) * H])
            b_hn_p = b_hn_p.at[0, d * H:(d + 1) * H].set(b_hh[2 * H:])
        packed[f"l{layer}"] = dict(
            w_ihE_f=w_ihE[0].astype(jnp.bfloat16),   # (in_dim, 6H)
            w_ihE_b=w_ihE[1].astype(jnp.bfloat16),   # (in_dim, 6H)
            w_hh=w_hh_p.astype(jnp.bfloat16),        # (2H, 6H) block-diag
            b=b_p,                                   # (1, 6H) f32
            b_hn=b_hn_p)                             # (1, 2H) f32
        raw["layers"].append(raw_dirs)

    key, k1, k2 = jax.random.split(key, 3)
    lin_scale = 1.0 / math.sqrt(2 * H)
    w_lin = uni(k1, (2 * H, num_classes), lin_scale)
    b_lin = uni(k2, (1, num_classes), lin_scale)
    packed["linear"] = dict(w=w_lin.astype(jnp.bfloat16), b=b_lin)
    raw["linear"] = dict(w=w_lin, b=b_lin)
    return packed, raw


# ----------------------------------------------------------------------------
# Pure-JAX reference (mirrors torch.nn.GRU semantics) for a tolerance check.
# ----------------------------------------------------------------------------
def gru_model_reference(raw, x_btf, gru_size):
    H = gru_size
    x_tb = jnp.transpose(x_btf, (1, 0, 2))
    T, B, _ = x_tb.shape

    def run_dir(inp_tb, p, reverse):
        h = jnp.zeros((B, H), jnp.float32)
        outs = [None] * T
        steps = range(T - 1, -1, -1) if reverse else range(T)
        for t in steps:
            gx = inp_tb[t] @ p["w_ih"] + p["b_ih"]
            gh = h @ p["w_hh"] + p["b_hh"]
            r = jax.nn.sigmoid(gx[:, :H] + gh[:, :H])
            z = jax.nn.sigmoid(gx[:, H:2 * H] + gh[:, H:2 * H])
            n = jnp.tanh(gx[:, 2 * H:] + r * gh[:, 2 * H:])
            h = (1.0 - z) * n + z * h
            outs[t] = h
        return jnp.stack(outs, axis=0)                       # (T, B, H)

    cur = x_tb
    for dirs in raw["layers"]:
        fwd = run_dir(cur, dirs[0], reverse=False)
        bwd = run_dir(cur, dirs[1], reverse=True)
        cur = jnp.concatenate([fwd, bwd], axis=-1)           # (T, B, 2H)
    logits = cur @ raw["linear"]["w"] + raw["linear"]["b"]
    probs = jax.nn.softmax(logits, axis=-1)
    return jnp.transpose(probs, (1, 0, 2))                   # (B, T, C)


if __name__ == "__main__":
    num_features = 16
    num_classes = 5
    gru_size = 32
    batch, seq = 2, 8

    key = jax.random.PRNGKey(0)
    key, pkey, xkey = jax.random.split(key, 3)
    params, raw = init_gru_model_params(pkey, num_features, num_classes, gru_size)
    x = jax.random.normal(xkey, (batch, seq, num_features), jnp.float32)

    fwd = jax.jit(functools.partial(gru_model_forward, gru_size=gru_size,
                                    num_classes=num_classes))
    out = fwd(params, x)
    jax.block_until_ready(out)

    assert out.shape == (batch, seq, num_classes)
    assert bool(jnp.all(jnp.isfinite(out)))
    row_sums = jnp.sum(out, axis=-1)
    assert bool(jnp.all(jnp.abs(row_sums - 1.0) < 1e-3))

    # Parity with the f32 reference (bf16 matmul operands -> small deviation).
    ref = gru_model_reference(raw, x, gru_size)
    max_err = float(jnp.max(jnp.abs(out - ref)))
    assert max_err < 2e-2, f"max abs error vs reference: {max_err}"
    print("KERNEL_OK")
</pallas_src>

<mosaic_0001>
module attributes {stable_mosaic.version = 11 : i64} {
  func.func @gru_model_kernel(%arg0: memref<8x2x16xf32, #tpu.memory_space<vmem>>, %arg1: memref<16x192xbf16, #tpu.memory_space<vmem>>, %arg2: memref<16x192xbf16, #tpu.memory_space<vmem>>, %arg3: memref<64x192xbf16, #tpu.memory_space<vmem>>, %arg4: memref<1x192xf32, #tpu.memory_space<vmem>>, %arg5: memref<1x64xf32, #tpu.memory_space<vmem>>, %arg6: memref<64x192xbf16, #tpu.memory_space<vmem>>, %arg7: memref<64x192xbf16, #tpu.memory_space<vmem>>, %arg8: memref<64x192xbf16, #tpu.memory_space<vmem>>, %arg9: memref<1x192xf32, #tpu.memory_space<vmem>>, %arg10: memref<1x64xf32, #tpu.memory_space<vmem>>, %arg11: memref<64x5xbf16, #tpu.memory_space<vmem>>, %arg12: memref<1x5xf32, #tpu.memory_space<vmem>>, %arg13: memref<8x2x5xf32, #tpu.memory_space<vmem>>, %arg14: memref<8x2x32xf32, #tpu.memory_space<vmem>>, %arg15: memref<8x2x32xf32, #tpu.memory_space<vmem>>, %arg16: memref<8x2x32xf32, #tpu.memory_space<vmem>>, %arg17: memref<8x2x32xf32, #tpu.memory_space<vmem>>) attributes {dimension_semantics = [], scalar_prefetch = 0 : i64, scratch_operands = 4 : i64, tpu.core_type = #tpu.core_type<tc>} {
    %c0 = arith.constant 0 : index
    %c0_0 = arith.constant 0 : index
    %c0_1 = arith.constant 0 : index
    %0 = vector.load %arg0[%c0, %c0_0, %c0_1] : memref<8x2x16xf32, #tpu.memory_space<vmem>>, vector<8x2x16xf32>
    %1 = arith.truncf %0 : vector<8x2x16xf32> to vector<8x2x16xbf16>
    %2 = vector.shape_cast %1 : vector<8x2x16xbf16> to vector<16x16xbf16>
    %c0_2 = arith.constant 0 : index
    %c0_3 = arith.constant 0 : index
    %3 = vector.load %arg1[%c0_2, %c0_3] : memref<16x192xbf16, #tpu.memory_space<vmem>>, vector<16x192xbf16>
    %cst = arith.constant dense<0.000000e+00> : vector<16x192xf32>
    %4 = tpu.matmul %2, %3, %cst {dimension_numbers = #tpu.dot_dimension_numbers<[1], [0], [0], [1], [0, 0, 1, 1], [], []>} : vector<16x16xbf16>, vector<16x192xbf16>, vector<16x192xf32> -> vector<16x192xf32>
    %c0_4 = arith.constant 0 : index
    %c0_5 = arith.constant 0 : index
    %5 = vector.load %arg4[%c0_4, %c0_5] : memref<1x192xf32, #tpu.memory_space<vmem>>, vector<1x192xf32>
    %6 = vector.broadcast %5 : vector<1x192xf32> to vector<16x192xf32>
    %7 = arith.addf %4, %6 : vector<16x192xf32>
    %8 = vector.shape_cast %7 : vector<16x192xf32> to vector<8x2x192xf32>
    %c0_6 = arith.constant 0 : index
    %c0_7 = arith.constant 0 : index
    %9 = vector.load %arg2[%c0_6, %c0_7] : memref<16x192xbf16, #tpu.memory_space<vmem>>, vector<16x192xbf16>
    %cst_8 = arith.constant dense<0.000000e+00> : vector<16x192xf32>
    %10 = tpu.matmul %2, %9, %cst_8 {dimension_numbers = #tpu.dot_dimension_numbers<[1], [0], [0], [1], [0, 0, 1, 1], [], []>} : vector<16x16xbf16>, vector<16x192xbf16>, vector<16x192xf32> -> vector<16x192xf32>
    %11 = vector.shape_cast %10 : vector<16x192xf32> to vector<8x2x192xf32>
    %c0_9 = arith.constant 0 : index
    %c0_10 = arith.constant 0 : index
    %12 = vector.load %arg3[%c0_9, %c0_10] : memref<64x192xbf16, #tpu.memory_space<vmem>>, vector<64x192xbf16>
    %c0_11 = arith.constant 0 : index
    %c0_12 = arith.constant 0 : index
    %13 = vector.load %arg5[%c0_11, %c0_12] : memref<1x64xf32, #tpu.memory_space<vmem>>, vector<1x64xf32>
    %14 = vector.shape_cast %13 : vector<1x64xf32> to vector<1x64xf32>
    %15 = vector.broadcast %14 : vector<1x64xf32> to vector<2x64xf32>
    %cst_13 = arith.constant 0.000000e+00 : f32
    %16 = vector.broadcast %cst_13 : f32 to vector<2x64xf32>
    %17 = arith.truncf %16 : vector<2x64xf32> to vector<2x64xbf16>
    %cst_14 = arith.constant dense<0.000000e+00> : vector<2x192xf32>
    %18 = tpu.matmul %17, %12, %cst_14 {dimension_numbers = #tpu.dot_dimension_numbers<[1], [0], [0], [1], [0, 0, 1, 1], [], []>} : vector<2x64xbf16>, vector<64x192xbf16>, vector<2x192xf32> -> vector<2x192xf32>
    %19 = vector.extract_strided_slice %8 {offsets = [0, 0, 0], sizes = [1, 2, 192], strides = [1, 1, 1]} : vector<8x2x192xf32> to vector<1x2x192xf32>
    %20 = vector.shape_cast %19 : vector<1x2x192xf32> to vector<2x192xf32>
    %21 = vector.extract_strided_slice %11 {offsets = [7, 0, 0], sizes = [1, 2, 192], strides = [1, 1, 1]} : vector<8x2x192xf32> to vector<1x2x192xf32>
    %22 = vector.shape_cast %21 : vector<1x2x192xf32> to vector<2x192xf32>
    %23 = arith.addf %20, %22 : vector<2x192xf32>
    %24 = vector.extract_strided_slice %23 {offsets = [0, 0], sizes = [2, 128], strides = [1, 1]} : vector<2x192xf32> to vector<2x128xf32>
    %25 = vector.extract_strided_slice %18 {offsets = [0, 0], sizes = [2, 128], strides = [1, 1]} : vector<2x192xf32> to vector<2x128xf32>
    %26 = arith.addf %24, %25 : vector<2x128xf32>
    %27 = arith.negf %26 : vector<2x128xf32>
    %28 = math.exp %27 : vector<2x128xf32>
    %cst_15 = arith.constant 1.000000e+00 : f32
    %29 = vector.broadcast %cst_15 : f32 to vector<2x128xf32>
    %30 = arith.addf %29, %28 : vector<2x128xf32>
    %31 = arith.divf %29, %30 : vector<2x128xf32>
    %32 = vector.extract_strided_slice %31 {offsets = [0, 0], sizes = [2, 64], strides = [1, 1]} : vector<2x128xf32> to vector<2x64xf32>
    %33 = vector.extract_strided_slice %31 {offsets = [0, 64], sizes = [2, 64], strides = [1, 1]} : vector<2x128xf32> to vector<2x64xf32>
    %34 = vector.extract_strided_slice %23 {offsets = [0, 128], sizes = [2, 64], strides = [1, 1]} : vector<2x192xf32> to vector<2x64xf32>
    %35 = vector.extract_strided_slice %18 {offsets = [0, 128], sizes = [2, 64], strides = [1, 1]} : vector<2x192xf32> to vector<2x64xf32>
    %36 = arith.addf %35, %15 : vector<2x64xf32>
    %37 = arith.mulf %32, %36 : vector<2x64xf32>
    %38 = arith.addf %34, %37 : vector<2x64xf32>
    %39 = math.tanh %38 : vector<2x64xf32>
    %40 = arith.subf %16, %39 : vector<2x64xf32>
    %41 = arith.mulf %33, %40 : vector<2x64xf32>
    %42 = arith.addf %39, %41 : vector<2x64xf32>
    %43 = vector.extract_strided_slice %42 {offsets = [0, 0], sizes = [2, 32], strides = [1, 1]} : vector<2x64xf32> to vector<2x32xf32>
    %c0_16 = arith.constant 0 : index
    %c0_17 = arith.constant 0 : index
    %c0_18 = arith.constant 0 : index
    %44 = vector.load %arg14[%c0_16, %c0_17, %c0_18] : memref<8x2x32xf32, #tpu.memory_space<vmem>>, vector<1x2x32xf32>
    %45 = vector.shape_cast %44 : vector<1x2x32xf32> to vector<2x32xf32>
    %46 = vector.shape_cast %43 : vector<2x32xf32> to vector<1x2x32xf32>
    tpu.vector_store %arg14[%c0_16, %c0_17, %c0_18], %46 {strides = array<i32>} : memref<8x2x32xf32, #tpu.memory_space<vmem>>, vector<1x2x32xf32>,
    %47 = vector.extract_strided_slice %42 {offsets = [0, 32], sizes = [2, 32], strides = [1, 1]} : vector<2x64xf32> to vector<2x32xf32>
    %c7 = arith.constant 7 : index
    %c0_19 = arith.constant 0 : index
    %c0_20 = arith.constant 0 : index
    %48 = vector.load %arg15[%c7, %c0_19, %c0_20] : memref<8x2x32xf32, #tpu.memory_space<vmem>>, vector<1x2x32xf32>
    %49 = vector.shape_cast %48 : vector<1x2x32xf32> to vector<2x32xf32>
    %50 = vector.shape_cast %47 : vector<2x32xf32> to vector<1x2x32xf32>
    tpu.vector_store %arg15[%c7, %c0_19, %c0_20], %50 {strides = array<i32>} : memref<8x2x32xf32, #tpu.memory_space<vmem>>, vector<1x2x32xf32>,
    %51 = arith.truncf %42 : vector<2x64xf32> to vector<2x64xbf16>
    %cst_21 = arith.constant dense<0.000000e+00> : vector<2x192xf32>
    %52 = tpu.matmul %51, %12, %cst_21 {dimension_numbers = #tpu.dot_dimension_numbers<[1], [0], [0], [1], [0, 0, 1, 1], [], []>} : vector<2x64xbf16>, vector<64x192xbf16>, vector<2x192xf32> -> vector<2x192xf32>
    %53 = vector.extract_strided_slice %8 {offsets = [1, 0, 0], sizes = [1, 2, 192], strides = [1, 1, 1]} : vector<8x2x192xf32> to vector<1x2x192xf32>
    %54 = vector.shape_cast %53 : vector<1x2x192xf32> to vector<2x192xf32>
    %55 = vector.extract_strided_slice %11 {offsets = [6, 0, 0], sizes = [1, 2, 192], strides = [1, 1, 1]} : vector<8x2x192xf32> to vector<1x2x192xf32>
    %56 = vector.shape_cast %55 : vector<1x2x192xf32> to vector<2x192xf32>
    %57 = arith.addf %54, %56 : vector<2x192xf32>
    %58 = vector.extract_strided_slice %57 {offsets = [0, 0], sizes = [2, 128], strides = [1, 1]} : vector<2x192xf32> to vector<2x128xf32>
    %59 = vector.extract_strided_slice %52 {offsets = [0, 0], sizes = [2, 128], strides = [1, 1]} : vector<2x192xf32> to vector<2x128xf32>
    %60 = arith.addf %58, %59 : vector<2x128xf32>
    %61 = arith.negf %60 : vector<2x128xf32>
    %62 = math.exp %61 : vector<2x128xf32>
    %cst_22 = arith.constant 1.000000e+00 : f32
    %63 = vector.broadcast %cst_22 : f32 to vector<2x128xf32>
    %64 = arith.addf %63, %62 : vector<2x128xf32>
    %65 = arith.divf %63, %64 : vector<2x128xf32>
    %66 = vector.extract_strided_slice %65 {offsets = [0, 0], sizes = [2, 64], strides = [1, 1]} : vector<2x128xf32> to vector<2x64xf32>
    %67 = vector.extract_strided_slice %65 {offsets = [0, 64], sizes = [2, 64], strides = [1, 1]} : vector<2x128xf32> to vector<2x64xf32>
    %68 = vector.extract_strided_slice %57 {offsets = [0, 128], sizes = [2, 64], strides = [1, 1]} : vector<2x192xf32> to vector<2x64xf32>
    %69 = vector.extract_strided_slice %52 {offsets = [0, 128], sizes = [2, 64], strides = [1, 1]} : vector<2x192xf32> to vector<2x64xf32>
    %70 = arith.addf %69, %15 : vector<2x64xf32>
    %71 = arith.mulf %66, %70 : vector<2x64xf32>
    %72 = arith.addf %68, %71 : vector<2x64xf32>
    %73 = math.tanh %72 : vector<2x64xf32>
    %74 = arith.subf %42, %73 : vector<2x64xf32>
    %75 = arith.mulf %67, %74 : vector<2x64xf32>
    %76 = arith.addf %73, %75 : vector<2x64xf32>
    %77 = vector.extract_strided_slice %76 {offsets = [0, 0], sizes = [2, 32], strides = [1, 1]} : vector<2x64xf32> to vector<2x32xf32>
    %c1 = arith.constant 1 : index
    %c0_23 = arith.constant 0 : index
    %c0_24 = arith.constant 0 : index
    %78 = vector.load %arg14[%c1, %c0_23, %c0_24] : memref<8x2x32xf32, #tpu.memory_space<vmem>>, vector<1x2x32xf32>
    %79 = vector.shape_cast %78 : vector<1x2x32xf32> to vector<2x32xf32>
    %80 = vector.shape_cast %77 : vector<2x32xf32> to vector<1x2x32xf32>
    tpu.vector_store %arg14[%c1, %c0_23, %c0_24], %80 {strides = array<i32>} : memref<8x2x32xf32, #tpu.memory_space<vmem>>, vector<1x2x32xf32>,
    %81 = vector.extract_strided_slice %76 {offsets = [0, 32], sizes = [2, 32], strides = [1, 1]} : vector<2x64xf32> to vector<2x32xf32>
    %c6 = arith.constant 6 : index
    %c0_25 = arith.constant 0 : index
    %c0_26 = arith.constant 0 : index
    %82 = vector.load %arg15[%c6, %c0_25, %c0_26] : memref<8x2x32xf32, #tpu.memory_space<vmem>>, vector<1x2x32xf32>
    %83 = vector.shape_cast %82 : vector<1x2x32xf32> to vector<2x32xf32>
    %84 = vector.shape_cast %81 : vector<2x32xf32> to vector<1x2x32xf32>
    tpu.vector_store %arg15[%c6, %c0_25, %c0_26], %84 {strides = array<i32>} : memref<8x2x32xf32, #tpu.memory_space<vmem>>, vector<1x2x32xf32>,
    %85 = arith.truncf %76 : vector<2x64xf32> to vector<2x64xbf16>
    %cst_27 = arith.constant dense<0.000000e+00> : vector<2x192xf32>
    %86 = tpu.matmul %85, %12, %cst_27 {dimension_numbers = #tpu.dot_dimension_numbers<[1], [0], [0], [1], [0, 0, 1, 1], [], []>} : vector<2x64xbf16>, vector<64x192xbf16>, vector<2x192xf32> -> vector<2x192xf32>
    %87 = vector.extract_strided_slice %8 {offsets = [2, 0, 0], sizes = [1, 2, 192], strides = [1, 1, 1]} : vector<8x2x192xf32> to vector<1x2x192xf32>
    %88 = vector.shape_cast %87 : vector<1x2x192xf32> to vector<2x192xf32>
    %89 = vector.extract_strided_slice %11 {offsets = [5, 0, 0], sizes = [1, 2, 192], strides = [1, 1, 1]} : vector<8x2x192xf32> to vector<1x2x192xf32>
    %90 = vector.shape_cast %89 : vector<1x2x192xf32> to vector<2x192xf32>
    %91 = arith.addf %88, %90 : vector<2x192xf32>
    %92 = vector.extract_strided_slice %91 {offsets = [0, 0], sizes = [2, 128], strides = [1, 1]} : vector<2x192xf32> to vector<2x128xf32>
    %93 = vector.extract_strided_slice %86 {offsets = [0, 0], sizes = [2, 128], strides = [1, 1]} : vector<2x192xf32> to vector<2x128xf32>
    %94 = arith.addf %92, %93 : vector<2x128xf32>
    %95 = arith.negf %94 : vector<2x128xf32>
    %96 = math.exp %95 : vector<2x128xf32>
    %cst_28 = arith.constant 1.000000e+00 : f32
    %97 = vector.broadcast %cst_28 : f32 to vector<2x128xf32>
    %98 = arith.addf %97, %96 : vector<2x128xf32>
    %99 = arith.divf %97, %98 : vector<2x128xf32>
    %100 = vector.extract_strided_slice %99 {offsets = [0, 0], sizes = [2, 64], strides = [1, 1]} : vector<2x128xf32> to vector<2x64xf32>
    %101 = vector.extract_strided_slice %99 {offsets = [0, 64], sizes = [2, 64], strides = [1, 1]} : vector<2x128xf32> to vector<2x64xf32>
    %102 = vector.extract_strided_slice %91 {offsets = [0, 128], sizes = [2, 64], strides = [1, 1]} : vector<2x192xf32> to vector<2x64xf32>
    %103 = vector.extract_strided_slice %86 {offsets = [0, 128], sizes = [2, 64], strides = [1, 1]} : vector<2x192xf32> to vector<2x64xf32>
    %104 = arith.addf %103, %15 : vector<2x64xf32>
    %105 = arith.mulf %100, %104 : vector<2x64xf32>
    %106 = arith.addf %102, %105 : vector<2x64xf32>
    %107 = math.tanh %106 : vector<2x64xf32>
    %108 = arith.subf %76, %107 : vector<2x64xf32>
    %109 = arith.mulf %101, %108 : vector<2x64xf32>
    %110 = arith.addf %107, %109 : vector<2x64xf32>
    %111 = vector.extract_strided_slice %110 {offsets = [0, 0], sizes = [2, 32], strides = [1, 1]} : vector<2x64xf32> to vector<2x32xf32>
    %c2 = arith.constant 2 : index
    %c0_29 = arith.constant 0 : index
    %c0_30 = arith.constant 0 : index
    %112 = vector.load %arg14[%c2, %c0_29, %c0_30] : memref<8x2x32xf32, #tpu.memory_space<vmem>>, vector<1x2x32xf32>
    %113 = vector.shape_cast %112 : vector<1x2x32xf32> to vector<2x32xf32>
    %114 = vector.shape_cast %111 : vector<2x32xf32> to vector<1x2x32xf32>
    tpu.vector_store %arg14[%c2, %c0_29, %c0_30], %114 {strides = array<i32>} : memref<8x2x32xf32, #tpu.memory_space<vmem>>, vector<1x2x32xf32>,
    %115 = vector.extract_strided_slice %110 {offsets = [0, 32], sizes = [2, 32], strides = [1, 1]} : vector<2x64xf32> to vector<2x32xf32>
    %c5 = arith.constant 5 : index
    %c0_31 = arith.constant 0 : index
    %c0_32 = arith.constant 0 : index
    %116 = vector.load %arg15[%c5, %c0_31, %c0_32] : memref<8x2x32xf32, #tpu.memory_space<vmem>>, vector<1x2x32xf32>
    %117 = vector.shape_cast %116 : vector<1x2x32xf32> to vector<2x32xf32>
    %118 = vector.shape_cast %115 : vector<2x32xf32> to vector<1x2x32xf32>
    tpu.vector_store %arg15[%c5, %c0_31, %c0_32], %118 {strides = array<i32>} : memref<8x2x32xf32, #tpu.memory_space<vmem>>, vector<1x2x32xf32>,
    %119 = arith.truncf %110 : vector<2x64xf32> to vector<2x64xbf16>
    %cst_33 = arith.constant dense<0.000000e+00> : vector<2x192xf32>
    %120 = tpu.matmul %119, %12, %cst_33 {dimension_numbers = #tpu.dot_dimension_numbers<[1], [0], [0], [1], [0, 0, 1, 1], [], []>} : vector<2x64xbf16>, vector<64x192xbf16>, vector<2x192xf32> -> vector<2x192xf32>
    %121 = vector.extract_strided_slice %8 {offsets = [3, 0, 0], sizes = [1, 2, 192], strides = [1, 1, 1]} : vector<8x2x192xf32> to vector<1x2x192xf32>
    %122 = vector.shape_cast %121 : vector<1x2x192xf32> to vector<2x192xf32>
    %123 = vector.extract_strided_slice %11 {offsets = [4, 0, 0], sizes = [1, 2, 192], strides = [1, 1, 1]} : vector<8x2x192xf32> to vector<1x2x192xf32>
    %124 = vector.shape_cast %123 : vector<1x2x192xf32> to vector<2x192xf32>
    %125 = arith.addf %122, %124 : vector<2x192xf32>
    %126 = vector.extract_strided_slice %125 {offsets = [0, 0], sizes = [2, 128], strides = [1, 1]} : vector<2x192xf32> to vector<2x128xf32>
    %127 = vector.extract_strided_slice %120 {offsets = [0, 0], sizes = [2, 128], strides = [1, 1]} : vector<2x192xf32> to vector<2x128xf32>
    %128 = arith.addf %126, %127 : vector<2x128xf32>
    %129 = arith.negf %128 : vector<2x128xf32>
    %130 = math.exp %129 : vector<2x128xf32>
    %cst_34 = arith.constant 1.000000e+00 : f32
    %131 = vector.broadcast %cst_34 : f32 to vector<2x128xf32>
    %132 = arith.addf %131, %130 : vector<2x128xf32>
    %133 = arith.divf %131, %132 : vector<2x128xf32>
    %134 = vector.extract_strided_slice %133 {offsets = [0, 0], sizes = [2, 64], strides = [1, 1]} : vector<2x128xf32> to vector<2x64xf32>
    %135 = vector.extract_strided_slice %133 {offsets = [0, 64], sizes = [2, 64], strides = [1, 1]} : vector<2x128xf32> to vector<2x64xf32>
    %136 = vector.extract_strided_slice %125 {offsets = [0, 128], sizes = [2, 64], strides = [1, 1]} : vector<2x192xf32> to vector<2x64xf32>
    %137 = vector.extract_strided_slice %120 {offsets = [0, 128], sizes = [2, 64], strides = [1, 1]} : vector<2x192xf32> to vector<2x64xf32>
    %138 = arith.addf %137, %15 : vector<2x64xf32>
    %139 = arith.mulf %134, %138 : vector<2x64xf32>
    %140 = arith.addf %136, %139 : vector<2x64xf32>
    %141 = math.tanh %140 : vector<2x64xf32>
    %142 = arith.subf %110, %141 : vector<2x64xf32>
    %143 = arith.mulf %135, %142 : vector<2x64xf32>
    %144 = arith.addf %141, %143 : vector<2x64xf32>
    %145 = vector.extract_strided_slice %144 {offsets = [0, 0], sizes = [2, 32], strides = [1, 1]} : vector<2x64xf32> to vector<2x32xf32>
    %c3 = arith.constant 3 : index
    %c0_35 = arith.constant 0 : index
    %c0_36 = arith.constant 0 : index
    %146 = vector.load %arg14[%c3, %c0_35, %c0_36] : memref<8x2x32xf32, #tpu.memory_space<vmem>>, vector<1x2x32xf32>
    %147 = vector.shape_cast %146 : vector<1x2x32xf32> to vector<2x32xf32>
    %148 = vector.shape_cast %145 : vector<2x32xf32> to vector<1x2x32xf32>
    tpu.vector_store %arg14[%c3, %c0_35, %c0_36], %148 {strides = array<i32>} : memref<8x2x32xf32, #tpu.memory_space<vmem>>, vector<1x2x32xf32>,
    %149 = vector.extract_strided_slice %144 {offsets = [0, 32], sizes = [2, 32], strides = [1, 1]} : vector<2x64xf32> to vector<2x32xf32>
    %c4 = arith.constant 4 : index
    %c0_37 = arith.constant 0 : index
    %c0_38 = arith.constant 0 : index
    %150 = vector.load %arg15[%c4, %c0_37, %c0_38] : memref<8x2x32xf32, #tpu.memory_space<vmem>>, vector<1x2x32xf32>
    %151 = vector.shape_cast %150 : vector<1x2x32xf32> to vector<2x32xf32>
    %152 = vector.shape_cast %149 : vector<2x32xf32> to vector<1x2x32xf32>
    tpu.vector_store %arg15[%c4, %c0_37, %c0_38], %152 {strides = array<i32>} : memref<8x2x32xf32, #tpu.memory_space<vmem>>, vector<1x2x32xf32>,
    %153 = arith.truncf %144 : vector<2x64xf32> to vector<2x64xbf16>
    %cst_39 = arith.constant dense<0.000000e+00> : vector<2x192xf32>
    %154 = tpu.matmul %153, %12, %cst_39 {dimension_numbers = #tpu.dot_dimension_numbers<[1], [0], [0], [1], [0, 0, 1, 1], [], []>} : vector<2x64xbf16>, vector<64x192xbf16>, vector<2x192xf32> -> vector<2x192xf32>
    %155 = vector.extract_strided_slice %8 {offsets = [4, 0, 0], sizes = [1, 2, 192], strides = [1, 1, 1]} : vector<8x2x192xf32> to vector<1x2x192xf32>
    %156 = vector.shape_cast %155 : vector<1x2x192xf32> to vector<2x192xf32>
    %157 = vector.extract_strided_slice %11 {offsets = [3, 0, 0], sizes = [1, 2, 192], strides = [1, 1, 1]} : vector<8x2x192xf32> to vector<1x2x192xf32>
    %158 = vector.shape_cast %157 : vector<1x2x192xf32> to vector<2x192xf32>
    %159 = arith.addf %156, %158 : vector<2x192xf32>
    %160 = vector.extract_strided_slice %159 {offsets = [0, 0], sizes = [2, 128], strides = [1, 1]} : vector<2x192xf32> to vector<2x128xf32>
    %161 = vector.extract_strided_slice %154 {offsets = [0, 0], sizes = [2, 128], strides = [1, 1]} : vector<2x192xf32> to vector<2x128xf32>
    %162 = arith.addf %160, %161 : vector<2x128xf32>
    %163 = arith.negf %162 : vector<2x128xf32>
    %164 = math.exp %163 : vector<2x128xf32>
    %cst_40 = arith.constant 1.000000e+00 : f32
    %165 = vector.broadcast %cst_40 : f32 to vector<2x128xf32>
    %166 = arith.addf %165, %164 : vector<2x128xf32>
    %167 = arith.divf %165, %166 : vector<2x128xf32>
    %168 = vector.extract_strided_slice %167 {offsets = [0, 0], sizes = [2, 64], strides = [1, 1]} : vector<2x128xf32> to vector<2x64xf32>
    %169 = vector.extract_strided_slice %167 {offsets = [0, 64], sizes = [2, 64], strides = [1, 1]} : vector<2x128xf32> to vector<2x64xf32>
    %170 = vector.extract_strided_slice %159 {offsets = [0, 128], sizes = [2, 64], strides = [1, 1]} : vector<2x192xf32> to vector<2x64xf32>
    %171 = vector.extract_strided_slice %154 {offsets = [0, 128], sizes = [2, 64], strides = [1, 1]} : vector<2x192xf32> to vector<2x64xf32>
    %172 = arith.addf %171, %15 : vector<2x64xf32>
    %173 = arith.mulf %168, %172 : vector<2x64xf32>
    %174 = arith.addf %170, %173 : vector<2x64xf32>
    %175 = math.tanh %174 : vector<2x64xf32>
    %176 = arith.subf %144, %175 : vector<2x64xf32>
    %177 = arith.mulf %169, %176 : vector<2x64xf32>
    %178 = arith.addf %175, %177 : vector<2x64xf32>
    %179 = vector.extract_strided_slice %178 {offsets = [0, 0], sizes = [2, 32], strides = [1, 1]} : vector<2x64xf32> to vector<2x32xf32>
    %c4_41 = arith.constant 4 : index
    %c0_42 = arith.constant 0 : index
    %c0_43 = arith.constant 0 : index
    %180 = vector.load %arg14[%c4_41, %c0_42, %c0_43] : memref<8x2x32xf32, #tpu.memory_space<vmem>>, vector<1x2x32xf32>
    %181 = vector.shape_cast %180 : vector<1x2x32xf32> to vector<2x32xf32>
    %182 = vector.shape_cast %179 : vector<2x32xf32> to vector<1x2x32xf32>
    tpu.vector_store %arg14[%c4_41, %c0_42, %c0_43], %182 {strides = array<i32>} : memref<8x2x32xf32, #tpu.memory_space<vmem>>, vector<1x2x32xf32>,
    %183 = vector.extract_strided_slice %178 {offsets = [0, 32], sizes = [2, 32], strides = [1, 1]} : vector<2x64xf32> to vector<2x32xf32>
    %c3_44 = arith.constant 3 : index
    %c0_45 = arith.constant 0 : index
    %c0_46 = arith.constant 0 : index
    %184 = vector.load %arg15[%c3_44, %c0_45, %c0_46] : memref<8x2x32xf32, #tpu.memory_space<vmem>>, vector<1x2x32xf32>
    %185 = vector.shape_cast %184 : vector<1x2x32xf32> to vector<2x32xf32>
    %186 = vector.shape_cast %183 : vector<2x32xf32> to vector<1x2x32xf32>
    tpu.vector_store %arg15[%c3_44, %c0_45, %c0_46], %186 {strides = array<i32>} : memref<8x2x32xf32, #tpu.memory_space<vmem>>, vector<1x2x32xf32>,
    %187 = arith.truncf %178 : vector<2x64xf32> to vector<2x64xbf16>
    %cst_47 = arith.constant dense<0.000000e+00> : vector<2x192xf32>
    %188 = tpu.matmul %187, %12, %cst_47 {dimension_numbers = #tpu.dot_dimension_numbers<[1], [0], [0], [1], [0, 0, 1, 1], [], []>} : vector<2x64xbf16>, vector<64x192xbf16>, vector<2x192xf32> -> vector<2x192xf32>
    %189 = vector.extract_strided_slice %8 {offsets = [5, 0, 0], sizes = [1, 2, 192], strides = [1, 1, 1]} : vector<8x2x192xf32> to vector<1x2x192xf32>
    %190 = vector.shape_cast %189 : vector<1x2x192xf32> to vector<2x192xf32>
    %191 = vector.extract_strided_slice %11 {offsets = [2, 0, 0], sizes = [1, 2, 192], strides = [1, 1, 1]} : vector<8x2x192xf32> to vector<1x2x192xf32>
    %192 = vector.shape_cast %191 : vector<1x2x192xf32> to vector<2x192xf32>
    %193 = arith.addf %190, %192 : vector<2x192xf32>
    %194 = vector.extract_strided_slice %193 {offsets = [0, 0], sizes = [2, 128], strides = [1, 1]} : vector<2x192xf32> to vector<2x128xf32>
    %195 = vector.extract_strided_slice %188 {offsets = [0, 0], sizes = [2, 128], strides = [1, 1]} : vector<2x192xf32> to vector<2x128xf32>
    %196 = arith.addf %194, %195 : vector<2x128xf32>
    %197 = arith.negf %196 : vector<2x128xf32>
    %198 = math.exp %197 : vector<2x128xf32>
    %cst_48 = arith.constant 1.000000e+00 : f32
    %199 = vector.broadcast %cst_48 : f32 to vector<2x128xf32>
    %200 = arith.addf %199, %198 : vector<2x128xf32>
    %201 = arith.divf %199, %200 : vector<2x128xf32>
    %202 = vector.extract_strided_slice %201 {offsets = [0, 0], sizes = [2, 64], strides = [1, 1]} : vector<2x128xf32> to vector<2x64xf32>
    %203 = vector.extract_strided_slice %201 {offsets = [0, 64], sizes = [2, 64], strides = [1, 1]} : vector<2x128xf32> to vector<2x64xf32>
    %204 = vector.extract_strided_slice %193 {offsets = [0, 128], sizes = [2, 64], strides = [1, 1]} : vector<2x192xf32> to vector<2x64xf32>
    %205 = vector.extract_strided_slice %188 {offsets = [0, 128], sizes = [2, 64], strides = [1, 1]} : vector<2x192xf32> to vector<2x64xf32>
    %206 = arith.addf %205, %15 : vector<2x64xf32>
    %207 = arith.mulf %202, %206 : vector<2x64xf32>
    %208 = arith.addf %204, %207 : vector<2x64xf32>
    %209 = math.tanh %208 : vector<2x64xf32>
    %210 = arith.subf %178, %209 : vector<2x64xf32>
    %211 = arith.mulf %203, %210 : vector<2x64xf32>
    %212 = arith.addf %209, %211 : vector<2x64xf32>
    %213 = vector.extract_strided_slice %212 {offsets = [0, 0], sizes = [2, 32], strides = [1, 1]} : vector<2x64xf32> to vector<2x32xf32>
    %c5_49 = arith.constant 5 : index
    %c0_50 = arith.constant 0 : index
    %c0_51 = arith.constant 0 : index
    %214 = vector.load %arg14[%c5_49, %c0_50, %c0_51] : memref<8x2x32xf32, #tpu.memory_space<vmem>>, vector<1x2x32xf32>
    %215 = vector.shape_cast %214 : vector<1x2x32xf32> to vector<2x32xf32>
    %216 = vector.shape_cast %213 : vector<2x32xf32> to vector<1x2x32xf32>
    tpu.vector_store %arg14[%c5_49, %c0_50, %c0_51], %216 {strides = array<i32>} : memref<8x2x32xf32, #tpu.memory_space<vmem>>, vector<1x2x32xf32>,
    %217 = vector.extract_strided_slice %212 {offsets = [0, 32], sizes = [2, 32], strides = [1, 1]} : vector<2x64xf32> to vector<2x32xf32>
    %c2_52 = arith.constant 2 : index
    %c0_53 = arith.constant 0 : index
    %c0_54 = arith.constant 0 : index
    %218 = vector.load %arg15[%c2_52, %c0_53, %c0_54] : memref<8x2x32xf32, #tpu.memory_space<vmem>>, vector<1x2x32xf32>
    %219 = vector.shape_cast %218 : vector<1x2x32xf32> to vector<2x32xf32>
    %220 = vector.shape_cast %217 : vector<2x32xf32> to vector<1x2x32xf32>
    tpu.vector_store %arg15[%c2_52, %c0_53, %c0_54], %220 {strides = array<i32>} : memref<8x2x32xf32, #tpu.memory_space<vmem>>, vector<1x2x32xf32>,
    %221 = arith.truncf %212 : vector<2x64xf32> to vector<2x64xbf16>
    %cst_55 = arith.constant dense<0.000000e+00> : vector<2x192xf32>
    %222 = tpu.matmul %221, %12, %cst_55 {dimension_numbers = #tpu.dot_dimension_numbers<[1], [0], [0], [1], [0, 0, 1, 1], [], []>} : vector<2x64xbf16>, vector<64x192xbf16>, vector<2x192xf32> -> vector<2x192xf32>
    %223 = vector.extract_strided_slice %8 {offsets = [6, 0, 0], sizes = [1, 2, 192], strides = [1, 1, 1]} : vector<8x2x192xf32> to vector<1x2x192xf32>
    %224 = vector.shape_cast %223 : vector<1x2x192xf32> to vector<2x192xf32>
    %225 = vector.extract_strided_slice %11 {offsets = [1, 0, 0], sizes = [1, 2, 192], strides = [1, 1, 1]} : vector<8x2x192xf32> to vector<1x2x192xf32>
    %226 = vector.shape_cast %225 : vector<1x2x192xf32> to vector<2x192xf32>
    %227 = arith.addf %224, %226 : vector<2x192xf32>
    %228 = vector.extract_strided_slice %227 {offsets = [0, 0], sizes = [2, 128], strides = [1, 1]} : vector<2x192xf32> to vector<2x128xf32>
    %229 = vector.extract_strided_slice %222 {offsets = [0, 0], sizes = [2, 128], strides = [1, 1]} : vector<2x192xf32> to vector<2x128xf32>
    %230 = arith.addf %228, %229 : vector<2x128xf32>
    %231 = arith.negf %230 : vector<2x128xf32>
    %232 = math.exp %231 : vector<2x128xf32>
    %cst_56 = arith.constant 1.000000e+00 : f32
    %233 = vector.broadcast %cst_56 : f32 to vector<2x128xf32>
    %234 = arith.addf %233, %232 : vector<2x128xf32>
    %235 = arith.divf %233, %234 : vector<2x128xf32>
    %236 = vector.extract_strided_slice %235 {offsets = [0, 0], sizes = [2, 64], strides = [1, 1]} : vector<2x128xf32> to vector<2x64xf32>
    %237 = vector.extract_strided_slice %235 {offsets = [0, 64], sizes = [2, 64], strides = [1, 1]} : vector<2x128xf32> to vector<2x64xf32>
    %238 = vector.extract_strided_slice %227 {offsets = [0, 128], sizes = [2, 64], strides = [1, 1]} : vector<2x192xf32> to vector<2x64xf32>
    %239 = vector.extract_strided_slice %222 {offsets = [0, 128], sizes = [2, 64], strides = [1, 1]} : vector<2x192xf32> to vector<2x64xf32>
    %240 = arith.addf %239, %15 : vector<2x64xf32>
    %241 = arith.mulf %236, %240 : vector<2x64xf32>
    %242 = arith.addf %238, %241 : vector<2x64xf32>
    %243 = math.tanh %242 : vector<2x64xf32>
    %244 = arith.subf %212, %243 : vector<2x64xf32>
    %245 = arith.mulf %237, %244 : vector<2x64xf32>
    %246 = arith.addf %243, %245 : vector<2x64xf32>
    %247 = vector.extract_strided_slice %246 {offsets = [0, 0], sizes = [2, 32], strides = [1, 1]} : vector<2x64xf32> to vector<2x32xf32>
    %c6_57 = arith.constant 6 : index
    %c0_58 = arith.constant 0 : index
    %c0_59 = arith.constant 0 : index
    %248 = vector.load %arg14[%c6_57, %c0_58, %c0_59] : memref<8x2x32xf32, #tpu.memory_space<vmem>>, vector<1x2x32xf32>
    %249 = vector.shape_cast %248 : vector<1x2x32xf32> to vector<2x32xf32>
    %250 = vector.shape_cast %247 : vector<2x32xf32> to vector<1x2x32xf32>
    tpu.vector_store %arg14[%c6_57, %c0_58, %c0_59], %250 {strides = array<i32>} : memref<8x2x32xf32, #tpu.memory_space<vmem>>, vector<1x2x32xf32>,
    %251 = vector.extract_strided_slice %246 {offsets = [0, 32], sizes = [2, 32], strides = [1, 1]} : vector<2x64xf32> to vector<2x32xf32>
    %c1_60 = arith.constant 1 : index
    %c0_61 = arith.constant 0 : index
    %c0_62 = arith.constant 0 : index
    %252 = vector.load %arg15[%c1_60, %c0_61, %c0_62] : memref<8x2x32xf32, #tpu.memory_space<vmem>>, vector<1x2x32xf32>
    %253 = vector.shape_cast %252 : vector<1x2x32xf32> to vector<2x32xf32>
    %254 = vector.shape_cast %251 : vector<2x32xf32> to vector<1x2x32xf32>
    tpu.vector_store %arg15[%c1_60, %c0_61, %c0_62], %254 {strides = array<i32>} : memref<8x2x32xf32, #tpu.memory_space<vmem>>, vector<1x2x32xf32>,
    %255 = arith.truncf %246 : vector<2x64xf32> to vector<2x64xbf16>
    %cst_63 = arith.constant dense<0.000000e+00> : vector<2x192xf32>
    %256 = tpu.matmul %255, %12, %cst_63 {dimension_numbers = #tpu.dot_dimension_numbers<[1], [0], [0], [1], [0, 0, 1, 1], [], []>} : vector<2x64xbf16>, vector<64x192xbf16>, vector<2x192xf32> -> vector<2x192xf32>
    %257 = vector.extract_strided_slice %8 {offsets = [7, 0, 0], sizes = [1, 2, 192], strides = [1, 1, 1]} : vector<8x2x192xf32> to vector<1x2x192xf32>
    %258 = vector.shape_cast %257 : vector<1x2x192xf32> to vector<2x192xf32>
    %259 = vector.extract_strided_slice %11 {offsets = [0, 0, 0], sizes = [1, 2, 192], strides = [1, 1, 1]} : vector<8x2x192xf32> to vector<1x2x192xf32>
    %260 = vector.shape_cast %259 : vector<1x2x192xf32> to vector<2x192xf32>
    %261 = arith.addf %258, %260 : vector<2x192xf32>
    %262 = vector.extract_strided_slice %261 {offsets = [0, 0], sizes = [2, 128], strides = [1, 1]} : vector<2x192xf32> to vector<2x128xf32>
    %263 = vector.extract_strided_slice %256 {offsets = [0, 0], sizes = [2, 128], strides = [1, 1]} : vector<2x192xf32> to vector<2x128xf32>
    %264 = arith.addf %262, %263 : vector<2x128xf32>
    %265 = arith.negf %264 : vector<2x128xf32>
    %266 = math.exp %265 : vector<2x128xf32>
    %cst_64 = arith.constant 1.000000e+00 : f32
    %267 = vector.broadcast %cst_64 : f32 to vector<2x128xf32>
    %268 = arith.addf %267, %266 : vector<2x128xf32>
    %269 = arith.divf %267, %268 : vector<2x128xf32>
    %270 = vector.extract_strided_slice %269 {offsets = [0, 0], sizes = [2, 64], strides = [1, 1]} : vector<2x128xf32> to vector<2x64xf32>
    %271 = vector.extract_strided_slice %269 {offsets = [0, 64], sizes = [2, 64], strides = [1, 1]} : vector<2x128xf32> to vector<2x64xf32>
    %272 = vector.extract_strided_slice %261 {offsets = [0, 128], sizes = [2, 64], strides = [1, 1]} : vector<2x192xf32> to vector<2x64xf32>
    %273 = vector.extract_strided_slice %256 {offsets = [0, 128], sizes = [2, 64], strides = [1, 1]} : vector<2x192xf32> to vector<2x64xf32>
    %274 = arith.addf %273, %15 : vector<2x64xf32>
    %275 = arith.mulf %270, %274 : vector<2x64xf32>
    %276 = arith.addf %272, %275 : vector<2x64xf32>
    %277 = math.tanh %276 : vector<2x64xf32>
    %278 = arith.subf %246, %277 : vector<2x64xf32>
    %279 = arith.mulf %271, %278 : vector<2x64xf32>
    %280 = arith.addf %277, %279 : vector<2x64xf32>
    %281 = vector.extract_strided_slice %280 {offsets = [0, 0], sizes = [2, 32], strides = [1, 1]} : vector<2x64xf32> to vector<2x32xf32>
    %c7_65 = arith.constant 7 : index
    %c0_66 = arith.constant 0 : index
    %c0_67 = arith.constant 0 : index
    %282 = vector.load %arg14[%c7_65, %c0_66, %c0_67] : memref<8x2x32xf32, #tpu.memory_space<vmem>>, vector<1x2x32xf32>
    %283 = vector.shape_cast %282 : vector<1x2x32xf32> to vector<2x32xf32>
    %284 = vector.shape_cast %281 : vector<2x32xf32> to vector<1x2x32xf32>
    tpu.vector_store %arg14[%c7_65, %c0_66, %c0_67], %284 {strides = array<i32>} : memref<8x2x32xf32, #tpu.memory_space<vmem>>, vector<1x2x32xf32>,
    %285 = vector.extract_strided_slice %280 {offsets = [0, 32], sizes = [2, 32], strides = [1, 1]} : vector<2x64xf32> to vector<2x32xf32>
    %c0_68 = arith.constant 0 : index
    %c0_69 = arith.constant 0 : index
    %c0_70 = arith.constant 0 : index
    %286 = vector.load %arg15[%c0_68, %c0_69, %c0_70] : memref<8x2x32xf32, #tpu.memory_space<vmem>>, vector<1x2x32xf32>
    %287 = vector.shape_cast %286 : vector<1x2x32xf32> to vector<2x32xf32>
    %288 = vector.shape_cast %285 : vector<2x32xf32> to vector<1x2x32xf32>
    tpu.vector_store %arg15[%c0_68, %c0_69, %c0_70], %288 {strides = array<i32>} : memref<8x2x32xf32, #tpu.memory_space<vmem>>, vector<1x2x32xf32>,
    %c0_71 = arith.constant 0 : index
    %c0_72 = arith.constant 0 : index
    %c0_73 = arith.constant 0 : index
    %289 = vector.load %arg14[%c0_71, %c0_72, %c0_73] : memref<8x2x32xf32, #tpu.memory_space<vmem>>, vector<8x2x32xf32>
    %290 = arith.truncf %289 : vector<8x2x32xf32> to vector<8x2x32xbf16>
    %291 = vector.shape_cast %290 : vector<8x2x32xbf16> to vector<16x32xbf16>
    %c0_74 = arith.constant 0 : index
    %c0_75 = arith.constant 0 : index
    %c0_76 = arith.constant 0 : index
    %292 = vector.load %arg15[%c0_74, %c0_75, %c0_76] : memref<8x2x32xf32, #tpu.memory_space<vmem>>, vector<8x2x32xf32>
    %293 = arith.truncf %292 : vector<8x2x32xf32> to vector<8x2x32xbf16>
    %294 = vector.shape_cast %293 : vector<8x2x32xbf16> to vector<16x32xbf16>
    %c0_77 = arith.constant 0 : index
    %c0_78 = arith.constant 0 : index
    %295 = vector.load %arg6[%c0_77, %c0_78] : memref<64x192xbf16, #tpu.memory_space<vmem>>, vector<64x192xbf16>
    %c0_79 = arith.constant 0 : index
    %c0_80 = arith.constant 0 : index
    %296 = vector.load %arg7[%c0_79, %c0_80] : memref<64x192xbf16, #tpu.memory_space<vmem>>, vector<64x192xbf16>
    %297 = vector.extract_strided_slice %295 {offsets = [0, 0], sizes = [32, 192], strides = [1, 1]} : vector<64x192xbf16> to vector<32x192xbf16>
    %cst_81 = arith.constant dense<0.000000e+00> : vector<16x192xf32>
    %298 = tpu.matmul %291, %297, %cst_81 {dimension_numbers = #tpu.dot_dimension_numbers<[1], [0], [0], [1], [0, 0, 1, 1], [], []>} : vector<16x32xbf16>, vector<32x192xbf16>, vector<16x192xf32> -> vector<16x192xf32>
    %299 = vector.extract_strided_slice %295 {offsets = [32, 0], sizes = [32, 192], strides = [1, 1]} : vector<64x192xbf16> to vector<32x192xbf16>
    %cst_82 = arith.constant dense<0.000000e+00> : vector<16x192xf32>
    %300 = tpu.matmul %294, %299, %cst_82 {dimension_numbers = #tpu.dot_dimension_numbers<[1], [0], [0], [1], [0, 0, 1, 1], [], []>} : vector<16x32xbf16>, vector<32x192xbf16>, vector<16x192xf32> -> vector<16x192xf32>
    %301 = arith.addf %298, %300 : vector<16x192xf32>
    %c0_83 = arith.constant 0 : index
    %c0_84 = arith.constant 0 : index
    %302 = vector.load %arg9[%c0_83, %c0_84] : memref<1x192xf32, #tpu.memory_space<vmem>>, vector<1x192xf32>
    %303 = vector.broadcast %302 : vector<1x192xf32> to vector<16x192xf32>
    %304 = arith.addf %301, %303 : vector<16x192xf32>
    %305 = vector.shape_cast %304 : vector<16x192xf32> to vector<8x2x192xf32>
    %306 = vector.extract_strided_slice %296 {offsets = [0, 0], sizes = [32, 192], strides = [1, 1]} : vector<64x192xbf16> to vector<32x192xbf16>
    %cst_85 = arith.constant dense<0.000000e+00> : vector<16x192xf32>
    %307 = tpu.matmul %291, %306, %cst_85 {dimension_numbers = #tpu.dot_dimension_numbers<[1], [0], [0], [1], [0, 0, 1, 1], [], []>} : vector<16x32xbf16>, vector<32x192xbf16>, vector<16x192xf32> -> vector<16x192xf32>
    %308 = vector.extract_strided_slice %296 {offsets = [32, 0], sizes = [32, 192], strides = [1, 1]} : vector<64x192xbf16> to vector<32x192xbf16>
    %cst_86 = arith.constant dense<0.000000e+00> : vector<16x192xf32>
    %309 = tpu.matmul %294, %308, %cst_86 {dimension_numbers = #tpu.dot_dimension_numbers<[1], [0], [0], [1], [0, 0, 1, 1], [], []>} : vector<16x32xbf16>, vector<32x192xbf16>, vector<16x192xf32> -> vector<16x192xf32>
    %310 = arith.addf %307, %309 : vector<16x192xf32>
    %311 = vector.shape_cast %310 : vector<16x192xf32> to vector<8x2x192xf32>
    %c0_87 = arith.constant 0 : index
    %c0_88 = arith.constant 0 : index
    %312 = vector.load %arg8[%c0_87, %c0_88] : memref<64x192xbf16, #tpu.memory_space<vmem>>, vector<64x192xbf16>
    %c0_89 = arith.constant 0 : index
    %c0_90 = arith.constant 0 : index
    %313 = vector.load %arg10[%c0_89, %c0_90] : memref<1x64xf32, #tpu.memory_space<vmem>>, vector<1x64xf32>
    %314 = vector.shape_cast %313 : vector<1x64xf32> to vector<1x64xf32>
    %315 = vector.broadcast %314 : vector<1x64xf32> to vector<2x64xf32>
    %cst_91 = arith.constant 0.000000e+00 : f32
    %316 = vector.broadcast %cst_91 : f32 to vector<2x64xf32>
    %317 = arith.truncf %316 : vector<2x64xf32> to vector<2x64xbf16>
    %cst_92 = arith.constant dense<0.000000e+00> : vector<2x192xf32>
    %318 = tpu.matmul %317, %312, %cst_92 {dimension_numbers = #tpu.dot_dimension_numbers<[1], [0], [0], [1], [0, 0, 1, 1], [], []>} : vector<2x64xbf16>, vector<64x192xbf16>, vector<2x192xf32> -> vector<2x192xf32>
    %319 = vector.extract_strided_slice %305 {offsets = [0, 0, 0], sizes = [1, 2, 192], strides = [1, 1, 1]} : vector<8x2x192xf32> to vector<1x2x192xf32>
    %320 = vector.shape_cast %319 : vector<1x2x192xf32> to vector<2x192xf32>
    %321 = vector.extract_strided_slice %311 {offsets = [7, 0, 0], sizes = [1, 2, 192], strides = [1, 1, 1]} : vector<8x2x192xf32> to vector<1x2x192xf32>
    %322 = vector.shape_cast %321 : vector<1x2x192xf32> to vector<2x192xf32>
    %323 = arith.addf %320, %322 : vector<2x192xf32>
    %324 = vector.extract_strided_slice %323 {offsets = [0, 0], sizes = [2, 128], strides = [1, 1]} : vector<2x192xf32> to vector<2x128xf32>
    %325 = vector.extract_strided_slice %318 {offsets = [0, 0], sizes = [2, 128], strides = [1, 1]} : vector<2x192xf32> to vector<2x128xf32>
    %326 = arith.addf %324, %325 : vector<2x128xf32>
    %327 = arith.negf %326 : vector<2x128xf32>
    %328 = math.exp %327 : vector<2x128xf32>
    %cst_93 = arith.constant 1.000000e+00 : f32
    %329 = vector.broadcast %cst_93 : f32 to vector<2x128xf32>
    %330 = arith.addf %329, %328 : vector<2x128xf32>
    %331 = arith.divf %329, %330 : vector<2x128xf32>
    %332 = vector.extract_strided_slice %331 {offsets = [0, 0], sizes = [2, 64], strides = [1, 1]} : vector<2x128xf32> to vector<2x64xf32>
    %333 = vector.extract_strided_slice %331 {offsets = [0, 64], sizes = [2, 64], strides = [1, 1]} : vector<2x128xf32> to vector<2x64xf32>
    %334 = vector.extract_strided_slice %323 {offsets = [0, 128], sizes = [2, 64], strides = [1, 1]} : vector<2x192xf32> to vector<2x64xf32>
    %335 = vector.extract_strided_slice %318 {offsets = [0, 128], sizes = [2, 64], strides = [1, 1]} : vector<2x192xf32> to vector<2x64xf32>
    %336 = arith.addf %335, %315 : vector<2x64xf32>
    %337 = arith.mulf %332, %336 : vector<2x64xf32>
    %338 = arith.addf %334, %337 : vector<2x64xf32>
    %339 = math.tanh %338 : vector<2x64xf32>
    %340 = arith.subf %316, %339 : vector<2x64xf32>
    %341 = arith.mulf %333, %340 : vector<2x64xf32>
    %342 = arith.addf %339, %341 : vector<2x64xf32>
    %343 = vector.extract_strided_slice %342 {offsets = [0, 0], sizes = [2, 32], strides = [1, 1]} : vector<2x64xf32> to vector<2x32xf32>
    %c0_94 = arith.constant 0 : index
    %c0_95 = arith.constant 0 : index
    %c0_96 = arith.constant 0 : index
    %344 = vector.load %arg16[%c0_94, %c0_95, %c0_96] : memref<8x2x32xf32, #tpu.memory_space<vmem>>, vector<1x2x32xf32>
    %345 = vector.shape_cast %344 : vector<1x2x32xf32> to vector<2x32xf32>
    %346 = vector.shape_cast %343 : vector<2x32xf32> to vector<1x2x32xf32>
    tpu.vector_store %arg16[%c0_94, %c0_95, %c0_96], %346 {strides = array<i32>} : memref<8x2x32xf32, #tpu.memory_space<vmem>>, vector<1x2x32xf32>,
    %347 = vector.extract_strided_slice %342 {offsets = [0, 32], sizes = [2, 32], strides = [1, 1]} : vector<2x64xf32> to vector<2x32xf32>
    %c7_97 = arith.constant 7 : index
    %c0_98 = arith.constant 0 : index
    %c0_99 = arith.constant 0 : index
    %348 = vector.load %arg17[%c7_97, %c0_98, %c0_99] : memref<8x2x32xf32, #tpu.memory_space<vmem>>, vector<1x2x32xf32>
    %349 = vector.shape_cast %348 : vector<1x2x32xf32> to vector<2x32xf32>
    %350 = vector.shape_cast %347 : vector<2x32xf32> to vector<1x2x32xf32>
    tpu.vector_store %arg17[%c7_97, %c0_98, %c0_99], %350 {strides = array<i32>} : memref<8x2x32xf32, #tpu.memory_space<vmem>>, vector<1x2x32xf32>,
    %351 = arith.truncf %342 : vector<2x64xf32> to vector<2x64xbf16>
    %cst_100 = arith.constant dense<0.000000e+00> : vector<2x192xf32>
    %352 = tpu.matmul %351, %312, %cst_100 {dimension_numbers = #tpu.dot_dimension_numbers<[1], [0], [0], [1], [0, 0, 1, 1], [], []>} : vector<2x64xbf16>, vector<64x192xbf16>, vector<2x192xf32> -> vector<2x192xf32>
    %353 = vector.extract_strided_slice %305 {offsets = [1, 0, 0], sizes = [1, 2, 192], strides = [1, 1, 1]} : vector<8x2x192xf32> to vector<1x2x192xf32>
    %354 = vector.shape_cast %353 : vector<1x2x192xf32> to vector<2x192xf32>
    %355 = vector.extract_strided_slice %311 {offsets = [6, 0, 0], sizes = [1, 2, 192], strides = [1, 1, 1]} : vector<8x2x192xf32> to vector<1x2x192xf32>
    %356 = vector.shape_cast %355 : vector<1x2x192xf32> to vector<2x192xf32>
    %357 = arith.addf %354, %356 : vector<2x192xf32>
    %358 = vector.extract_strided_slice %357 {offsets = [0, 0], sizes = [2, 128], strides = [1, 1]} : vector<2x192xf32> to vector<2x128xf32>
    %359 = vector.extract_strided_slice %352 {offsets = [0, 0], sizes = [2, 128], strides = [1, 1]} : vector<2x192xf32> to vector<2x128xf32>
    %360 = arith.addf %358, %359 : vector<2x128xf32>
    %361 = arith.negf %360 : vector<2x128xf32>
    %362 = math.exp %361 : vector<2x128xf32>
    %cst_101 = arith.constant 1.000000e+00 : f32
    %363 = vector.broadcast %cst_101 : f32 to vector<2x128xf32>
    %364 = arith.addf %363, %362 : vector<2x128xf32>
    %365 = arith.divf %363, %364 : vector<2x128xf32>
    %366 = vector.extract_strided_slice %365 {offsets = [0, 0], sizes = [2, 64], strides = [1, 1]} : vector<2x128xf32> to vector<2x64xf32>
    %367 = vector.extract_strided_slice %365 {offsets = [0, 64], sizes = [2, 64], strides = [1, 1]} : vector<2x128xf32> to vector<2x64xf32>
    %368 = vector.extract_strided_slice %357 {offsets = [0, 128], sizes = [2, 64], strides = [1, 1]} : vector<2x192xf32> to vector<2x64xf32>
    %369 = vector.extract_strided_slice %352 {offsets = [0, 128], sizes = [2, 64], strides = [1, 1]} : vector<2x192xf32> to vector<2x64xf32>
    %370 = arith.addf %369, %315 : vector<2x64xf32>
    %371 = arith.mulf %366, %370 : vector<2x64xf32>
    %372 = arith.addf %368, %371 : vector<2x64xf32>
    %373 = math.tanh %372 : vector<2x64xf32>
    %374 = arith.subf %342, %373 : vector<2x64xf32>
    %375 = arith.mulf %367, %374 : vector<2x64xf32>
    %376 = arith.addf %373, %375 : vector<2x64xf32>
    %377 = vector.extract_strided_slice %376 {offsets = [0, 0], sizes = [2, 32], strides = [1, 1]} : vector<2x64xf32> to vector<2x32xf32>
    %c1_102 = arith.constant 1 : index
    %c0_103 = arith.constant 0 : index
    %c0_104 = arith.constant 0 : index
    %378 = vector.load %arg16[%c1_102, %c0_103, %c0_104] : memref<8x2x32xf32, #tpu.memory_space<vmem>>, vector<1x2x32xf32>
    %379 = vector.shape_cast %378 : vector<1x2x32xf32> to vector<2x32xf32>
    %380 = vector.shape_cast %377 : vector<2x32xf32> to vector<1x2x32xf32>
    tpu.vector_store %arg16[%c1_102, %c0_103, %c0_104], %380 {strides = array<i32>} : memref<8x2x32xf32, #tpu.memory_space<vmem>>, vector<1x2x32xf32>,
    %381 = vector.extract_strided_slice %376 {offsets = [0, 32], sizes = [2, 32], strides = [1, 1]} : vector<2x64xf32> to vector<2x32xf32>
    %c6_105 = arith.constant 6 : index
    %c0_106 = arith.constant 0 : index
    %c0_107 = arith.constant 0 : index
    %382 = vector.load %arg17[%c6_105, %c0_106, %c0_107] : memref<8x2x32xf32, #tpu.memory_space<vmem>>, vector<1x2x32xf32>
    %383 = vector.shape_cast %382 : vector<1x2x32xf32> to vector<2x32xf32>
    %384 = vector.shape_cast %381 : vector<2x32xf32> to vector<1x2x32xf32>
    tpu.vector_store %arg17[%c6_105, %c0_106, %c0_107], %384 {strides = array<i32>} : memref<8x2x32xf32, #tpu.memory_space<vmem>>, vector<1x2x32xf32>,
    %385 = arith.truncf %376 : vector<2x64xf32> to vector<2x64xbf16>
    %cst_108 = arith.constant dense<0.000000e+00> : vector<2x192xf32>
    %386 = tpu.matmul %385, %312, %cst_108 {dimension_numbers = #tpu.dot_dimension_numbers<[1], [0], [0], [1], [0, 0, 1, 1], [], []>} : vector<2x64xbf16>, vector<64x192xbf16>, vector<2x192xf32> -> vector<2x192xf32>
    %387 = vector.extract_strided_slice %305 {offsets = [2, 0, 0], sizes = [1, 2, 192], strides = [1, 1, 1]} : vector<8x2x192xf32> to vector<1x2x192xf32>
    %388 = vector.shape_cast %387 : vector<1x2x192xf32> to vector<2x192xf32>
    %389 = vector.extract_strided_slice %311 {offsets = [5, 0, 0], sizes = [1, 2, 192], strides = [1, 1, 1]} : vector<8x2x192xf32> to vector<1x2x192xf32>
    %390 = vector.shape_cast %389 : vector<1x2x192xf32> to vector<2x192xf32>
    %391 = arith.addf %388, %390 : vector<2x192xf32>
    %392 = vector.extract_strided_slice %391 {offsets = [0, 0], sizes = [2, 128], strides = [1, 1]} : vector<2x192xf32> to vector<2x128xf32>
    %393 = vector.extract_strided_slice %386 {offsets = [0, 0], sizes = [2, 128], strides = [1, 1]} : vector<2x192xf32> to vector<2x128xf32>
    %394 = arith.addf %392, %393 : vector<2x128xf32>
    %395 = arith.negf %394 : vector<2x128xf32>
    %396 = math.exp %395 : vector<2x128xf32>
    %cst_109 = arith.constant 1.000000e+00 : f32
    %397 = vector.broadcast %cst_109 : f32 to vector<2x128xf32>
    %398 = arith.addf %397, %396 : vector<2x128xf32>
    %399 = arith.divf %397, %398 : vector<2x128xf32>
    %400 = vector.extract_strided_slice %399 {offsets = [0, 0], sizes = [2, 64], strides = [1, 1]} : vector<2x128xf32> to vector<2x64xf32>
    %401 = vector.extract_strided_slice %399 {offsets = [0, 64], sizes = [2, 64], strides = [1, 1]} : vector<2x128xf32> to vector<2x64xf32>
    %402 = vector.extract_strided_slice %391 {offsets = [0, 128], sizes = [2, 64], strides = [1, 1]} : vector<2x192xf32> to vector<2x64xf32>
    %403 = vector.extract_strided_slice %386 {offsets = [0, 128], sizes = [2, 64], strides = [1, 1]} : vector<2x192xf32> to vector<2x64xf32>
    %404 = arith.addf %403, %315 : vector<2x64xf32>
    %405 = arith.mulf %400, %404 : vector<2x64xf32>
    %406 = arith.addf %402, %405 : vector<2x64xf32>
    %407 = math.tanh %406 : vector<2x64xf32>
    %408 = arith.subf %376, %407 : vector<2x64xf32>
    %409 = arith.mulf %401, %408 : vector<2x64xf32>
    %410 = arith.addf %407, %409 : vector<2x64xf32>
    %411 = vector.extract_strided_slice %410 {offsets = [0, 0], sizes = [2, 32], strides = [1, 1]} : vector<2x64xf32> to vector<2x32xf32>
    %c2_110 = arith.constant 2 : index
    %c0_111 = arith.constant 0 : index
    %c0_112 = arith.constant 0 : index
    %412 = vector.load %arg16[%c2_110, %c0_111, %c0_112] : memref<8x2x32xf32, #tpu.memory_space<vmem>>, vector<1x2x32xf32>
    %413 = vector.shape_cast %412 : vector<1x2x32xf32> to vector<2x32xf32>
    %414 = vector.shape_cast %411 : vector<2x32xf32> to vector<1x2x32xf32>
    tpu.vector_store %arg16[%c2_110, %c0_111, %c0_112], %414 {strides = array<i32>} : memref<8x2x32xf32, #tpu.memory_space<vmem>>, vector<1x2x32xf32>,
    %415 = vector.extract_strided_slice %410 {offsets = [0, 32], sizes = [2, 32], strides = [1, 1]} : vector<2x64xf32> to vector<2x32xf32>
    %c5_113 = arith.constant 5 : index
    %c0_114 = arith.constant 0 : index
    %c0_115 = arith.constant 0 : index
    %416 = vector.load %arg17[%c5_113, %c0_114, %c0_115] : memref<8x2x32xf32, #tpu.memory_space<vmem>>, vector<1x2x32xf32>
    %417 = vector.shape_cast %416 : vector<1x2x32xf32> to vector<2x32xf32>
    %418 = vector.shape_cast %415 : vector<2x32xf32> to vector<1x2x32xf32>
    tpu.vector_store %arg17[%c5_113, %c0_114, %c0_115], %418 {strides = array<i32>} : memref<8x2x32xf32, #tpu.memory_space<vmem>>, vector<1x2x32xf32>,
    %419 = arith.truncf %410 : vector<2x64xf32> to vector<2x64xbf16>
    %cst_116 = arith.constant dense<0.000000e+00> : vector<2x192xf32>
    %420 = tpu.matmul %419, %312, %cst_116 {dimension_numbers = #tpu.dot_dimension_numbers<[1], [0], [0], [1], [0, 0, 1, 1], [], []>} : vector<2x64xbf16>, vector<64x192xbf16>, vector<2x192xf32> -> vector<2x192xf32>
    %421 = vector.extract_strided_slice %305 {offsets = [3, 0, 0], sizes = [1, 2, 192], strides = [1, 1, 1]} : vector<8x2x192xf32> to vector<1x2x192xf32>
    %422 = vector.shape_cast %421 : vector<1x2x192xf32> to vector<2x192xf32>
    %423 = vector.extract_strided_slice %311 {offsets = [4, 0, 0], sizes = [1, 2, 192], strides = [1, 1, 1]} : vector<8x2x192xf32> to vector<1x2x192xf32>
    %424 = vector.shape_cast %423 : vector<1x2x192xf32> to vector<2x192xf32>
    %425 = arith.addf %422, %424 : vector<2x192xf32>
    %426 = vector.extract_strided_slice %425 {offsets = [0, 0], sizes = [2, 128], strides = [1, 1]} : vector<2x192xf32> to vector<2x128xf32>
    %427 = vector.extract_strided_slice %420 {offsets = [0, 0], sizes = [2, 128], strides = [1, 1]} : vector<2x192xf32> to vector<2x128xf32>
    %428 = arith.addf %426, %427 : vector<2x128xf32>
    %429 = arith.negf %428 : vector<2x128xf32>
    %430 = math.exp %429 : vector<2x128xf32>
    %cst_117 = arith.constant 1.000000e+00 : f32
    %431 = vector.broadcast %cst_117 : f32 to vector<2x128xf32>
    %432 = arith.addf %431, %430 : vector<2x128xf32>
    %433 = arith.divf %431, %432 : vector<2x128xf32>
    %434 = vector.extract_strided_slice %433 {offsets = [0, 0], sizes = [2, 64], strides = [1, 1]} : vector<2x128xf32> to vector<2x64xf32>
    %435 = vector.extract_strided_slice %433 {offsets = [0, 64], sizes = [2, 64], strides = [1, 1]} : vector<2x128xf32> to vector<2x64xf32>
    %436 = vector.extract_strided_slice %425 {offsets = [0, 128], sizes = [2, 64], strides = [1, 1]} : vector<2x192xf32> to vector<2x64xf32>
    %437 = vector.extract_strided_slice %420 {offsets = [0, 128], sizes = [2, 64], strides = [1, 1]} : vector<2x192xf32> to vector<2x64xf32>
    %438 = arith.addf %437, %315 : vector<2x64xf32>
    %439 = arith.mulf %434, %438 : vector<2x64xf32>
    %440 = arith.addf %436, %439 : vector<2x64xf32>
    %441 = math.tanh %440 : vector<2x64xf32>
    %442 = arith.subf %410, %441 : vector<2x64xf32>
    %443 = arith.mulf %435, %442 : vector<2x64xf32>
    %444 = arith.addf %441, %443 : vector<2x64xf32>
    %445 = vector.extract_strided_slice %444 {offsets = [0, 0], sizes = [2, 32], strides = [1, 1]} : vector<2x64xf32> to vector<2x32xf32>
    %c3_118 = arith.constant 3 : index
    %c0_119 = arith.constant 0 : index
    %c0_120 = arith.constant 0 : index
    %446 = vector.load %arg16[%c3_118, %c0_119, %c0_120] : memref<8x2x32xf32, #tpu.memory_space<vmem>>, vector<1x2x32xf32>
    %447 = vector.shape_cast %446 : vector<1x2x32xf32> to vector<2x32xf32>
    %448 = vector.shape_cast %445 : vector<2x32xf32> to vector<1x2x32xf32>
    tpu.vector_store %arg16[%c3_118, %c0_119, %c0_120], %448 {strides = array<i32>} : memref<8x2x32xf32, #tpu.memory_space<vmem>>, vector<1x2x32xf32>,
    %449 = vector.extract_strided_slice %444 {offsets = [0, 32], sizes = [2, 32], strides = [1, 1]} : vector<2x64xf32> to vector<2x32xf32>
    %c4_121 = arith.constant 4 : index
    %c0_122 = arith.constant 0 : index
    %c0_123 = arith.constant 0 : index
    %450 = vector.load %arg17[%c4_121, %c0_122, %c0_123] : memref<8x2x32xf32, #tpu.memory_space<vmem>>, vector<1x2x32xf32>
    %451 = vector.shape_cast %450 : vector<1x2x32xf32> to vector<2x32xf32>
    %452 = vector.shape_cast %449 : vector<2x32xf32> to vector<1x2x32xf32>
    tpu.vector_store %arg17[%c4_121, %c0_122, %c0_123], %452 {strides = array<i32>} : memref<8x2x32xf32, #tpu.memory_space<vmem>>, vector<1x2x32xf32>,
    %453 = arith.truncf %444 : vector<2x64xf32> to vector<2x64xbf16>
    %cst_124 = arith.constant dense<0.000000e+00> : vector<2x192xf32>
    %454 = tpu.matmul %453, %312, %cst_124 {dimension_numbers = #tpu.dot_dimension_numbers<[1], [0], [0], [1], [0, 0, 1, 1], [], []>} : vector<2x64xbf16>, vector<64x192xbf16>, vector<2x192xf32> -> vector<2x192xf32>
    %455 = vector.extract_strided_slice %305 {offsets = [4, 0, 0], sizes = [1, 2, 192], strides = [1, 1, 1]} : vector<8x2x192xf32> to vector<1x2x192xf32>
    %456 = vector.shape_cast %455 : vector<1x2x192xf32> to vector<2x192xf32>
    %457 = vector.extract_strided_slice %311 {offsets = [3, 0, 0], sizes = [1, 2, 192], strides = [1, 1, 1]} : vector<8x2x192xf32> to vector<1x2x192xf32>
    %458 = vector.shape_cast %457 : vector<1x2x192xf32> to vector<2x192xf32>
    %459 = arith.addf %456, %458 : vector<2x192xf32>
    %460 = vector.extract_strided_slice %459 {offsets = [0, 0], sizes = [2, 128], strides = [1, 1]} : vector<2x192xf32> to vector<2x128xf32>
    %461 = vector.extract_strided_slice %454 {offsets = [0, 0], sizes = [2, 128], strides = [1, 1]} : vector<2x192xf32> to vector<2x128xf32>
    %462 = arith.addf %460, %461 : vector<2x128xf32>
    %463 = arith.negf %462 : vector<2x128xf32>
    %464 = math.exp %463 : vector<2x128xf32>
    %cst_125 = arith.constant 1.000000e+00 : f32
    %465 = vector.broadcast %cst_125 : f32 to vector<2x128xf32>
    %466 = arith.addf %465, %464 : vector<2x128xf32>
    %467 = arith.divf %465, %466 : vector<2x128xf32>
    %468 = vector.extract_strided_slice %467 {offsets = [0, 0], sizes = [2, 64], strides = [1, 1]} : vector<2x128xf32> to vector<2x64xf32>
    %469 = vector.extract_strided_slice %467 {offsets = [0, 64], sizes = [2, 64], strides = [1, 1]} : vector<2x128xf32> to vector<2x64xf32>
    %470 = vector.extract_strided_slice %459 {offsets = [0, 128], sizes = [2, 64], strides = [1, 1]} : vector<2x192xf32> to vector<2x64xf32>
    %471 = vector.extract_strided_slice %454 {offsets = [0, 128], sizes = [2, 64], strides = [1, 1]} : vector<2x192xf32> to vector<2x64xf32>
    %472 = arith.addf %471, %315 : vector<2x64xf32>
    %473 = arith.mulf %468, %472 : vector<2x64xf32>
    %474 = arith.addf %470, %473 : vector<2x64xf32>
    %475 = math.tanh %474 : vector<2x64xf32>
    %476 = arith.subf %444, %475 : vector<2x64xf32>
    %477 = arith.mulf %469, %476 : vector<2x64xf32>
    %478 = arith.addf %475, %477 : vector<2x64xf32>
    %479 = vector.extract_strided_slice %478 {offsets = [0, 0], sizes = [2, 32], strides = [1, 1]} : vector<2x64xf32> to vector<2x32xf32>
    %c4_126 = arith.constant 4 : index
    %c0_127 = arith.constant 0 : index
    %c0_128 = arith.constant 0 : index
    %480 = vector.load %arg16[%c4_126, %c0_127, %c0_128] : memref<8x2x32xf32, #tpu.memory_space<vmem>>, vector<1x2x32xf32>
    %481 = vector.shape_cast %480 : vector<1x2x32xf32> to vector<2x32xf32>
    %482 = vector.shape_cast %479 : vector<2x32xf32> to vector<1x2x32xf32>
    tpu.vector_store %arg16[%c4_126, %c0_127, %c0_128], %482 {strides = array<i32>} : memref<8x2x32xf32, #tpu.memory_space<vmem>>, vector<1x2x32xf32>,
    %483 = vector.extract_strided_slice %478 {offsets = [0, 32], sizes = [2, 32], strides = [1, 1]} : vector<2x64xf32> to vector<2x32xf32>
    %c3_129 = arith.constant 3 : index
    %c0_130 = arith.constant 0 : index
    %c0_131 = arith.constant 0 : index
    %484 = vector.load %arg17[%c3_129, %c0_130, %c0_131] : memref<8x2x32xf32, #tpu.memory_space<vmem>>, vector<1x2x32xf32>
    %485 = vector.shape_cast %484 : vector<1x2x32xf32> to vector<2x32xf32>
    %486 = vector.shape_cast %483 : vector<2x32xf32> to vector<1x2x32xf32>
    tpu.vector_store %arg17[%c3_129, %c0_130, %c0_131], %486 {strides = array<i32>} : memref<8x2x32xf32, #tpu.memory_space<vmem>>, vector<1x2x32xf32>,
    %487 = arith.truncf %478 : vector<2x64xf32> to vector<2x64xbf16>
    %cst_132 = arith.constant dense<0.000000e+00> : vector<2x192xf32>
    %488 = tpu.matmul %487, %312, %cst_132 {dimension_numbers = #tpu.dot_dimension_numbers<[1], [0], [0], [1], [0, 0, 1, 1], [], []>} : vector<2x64xbf16>, vector<64x192xbf16>, vector<2x192xf32> -> vector<2x192xf32>
    %489 = vector.extract_strided_slice %305 {offsets = [5, 0, 0], sizes = [1, 2, 192], strides = [1, 1, 1]} : vector<8x2x192xf32> to vector<1x2x192xf32>
    %490 = vector.shape_cast %489 : vector<1x2x192xf32> to vector<2x192xf32>
    %491 = vector.extract_strided_slice %311 {offsets = [2, 0, 0], sizes = [1, 2, 192], strides = [1, 1, 1]} : vector<8x2x192xf32> to vector<1x2x192xf32>
    %492 = vector.shape_cast %491 : vector<1x2x192xf32> to vector<2x192xf32>
    %493 = arith.addf %490, %492 : vector<2x192xf32>
    %494 = vector.extract_strided_slice %493 {offsets = [0, 0], sizes = [2, 128], strides = [1, 1]} : vector<2x192xf32> to vector<2x128xf32>
    %495 = vector.extract_strided_slice %488 {offsets = [0, 0], sizes = [2, 128], strides = [1, 1]} : vector<2x192xf32> to vector<2x128xf32>
    %496 = arith.addf %494, %495 : vector<2x128xf32>
    %497 = arith.negf %496 : vector<2x128xf32>
    %498 = math.exp %497 : vector<2x128xf32>
    %cst_133 = arith.constant 1.000000e+00 : f32
    %499 = vector.broadcast %cst_133 : f32 to vector<2x128xf32>
    %500 = arith.addf %499, %498 : vector<2x128xf32>
    %501 = arith.divf %499, %500 : vector<2x128xf32>
    %502 = vector.extract_strided_slice %501 {offsets = [0, 0], sizes = [2, 64], strides = [1, 1]} : vector<2x128xf32> to vector<2x64xf32>
    %503 = vector.extract_strided_slice %501 {offsets = [0, 64], sizes = [2, 64], strides = [1, 1]} : vector<2x128xf32> to vector<2x64xf32>
    %504 = vector.extract_strided_slice %493 {offsets = [0, 128], sizes = [2, 64], strides = [1, 1]} : vector<2x192xf32> to vector<2x64xf32>
    %505 = vector.extract_strided_slice %488 {offsets = [0, 128], sizes = [2, 64], strides = [1, 1]} : vector<2x192xf32> to vector<2x64xf32>
    %506 = arith.addf %505, %315 : vector<2x64xf32>
    %507 = arith.mulf %502, %506 : vector<2x64xf32>
    %508 = arith.addf %504, %507 : vector<2x64xf32>
    %509 = math.tanh %508 : vector<2x64xf32>
    %510 = arith.subf %478, %509 : vector<2x64xf32>
    %511 = arith.mulf %503, %510 : vector<2x64xf32>
    %512 = arith.addf %509, %511 : vector<2x64xf32>
    %513 = vector.extract_strided_slice %512 {offsets = [0, 0], sizes = [2, 32], strides = [1, 1]} : vector<2x64xf32> to vector<2x32xf32>
    %c5_134 = arith.constant 5 : index
    %c0_135 = arith.constant 0 : index
    %c0_136 = arith.constant 0 : index
    %514 = vector.load %arg16[%c5_134, %c0_135, %c0_136] : memref<8x2x32xf32, #tpu.memory_space<vmem>>, vector<1x2x32xf32>
    %515 = vector.shape_cast %514 : vector<1x2x32xf32> to vector<2x32xf32>
    %516 = vector.shape_cast %513 : vector<2x32xf32> to vector<1x2x32xf32>
    tpu.vector_store %arg16[%c5_134, %c0_135, %c0_136], %516 {strides = array<i32>} : memref<8x2x32xf32, #tpu.memory_space<vmem>>, vector<1x2x32xf32>,
    %517 = vector.extract_strided_slice %512 {offsets = [0, 32], sizes = [2, 32], strides = [1, 1]} : vector<2x64xf32> to vector<2x32xf32>
    %c2_137 = arith.constant 2 : index
    %c0_138 = arith.constant 0 : index
    %c0_139 = arith.constant 0 : index
    %518 = vector.load %arg17[%c2_137, %c0_138, %c0_139] : memref<8x2x32xf32, #tpu.memory_space<vmem>>, vector<1x2x32xf32>
    %519 = vector.shape_cast %518 : vector<1x2x32xf32> to vector<2x32xf32>
    %520 = vector.shape_cast %517 : vector<2x32xf32> to vector<1x2x32xf32>
    tpu.vector_store %arg17[%c2_137, %c0_138, %c0_139], %520 {strides = array<i32>} : memref<8x2x32xf32, #tpu.memory_space<vmem>>, vector<1x2x32xf32>,
    %521 = arith.truncf %512 : vector<2x64xf32> to vector<2x64xbf16>
    %cst_140 = arith.constant dense<0.000000e+00> : vector<2x192xf32>
    %522 = tpu.matmul %521, %312, %cst_140 {dimension_numbers = #tpu.dot_dimension_numbers<[1], [0], [0], [1], [0, 0, 1, 1], [], []>} : vector<2x64xbf16>, vector<64x192xbf16>, vector<2x192xf32> -> vector<2x192xf32>
    %523 = vector.extract_strided_slice %305 {offsets = [6, 0, 0], sizes = [1, 2, 192], strides = [1, 1, 1]} : vector<8x2x192xf32> to vector<1x2x192xf32>
    %524 = vector.shape_cast %523 : vector<1x2x192xf32> to vector<2x192xf32>
    %525 = vector.extract_strided_slice %311 {offsets = [1, 0, 0], sizes = [1, 2, 192], strides = [1, 1, 1]} : vector<8x2x192xf32> to vector<1x2x192xf32>
    %526 = vector.shape_cast %525 : vector<1x2x192xf32> to vector<2x192xf32>
    %527 = arith.addf %524, %526 : vector<2x192xf32>
    %528 = vector.extract_strided_slice %527 {offsets = [0, 0], sizes = [2, 128], strides = [1, 1]} : vector<2x192xf32> to vector<2x128xf32>
    %529 = vector.extract_strided_slice %522 {offsets = [0, 0], sizes = [2, 128], strides = [1, 1]} : vector<2x192xf32> to vector<2x128xf32>
    %530 = arith.addf %528, %529 : vector<2x128xf32>
    %531 = arith.negf %530 : vector<2x128xf32>
    %532 = math.exp %531 : vector<2x128xf32>
    %cst_141 = arith.constant 1.000000e+00 : f32
    %533 = vector.broadcast %cst_141 : f32 to vector<2x128xf32>
    %534 = arith.addf %533, %532 : vector<2x128xf32>
    %535 = arith.divf %533, %534 : vector<2x128xf32>
    %536 = vector.extract_strided_slice %535 {offsets = [0, 0], sizes = [2, 64], strides = [1, 1]} : vector<2x128xf32> to vector<2x64xf32>
    %537 = vector.extract_strided_slice %535 {offsets = [0, 64], sizes = [2, 64], strides = [1, 1]} : vector<2x128xf32> to vector<2x64xf32>
    %538 = vector.extract_strided_slice %527 {offsets = [0, 128], sizes = [2, 64], strides = [1, 1]} : vector<2x192xf32> to vector<2x64xf32>
    %539 = vector.extract_strided_slice %522 {offsets = [0, 128], sizes = [2, 64], strides = [1, 1]} : vector<2x192xf32> to vector<2x64xf32>
    %540 = arith.addf %539, %315 : vector<2x64xf32>
    %541 = arith.mulf %536, %540 : vector<2x64xf32>
    %542 = arith.addf %538, %541 : vector<2x64xf32>
    %543 = math.tanh %542 : vector<2x64xf32>
    %544 = arith.subf %512, %543 : vector<2x64xf32>
    %545 = arith.mulf %537, %544 : vector<2x64xf32>
    %546 = arith.addf %543, %545 : vector<2x64xf32>
    %547 = vector.extract_strided_slice %546 {offsets = [0, 0], sizes = [2, 32], strides = [1, 1]} : vector<2x64xf32> to vector<2x32xf32>
    %c6_142 = arith.constant 6 : index
    %c0_143 = arith.constant 0 : index
    %c0_144 = arith.constant 0 : index
    %548 = vector.load %arg16[%c6_142, %c0_143, %c0_144] : memref<8x2x32xf32, #tpu.memory_space<vmem>>, vector<1x2x32xf32>
    %549 = vector.shape_cast %548 : vector<1x2x32xf32> to vector<2x32xf32>
    %550 = vector.shape_cast %547 : vector<2x32xf32> to vector<1x2x32xf32>
    tpu.vector_store %arg16[%c6_142, %c0_143, %c0_144], %550 {strides = array<i32>} : memref<8x2x32xf32, #tpu.memory_space<vmem>>, vector<1x2x32xf32>,
    %551 = vector.extract_strided_slice %546 {offsets = [0, 32], sizes = [2, 32], strides = [1, 1]} : vector<2x64xf32> to vector<2x32xf32>
    %c1_145 = arith.constant 1 : index
    %c0_146 = arith.constant 0 : index
    %c0_147 = arith.constant 0 : index
    %552 = vector.load %arg17[%c1_145, %c0_146, %c0_147] : memref<8x2x32xf32, #tpu.memory_space<vmem>>, vector<1x2x32xf32>
    %553 = vector.shape_cast %552 : vector<1x2x32xf32> to vector<2x32xf32>
    %554 = vector.shape_cast %551 : vector<2x32xf32> to vector<1x2x32xf32>
    tpu.vector_store %arg17[%c1_145, %c0_146, %c0_147], %554 {strides = array<i32>} : memref<8x2x32xf32, #tpu.memory_space<vmem>>, vector<1x2x32xf32>,
    %555 = arith.truncf %546 : vector<2x64xf32> to vector<2x64xbf16>
    %cst_148 = arith.constant dense<0.000000e+00> : vector<2x192xf32>
    %556 = tpu.matmul %555, %312, %cst_148 {dimension_numbers = #tpu.dot_dimension_numbers<[1], [0], [0], [1], [0, 0, 1, 1], [], []>} : vector<2x64xbf16>, vector<64x192xbf16>, vector<2x192xf32> -> vector<2x192xf32>
    %557 = vector.extract_strided_slice %305 {offsets = [7, 0, 0], sizes = [1, 2, 192], strides = [1, 1, 1]} : vector<8x2x192xf32> to vector<1x2x192xf32>
    %558 = vector.shape_cast %557 : vector<1x2x192xf32> to vector<2x192xf32>
    %559 = vector.extract_strided_slice %311 {offsets = [0, 0, 0], sizes = [1, 2, 192], strides = [1, 1, 1]} : vector<8x2x192xf32> to vector<1x2x192xf32>
    %560 = vector.shape_cast %559 : vector<1x2x192xf32> to vector<2x192xf32>
    %561 = arith.addf %558, %560 : vector<2x192xf32>
    %562 = vector.extract_strided_slice %561 {offsets = [0, 0], sizes = [2, 128], strides = [1, 1]} : vector<2x192xf32> to vector<2x128xf32>
    %563 = vector.extract_strided_slice %556 {offsets = [0, 0], sizes = [2, 128], strides = [1, 1]} : vector<2x192xf32> to vector<2x128xf32>
    %564 = arith.addf %562, %563 : vector<2x128xf32>
    %565 = arith.negf %564 : vector<2x128xf32>
    %566 = math.exp %565 : vector<2x128xf32>
    %cst_149 = arith.constant 1.000000e+00 : f32
    %567 = vector.broadcast %cst_149 : f32 to vector<2x128xf32>
    %568 = arith.addf %567, %566 : vector<2x128xf32>
    %569 = arith.divf %567, %568 : vector<2x128xf32>
    %570 = vector.extract_strided_slice %569 {offsets = [0, 0], sizes = [2, 64], strides = [1, 1]} : vector<2x128xf32> to vector<2x64xf32>
    %571 = vector.extract_strided_slice %569 {offsets = [0, 64], sizes = [2, 64], strides = [1, 1]} : vector<2x128xf32> to vector<2x64xf32>
    %572 = vector.extract_strided_slice %561 {offsets = [0, 128], sizes = [2, 64], strides = [1, 1]} : vector<2x192xf32> to vector<2x64xf32>
    %573 = vector.extract_strided_slice %556 {offsets = [0, 128], sizes = [2, 64], strides = [1, 1]} : vector<2x192xf32> to vector<2x64xf32>
    %574 = arith.addf %573, %315 : vector<2x64xf32>
    %575 = arith.mulf %570, %574 : vector<2x64xf32>
    %576 = arith.addf %572, %575 : vector<2x64xf32>
    %577 = math.tanh %576 : vector<2x64xf32>
    %578 = arith.subf %546, %577 : vector<2x64xf32>
    %579 = arith.mulf %571, %578 : vector<2x64xf32>
    %580 = arith.addf %577, %579 : vector<2x64xf32>
    %581 = vector.extract_strided_slice %580 {offsets = [0, 0], sizes = [2, 32], strides = [1, 1]} : vector<2x64xf32> to vector<2x32xf32>
    %c7_150 = arith.constant 7 : index
    %c0_151 = arith.constant 0 : index
    %c0_152 = arith.constant 0 : index
    %582 = vector.load %arg16[%c7_150, %c0_151, %c0_152] : memref<8x2x32xf32, #tpu.memory_space<vmem>>, vector<1x2x32xf32>
    %583 = vector.shape_cast %582 : vector<1x2x32xf32> to vector<2x32xf32>
    %584 = vector.shape_cast %581 : vector<2x32xf32> to vector<1x2x32xf32>
    tpu.vector_store %arg16[%c7_150, %c0_151, %c0_152], %584 {strides = array<i32>} : memref<8x2x32xf32, #tpu.memory_space<vmem>>, vector<1x2x32xf32>,
    %585 = vector.extract_strided_slice %580 {offsets = [0, 32], sizes = [2, 32], strides = [1, 1]} : vector<2x64xf32> to vector<2x32xf32>
    %c0_153 = arith.constant 0 : index
    %c0_154 = arith.constant 0 : index
    %c0_155 = arith.constant 0 : index
    %586 = vector.load %arg17[%c0_153, %c0_154, %c0_155] : memref<8x2x32xf32, #tpu.memory_space<vmem>>, vector<1x2x32xf32>
    %587 = vector.shape_cast %586 : vector<1x2x32xf32> to vector<2x32xf32>
    %588 = vector.shape_cast %585 : vector<2x32xf32> to vector<1x2x32xf32>
    tpu.vector_store %arg17[%c0_153, %c0_154, %c0_155], %588 {strides = array<i32>} : memref<8x2x32xf32, #tpu.memory_space<vmem>>, vector<1x2x32xf32>,
    %c0_156 = arith.constant 0 : index
    %c0_157 = arith.constant 0 : index
    %c0_158 = arith.constant 0 : index
    %589 = vector.load %arg16[%c0_156, %c0_157, %c0_158] : memref<8x2x32xf32, #tpu.memory_space<vmem>>, vector<8x2x32xf32>
    %590 = arith.truncf %589 : vector<8x2x32xf32> to vector<8x2x32xbf16>
    %591 = vector.shape_cast %590 : vector<8x2x32xbf16> to vector<16x32xbf16>
    %c0_159 = arith.constant 0 : index
    %c0_160 = arith.constant 0 : index
    %c0_161 = arith.constant 0 : index
    %592 = vector.load %arg17[%c0_159, %c0_160, %c0_161] : memref<8x2x32xf32, #tpu.memory_space<vmem>>, vector<8x2x32xf32>
    %593 = arith.truncf %592 : vector<8x2x32xf32> to vector<8x2x32xbf16>
    %594 = vector.shape_cast %593 : vector<8x2x32xbf16> to vector<16x32xbf16>
    %c0_162 = arith.constant 0 : index
    %c0_163 = arith.constant 0 : index
    %595 = vector.load %arg11[%c0_162, %c0_163] : memref<64x5xbf16, #tpu.memory_space<vmem>>, vector<64x5xbf16>
    %596 = vector.extract_strided_slice %595 {offsets = [0, 0], sizes = [32, 5], strides = [1, 1]} : vector<64x5xbf16> to vector<32x5xbf16>
    %cst_164 = arith.constant dense<0.000000e+00> : vector<16x5xf32>
    %597 = tpu.matmul %591, %596, %cst_164 {dimension_numbers = #tpu.dot_dimension_numbers<[1], [0], [0], [1], [0, 0, 1, 1], [], []>} : vector<16x32xbf16>, vector<32x5xbf16>, vector<16x5xf32> -> vector<16x5xf32>
    %598 = vector.extract_strided_slice %595 {offsets = [32, 0], sizes = [32, 5], strides = [1, 1]} : vector<64x5xbf16> to vector<32x5xbf16>
    %cst_165 = arith.constant dense<0.000000e+00> : vector<16x5xf32>
    %599 = tpu.matmul %594, %598, %cst_165 {dimension_numbers = #tpu.dot_dimension_numbers<[1], [0], [0], [1], [0, 0, 1, 1], [], []>} : vector<16x32xbf16>, vector<32x5xbf16>, vector<16x5xf32> -> vector<16x5xf32>
    %600 = arith.addf %597, %599 : vector<16x5xf32>
    %c0_166 = arith.constant 0 : index
    %c0_167 = arith.constant 0 : index
    %601 = vector.load %arg12[%c0_166, %c0_167] : memref<1x5xf32, #tpu.memory_space<vmem>>, vector<1x5xf32>
    %602 = vector.broadcast %601 : vector<1x5xf32> to vector<16x5xf32>
    %603 = arith.addf %600, %602 : vector<16x5xf32>
    %cst_168 = arith.constant dense<0xFF800000> : vector<16xf32>
    %604 = vector.multi_reduction <maximumf>, %603, %cst_168 [1] : vector<16x5xf32> to vector<16xf32>
    %605 = vector.shape_cast %604 : vector<16xf32> to vector<16x1xf32>
    %606 = vector.broadcast %605 : vector<16x1xf32> to vector<16x5xf32>
    %607 = arith.subf %603, %606 : vector<16x5xf32>
    %608 = math.exp %607 : vector<16x5xf32>
    %cst_169 = arith.constant dense<0.000000e+00> : vector<16xf32>
    %609 = vector.multi_reduction <add>, %608, %cst_169 [1] : vector<16x5xf32> to vector<16xf32>
    %610 = vector.shape_cast %609 : vector<16xf32> to vector<16x1xf32>
    %611 = vector.broadcast %610 : vector<16x1xf32> to vector<16x5xf32>
    %612 = arith.divf %608, %611 : vector<16x5xf32>
    %613 = vector.shape_cast %612 : vector<16x5xf32> to vector<8x2x5xf32>
    %c0_170 = arith.constant 0 : index
    %c0_171 = arith.constant 0 : index
    %c0_172 = arith.constant 0 : index
    %614 = vector.load %arg13[%c0_170, %c0_171, %c0_172] : memref<8x2x5xf32, #tpu.memory_space<vmem>>, vector<8x2x5xf32>
    tpu.vector_store %arg13[%c0_170, %c0_171, %c0_172], %613 {strides = array<i32>} : memref<8x2x5xf32, #tpu.memory_space<vmem>>, vector<8x2x5xf32>,
    return
  }
}

</mosaic_0001>

<bundles_post_ra>
// kernel: gru_model_forward.1
= control target key start
LH: loop header
LB: loop body
LE: loop exit
PB: predicated region body
PF: predicated region fallthrough
CT: control target
= control target key end

     0   :  { %18 = vsyncpa [#allocation7], 0  ;;  %s3651_s0 = inlined_call_operand.vmem [shape: f32[8,2,16], index: 0, kind: input, shape index: {}]   ;;  %s3652_s1 = inlined_call_operand.hbm [shape: bf16[16,192], index: 1, kind: input, shape index: {}]   ;;  %s3653_s2 = inlined_call_operand.hbm [shape: bf16[16,192], index: 2, kind: input, shape index: {}]   ;;  %s3654_s3 = inlined_call_operand.vmem [shape: bf16[64,192], index: 3, kind: input, shape index: {}]   ;;  %s3655_s4 = inlined_call_operand.hbm [shape: f32[1,192], index: 4, kind: input, shape index: {}]   ;;  %s3656_s5 = inlined_call_operand.hbm [shape: f32[1,64], index: 5, kind: input, shape index: {}]   ;;  %s3657_s6 = inlined_call_operand.hbm [shape: bf16[64,192], index: 6, kind: input, shape index: {}]   ;;  %s3658_s7 = inlined_call_operand.hbm [shape: bf16[64,192], index: 7, kind: input, shape index: {}]   ;;  %s3659_s8 = inlined_call_operand.hbm [shape: bf16[64,192], index: 8, kind: input, shape index: {}]   ;;  %s3660_s9 = inlined_call_operand.vmem [shape: f32[1,192], index: 9, kind: input, shape index: {}]   ;;  %s3661_s10 = inlined_call_operand.vmem [shape: f32[1,64], index: 10, kind: input, shape index: {}]   ;;  %s3662_s11 = inlined_call_operand.vmem [shape: bf16[64,5], index: 11, kind: input, shape index: {}]   ;;  %s3663_s12 = inlined_call_operand.vmem [shape: f32[1,5], index: 12, kind: input, shape index: {}]   ;;  %s3664_s13 = inlined_call_operand.vmem [shape: f32[8,2,5], index: 13, kind: output, shape index: {}]  }
   0x1   :  { %19 = vsyncpa [#allocation9], 0 }
   0x2   :  { %20 = vsyncpa [#allocation12], 0 }
   0x3   :  { %21 = vsyncpa [#allocation15], 0  ;;  %s41_s27 = sshll.u32 %s3653_s2, 4  ;;  %s2896_s28 = smov [#allocation8]   ;;  %s42_s27 = int_to_ptr.hbm [resolvable:$true] %s41_s27 }
   0x4   :  { %s43_s29 = sshll.u32 %s2896_s28, 4  ;;  %s68_s15 = sshll.u32 %s3656_s5, 4  ;;  %s44_s29 = int_to_ptr.vmem [resolvable:$true] %s43_s29  ;;  %s69_s15 = int_to_ptr.hbm [resolvable:$true] %s68_s15 }
   0x5   :  { %s2897_s16 = smov 128   ;;  %s2898_s17 = smov 8  }
   0x6   :  { %49 = dma.hbm_to_vmem [thread:$0]  %s42_s27, 256, %s44_s29, [#allocation9], %s2897_s16, %s2897_s16, %s2898_s17  }
   0x7   :  { %s2899_s18 = smov [#allocation11]   ;;  %s91_s2 = sshll.u32 %s3658_s7, 4  ;;  %s92_s2 = int_to_ptr.hbm [resolvable:$true] %s91_s2 }
   0x8   :  { %s70_s19 = sshll.u32 %s2899_s18, 4  ;;  %s28_s5 = sshll.u32 %s3652_s1, 4  ;;  %s71_s19 = int_to_ptr.vmem [resolvable:$true] %s70_s19  ;;  %s29_s5 = int_to_ptr.hbm [resolvable:$true] %s28_s5 }
   0x9   :  { %73 = dma.hbm_to_vmem [thread:$0]  %s69_s15, 16, %s71_s19, [#allocation12]  }
   0xa   :  { %s2900_s24 = smov [#allocation14]   ;;  %s2901_s26 = smov [#allocation6]  }
   0xb   :  { %s93_s25 = sshll.u32 %s2900_s24, 4  ;;  %s30_s27 = sshll.u32 %s2901_s26, 4  ;;  %s94_s25 = int_to_ptr.vmem [resolvable:$true] %s93_s25  ;;  %s31_s27 = int_to_ptr.vmem [resolvable:$true] %s30_s27 }
   0xc   :  { %99 = dma.hbm_to_vmem [thread:$0]  %s92_s2, 1024, %s94_s25, [#allocation15], %s2897_s16, %s2897_s16, %s2898_s17  }
   0xd   :  { %s57_s7 = sshll.u32 %s3655_s4, 4  ;;  %s78_s14 = sshll.u32 %s3657_s6, 4  ;;  %s58_s7 = int_to_ptr.hbm [resolvable:$true] %s57_s7  ;;  %s79_s14 = int_to_ptr.hbm [resolvable:$true] %s78_s14 }
   0xe   :  { %36 = dma.hbm_to_vmem [thread:$0]  %s29_s5, 256, %s31_s27, [#allocation7], %s2897_s16, %s2897_s16, %s2898_s17  }
   0xf   :  { %s2902_s15 = smov [#allocation10]   ;;  %s2903_s19 = smov [#allocation13]  }
  0x10   :  { %s59_s18 = sshll.u32 %s2902_s15, 4  ;;  %s80_s20 = sshll.u32 %s2903_s19, 4  ;;  %s60_s18 = int_to_ptr.vmem [resolvable:$true] %s59_s18  ;;  %s81_s20 = int_to_ptr.vmem [resolvable:$true] %s80_s20 }
  0x11   :  { %62 = dma.hbm_to_vmem [thread:$0]  %s58_s7, 32, %s60_s18, [#allocation9]  }
  0x12   :  { %s104_s4 = sshll.u32 %s3659_s8, 4  ;;  %s2904_s22 = smov [#allocation16]   ;;  %s105_s4 = int_to_ptr.hbm [resolvable:$true] %s104_s4 }
  0x13   :  { %86 = dma.hbm_to_vmem [thread:$0]  %s79_s14, 1024, %s81_s20, [#allocation12], %s2897_s16, %s2897_s16, %s2898_s17  }
  0x14   :  { %s106_s23 = sshll.u32 %s2904_s22, 4  ;;  %s107_s23 = int_to_ptr.vmem [resolvable:$true] %s106_s23 }
  0x15   :  { %112 = dma.hbm_to_vmem [thread:$0]  %s105_s4, 1024, %s107_s23, [#allocation15], %s2897_s16, %s2897_s16, %s2898_s17  }
  0x16   :  { %2888 = dma.done.wait [#allocation7], 256  }
  0x17   :  { %2889 = vsyncadd [#allocation7], 4294967040 }
  0x18   :  { %2890 = dma.done.wait [#allocation9], 288  }
  0x19   :  { %2891 = vsyncadd [#allocation9], 4294967008 }
  0x1a   :  { %2892 = dma.done.wait [#allocation12], 1040  }
  0x1b   :  { %2893 = vsyncadd [#allocation12], 4294966256 }
  0x1c   :  { %2894 = dma.done.wait [#allocation15], 2048  }
  0x1d   :  { %2895 = vsyncadd [#allocation15], 4294965248  ;;  %v2561_v0 = vld [vmem:[#allocation6 + $0x4] sm:$0xf]  ;;  %v2347_v1 = vld [vmem:[#allocation6 + $0x8] sm:$0xf0] }
  0x1e   :  { %v2345_v2 = vld [vmem:[#allocation6] sm:$0xf]  ;;  %v2350_v3 = vor.u32 %v2561_v0, %v2347_v1  ;;  %v2562_v4 = vld [vmem:[#allocation6 + $0x4] sm:$0xf0]  ;;  %v150_v5 = vld [vmem:[%s3651_s0] sm:$0x3] }
  0x1f   :  { %v151_v6 = vld [vmem:[%s3651_s0 + $0x2] sm:$0x3]  ;;  %v2346_v7 = vor.u32 %v2562_v4, %v2345_v2  ;;  %v152_v8 = vld [vmem:[%s3651_s0 + $0x4] sm:$0x3]  ;;  %v153_v9 = vld [vmem:[%s3651_s0 + $0x6] sm:$0x3]  ;;  %v3029_v11 = vpack.c.bf16 %v150_v5, %v150_v5 }
  0x20   :  { %v154_v10 = vld [vmem:[%s3651_s0 + $0x8] sm:$0x3]  ;;  %v3031_v12 = vpack.c.bf16 %v151_v6, %v151_v6  ;;  %232 = vmatpush.bf16.msra.mxu1 %v2350_v3  ;;  %v155_v13 = vld [vmem:[%s3651_s0 + $0xa] sm:$0x3]  ;;  %v156_v14 = vld [vmem:[%s3651_s0 + $0xc] sm:$0x3]  ;;  %v160_v16 = vpack.c.bf16 %v152_v8, %v152_v8  ;;  %v3042_v17 = vpack.c.bf16 %v153_v9, %v153_v9 }
  0x21   :  { %v157_v15 = vld [vmem:[%s3651_s0 + $0xe] sm:$0x3]  ;;  %218 = vmatpush.bf16.msra.mxu0 %v2346_v7  ;;  %v3044_v18 = vpack.c.bf16 %v154_v10, %v154_v10  ;;  %175 = vst [vmem:[#allocation1] ss:$9 sm:$0xff] %v3029_v11  ;;  %v2355_v19 = vld [vmem:[#allocation8] sm:$0xf]  ;;  %v3047_v21 = vpack.c.bf16 %v155_v13, %v155_v13  ;;  %v164_v25 = vpack.c.bf16 %v156_v14, %v156_v14 }
  0x22   :  { %v2564_v20 = vld [vmem:[#allocation8 + $0x4] sm:$0xf0]  ;;  %178 = vst [vmem:[#allocation1 + $0x1] ss:$9 sm:$0xff] %v3031_v12  ;;  %v2563_v23 = vld [vmem:[#allocation8 + $0x4] sm:$0xf]  ;;  %v165_v29 = vpack.c.bf16 %v157_v15, %v157_v15 }
  0x23   :  { %v2356_v22 = vor.u32 %v2564_v20, %v2355_v19  ;;  %v2357_v24 = vld [vmem:[#allocation8 + $0x8] sm:$0xf0]  ;;  %181 = vst [vmem:[#allocation1 + $0x2] ss:$9 sm:$0xff] %v160_v16  ;;  %v2389_v27 = vld [vmem:[%s3654_s3 + $0x30] sm:$0xf] }
  0x24   :  { %v2360_v26 = vor.u32 %v2563_v23, %v2357_v24  ;;  %v2572_v28 = vld [vmem:[%s3654_s3 + $0x34] sm:$0xf0]  ;;  %184 = vst [vmem:[#allocation1 + $0x3] ss:$9 sm:$0xff] %v3042_v17  ;;  %v2381_v31 = vld [vmem:[%s3654_s3 + $0x20] sm:$0xf] }
  0x25   :  { %308 = vmatpush.bf16.msra.mxu2 %v2356_v22  ;;  %v3057_v30 = vor.u32 %v2572_v28, %v2389_v27  ;;  %v2570_v32 = vld [vmem:[%s3654_s3 + $0x24] sm:$0xf0]  ;;  %187 = vst [vmem:[#allocation1 + $0x4] ss:$9 sm:$0xff] %v3044_v18  ;;  %v2373_v34 = vld [vmem:[%s3654_s3 + $0x10] sm:$0xf] }
  0x26   :  { %322 = vmatpush.bf16.msra.mxu3 %v2360_v26  ;;  %190 = vst [vmem:[#allocation1 + $0x5] ss:$9 sm:$0xff] %v3047_v21  ;;  %v3068_v33 = vor.u32 %v2570_v32, %v2381_v31  ;;  %v2568_v35 = vld [vmem:[%s3654_s3 + $0x14] sm:$0xf0]  ;;  %v2571_v36 = vld [vmem:[%s3654_s3 + $0x34] sm:$0xf] }
  0x27   :  { %417 = vmatpush.bf16.msrb.mxu0 %v3057_v30  ;;  %193 = vst [vmem:[#allocation1 + $0x6] ss:$9 sm:$0xff] %v164_v25  ;;  %v2391_v37 = vld [vmem:[%s3654_s3 + $0x38] sm:$0xf0]  ;;  %v2569_v38 = vld [vmem:[%s3654_s3 + $0x24] sm:$0xf]  ;;  %v3092_v41 = vor.u32 %v2568_v35, %v2373_v34 }
  0x28   :  { %196 = vst [vmem:[#allocation1 + $0x7] ss:$9 sm:$0xff] %v165_v29  ;;  %v3086_v39 = vor.u32 %v2571_v36, %v2391_v37  ;;  %v2383_v40 = vld [vmem:[%s3654_s3 + $0x28] sm:$0xf0]  ;;  %v2365_v42 = vld [vmem:[%s3654_s3] sm:$0xf] }
  0x29   :  { %496 = vmatpush.bf16.msrb.mxu2 %v3057_v30  ;;  %v2566_v43 = vld [vmem:[%s3654_s3 + $0x4] sm:$0xf0]  ;;  %v3102_v44 = vor.u32 %v2569_v38, %v2383_v40  ;;  %v2567_v45 = vld [vmem:[%s3654_s3 + $0x14] sm:$0xf]  ;;  %v2375_v46 = vld [vmem:[%s3654_s3 + $0x18] sm:$0xf0] }
  0x2a   :  { %430 = vmatpush.bf16.msrb.mxu1 %v3086_v39  ;;  %509 = vmatpush.bf16.msrb.mxu3 %v3086_v39  ;;  %vm208_vm0 = vcmask 130048   ;;  %v3112_v47 = vor.u32 %v2566_v43, %v2365_v42  ;;  %v3116_v49 = vor.u32 %v2567_v45, %v2375_v46  ;;  %v2565_v50 = vld [vmem:[%s3654_s3 + $0x4] sm:$0xf]  ;;  %v2367_v51 = vld [vmem:[%s3654_s3 + $0x8] sm:$0xf0]  ;;  %v2905_v54 = vmov 0  }
  0x2b   :  { %418 = vmatpush.bf16.msrb.mxu0 %v3068_v33  ;;  %v3133_v52 = vor.u32 %v2565_v50, %v2367_v51  ;;  %v168_v55 = vld [vmem:[#allocation10] sm:$0x3]  ;;  %vm253_vm1 = vcmask 1045504   ;;  %vm247_vm2 = vcmask 1043458   ;;  %vm250_vm3 = vcmask 1045508   ;;  %s2906_s3 = smov 64  }
  0x2c   :  { %v171_v56 = vperm.slane %v168_v55, 1  ;;  %v170_v57 = vperm.slane %v168_v55, 0  ;;  %vm245_vm4 = vcmask 1041408   ;;  %vm478_vm9 = vcmask 254976   ;;  %s2907_s22 = smov 96  }
  0x2d   :  { %497 = vmatpush.bf16.msrb.mxu2 %v3068_v33  ;;  %vm409_vm10 = vcmask 523264  }
  0x2e   :  { %431 = vmatpush.bf16.msrb.mxu1 %v3102_v44  ;;  %510 = vmatpush.bf16.msrb.mxu3 %v3102_v44 }
  0x2f   :  { %419 = vmatpush.bf16.msrb.mxu0 %v3092_v41  ;;  %v197_v48 = vld [vmem:[#allocation1] sm:$0xff] }
  0x30   :  { %2352 = vmatmul.msk.bf16.vlgmr.msra.gmra.mxu1 %vm208_vm0, %v197_v48  ;;  %273 = vst [vmem:[#allocation1] ss:$9 sm:$0xff] %v3029_v11  ;;  %2351 = vmatmul.msk.bf16.vlgmr.msra.gmra.mxu0 %vm208_vm0, %v197_v48 }
  0x31   :  { %498 = vmatpush.bf16.msrb.mxu2 %v3092_v41  ;;  %275 = vst [vmem:[#allocation1 + $0x1] ss:$9 sm:$0xff] %v3031_v12 }
  0x32   :  { %277 = vst [vmem:[#allocation1 + $0x2] ss:$9 sm:$0xff] %v160_v16  ;;  %432 = vmatpush.bf16.msrb.mxu1 %v3116_v49  ;;  %511 = vmatpush.bf16.msrb.mxu3 %v3116_v49 }
  0x33   :  { %420 = vmatpush.bf16.msrb.mxu0 %v3112_v47  ;;  %279 = vst [vmem:[#allocation1 + $0x3] ss:$9 sm:$0xff] %v3042_v17 }
  0x34   :  { %281 = vst [vmem:[#allocation1 + $0x4] ss:$9 sm:$0xff] %v3044_v18 }
  0x35   :  { %499 = vmatpush.bf16.msrb.mxu2 %v3112_v47  ;;  %283 = vst [vmem:[#allocation1 + $0x5] ss:$9 sm:$0xff] %v3047_v21 }
  0x36   :  { %285 = vst [vmem:[#allocation1 + $0x6] ss:$9 sm:$0xff] %v164_v25  ;;  %433 = vmatpush.bf16.msrb.mxu1 %v3133_v52  ;;  %512 = vmatpush.bf16.msrb.mxu3 %v3133_v52 }
  0x37   :  { %575 = vmatpush.bf16.msra.mxu0 %v3057_v30  ;;  %287 = vst [vmem:[#allocation1 + $0x7] ss:$9 sm:$0xff] %v165_v29 }
  0x3a   :  { %588 = vmatpush.bf16.msra.mxu1 %v3086_v39 }
  0x3b   :  { %576 = vmatpush.bf16.msra.mxu0 %v3068_v33 }
  0x3e   :  { %589 = vmatpush.bf16.msra.mxu1 %v3102_v44  ;;  %v288_v53 = vld [vmem:[#allocation1] sm:$0xff] }
  0x3f   :  { %577 = vmatpush.bf16.msra.mxu0 %v3092_v41  ;;  %2361 = vmatmul.msk.bf16.vlgmr.msra.gmra.mxu2 %vm208_vm0, %v288_v53 }
  0x40   :  { %2362 = vmatmul.msk.bf16.vlgmr.msra.gmra.mxu3 %vm208_vm0, %v288_v53  ;;  %421 = vmatmul.bf16.vlgmr.msrb.gmra.mxu0 %v2905_v54 }
  0x41   :  { %434 = vmatmul.bf16.vlgmr.msrb.gmra.mxu1 %v2905_v54  ;;  %654 = vmatpush.bf16.msra.mxu2 %v3057_v30 }
  0x42   :  { %590 = vmatpush.bf16.msra.mxu1 %v3116_v49  ;;  %667 = vmatpush.bf16.msra.mxu3 %v3086_v39 }
  0x43   :  { %578 = vmatpush.bf16.msra.mxu0 %v3112_v47 }
  0x45   :  { %655 = vmatpush.bf16.msra.mxu2 %v3068_v33 }
  0x46   :  { %591 = vmatpush.bf16.msra.mxu1 %v3133_v52  ;;  %668 = vmatpush.bf16.msra.mxu3 %v3102_v44 }
  0x47   :  { %733 = vmatpush.bf16.msrb.mxu0 %v3057_v30 }
  0x49   :  { %656 = vmatpush.bf16.msra.mxu2 %v3092_v41 }
  0x4a   :  { %746 = vmatpush.bf16.msrb.mxu1 %v3086_v39  ;;  %669 = vmatpush.bf16.msra.mxu3 %v3116_v49 }
  0x4b   :  { %734 = vmatpush.bf16.msrb.mxu0 %v3068_v33 }
  0x4d   :  { %657 = vmatpush.bf16.msra.mxu2 %v3112_v47 }
  0x4e   :  { %747 = vmatpush.bf16.msrb.mxu1 %v3102_v44  ;;  %670 = vmatpush.bf16.msra.mxu3 %v3133_v52 }
  0x4f   :  { %735 = vmatpush.bf16.msrb.mxu0 %v3092_v41 }
  0x52   :  { %748 = vmatpush.bf16.msrb.mxu1 %v3116_v49 }
  0x53   :  { %736 = vmatpush.bf16.msrb.mxu0 %v3112_v47 }
  0x56   :  { %749 = vmatpush.bf16.msrb.mxu1 %v3133_v52 }
  0xad   :  { %v234_v58 = vpop.f32.mrf.mxu1  ;;  %v220_v59 = vpop.f32.mrf.mxu0 }
  0xae   :  { %v235_v60 = vadd.f32 %v234_v58, %v171_v56  ;;  %v221_v61 = vadd.f32 %v220_v59, %v170_v57 }
  0xb0   :  { %v243_v62 = vrot.slane %v235_v60, 6 }
  0xb2   :  { %v248_v63 = vsel %vm247_vm2, %v221_v61, %v243_v62  ;;  %v251_v0 = vsel %vm250_vm3, %v221_v61, %v243_v62  ;;  %v254_v1 = vsel %vm253_vm1, %v243_v62, %v221_v61  ;;  %v246_v53 = vsel %vm245_vm4, %v221_v61, %v243_v62 }
  0xb3   :  { %v249_v37 = vrot.slane %v248_v63, 2  ;;  %v255_v38 = vrot.slane %v254_v1, 6  ;;  %v252_v50 = vrot.slane %v251_v0, 4 }
  0xb5   :  { %v236_v2 = vpop.f32.mrf.mxu1  ;;  %v222_v3 = vpop.f32.mrf.mxu0 }
  0xb6   :  { %v237_v4 = vadd.f32 %v236_v2, %v171_v56  ;;  %v223_v5 = vadd.f32 %v222_v3, %v170_v57 }
  0xb8   :  { %v244_v6 = vrot.slane %v237_v4, 6  ;;  %v3198_v4 = vld [vmem:[#allocation11] ss:$0 sm:$0xff] }
  0xba   :  { %v256_v7 = vsel %vm245_vm4, %v223_v5, %v244_v6  ;;  %v257_v8 = vsel %vm247_vm2, %v223_v5, %v244_v6  ;;  %v259_v9 = vsel %vm250_vm3, %v223_v5, %v244_v6  ;;  %v261_v10 = vsel %vm253_vm1, %v244_v6, %v223_v5 }
  0xbb   :  { %v262_v15 = vrot.slane %v261_v10, 6  ;;  %v258_v17 = vrot.slane %v257_v8, 2  ;;  %v260_v18 = vrot.slane %v259_v9, 4 }
  0xbd   :  { %v422_v11 = vpop.f32.mrf.mxu0 }
  0xbe   :  { %v435_v12 = vpop.f32.mrf.mxu1 }
  0xc2   :  { %v310_v13 = vpop.f32.mrf.mxu2 }
  0xc3   :  { %v324_v14 = vpop.f32.mrf.mxu3 }
  0xc4   :  { %v333_v16 = vrot.slane %v324_v14, 6 }
  0xc5   :  { %v424_v19 = vpop.f32.mrf.mxu0 }
  0xc6   :  { %v437_v20 = vpop.f32.mrf.mxu1  ;;  %v340_v21 = vsel %vm253_vm1, %v333_v16, %v310_v13  ;;  %v338_v22 = vsel %vm250_vm3, %v310_v13, %v333_v16  ;;  %v336_v23 = vsel %vm247_vm2, %v310_v13, %v333_v16  ;;  %v335_v24 = vsel %vm245_vm4, %v310_v13, %v333_v16 }
  0xc7   :  { %v341_v25 = vrot.slane %v340_v21, 6  ;;  %v339_v26 = vrot.slane %v338_v22, 4  ;;  %v337_v27 = vrot.slane %v336_v23, 2  ;;  %v3179_v28 = vadd.f32 %v335_v24, %v262_v15 }
  0xc9   :  { %v3181_v29 = vadd.f32 %v341_v25, %v256_v7  ;;  %v3183_v31 = vadd.f32 %v339_v26, %v258_v17  ;;  %v3185_v32 = vadd.f32 %v337_v27, %v260_v18  ;;  %v460_v7 = vadd.f32 %v3198_v4, %v435_v12 }
  0xca   :  { %v312_v36 = vpop.f32.mrf.mxu2 }
  0xcb   :  { %v326_v34 = vpop.f32.mrf.mxu3 }
  0xcc   :  { %v334_v35 = vrot.slane %v326_v34, 6 }
  0xce   :  { %v347_v40 = vsel %vm253_vm1, %v334_v35, %v312_v36  ;;  %v345_v42 = vsel %vm250_vm3, %v312_v36, %v334_v35  ;;  %v343_v43 = vsel %vm247_vm2, %v312_v36, %v334_v35  ;;  %v342_v45 = vsel %vm245_vm4, %v312_v36, %v334_v35 }
  0xcf   :  { %v348_v46 = vrot.slane %v347_v40, 6  ;;  %v346_v48 = vrot.slane %v345_v42, 4  ;;  %v344_v51 = vrot.slane %v343_v43, 2  ;;  %v3192_v55 = vadd.f32 %v342_v45, %v255_v38 }
  0xd1   :  { %v439_v56 = vadd.f32 %v348_v46, %v246_v53  ;;  %v3194_v57 = vadd.f32 %v346_v48, %v249_v37  ;;  %v3196_v58 = vadd.f32 %v344_v51, %v252_v50 }
  0xd3   :  { %v440_v59 = vadd.f32 %v439_v56, %v422_v11  ;;  %v463_v13 = vrot.slane %v439_v56, 2  ;;  %v542_v51 = vrot.slane %v3194_v57, 2 }
  0xd5   :  { %v2395_v60 = vmul.f32 -1.442695, %v440_v59 }
  0xd7   :  { %2616 = vpow2.f32 %v2395_v60 }
  0xdd   :  { %v2617_v63 = vpop.eup %2616 }
  0xde   :  { %v444_v1 = vadd.f32 1.0, %v2617_v63 }
  0xe0   :  { %2618 = vrcp.f32 %v444_v1  ;;  %v456_v5 = vand.u32 2147483648, %v444_v1  ;;  %v454_v62 = vand.u32 2147483647, %v444_v1  ;;  %vm450_vm6 = vweird.f32 %v444_v1 }
  0xe2   :  { %v457_v8 = vor.u32 1.1754944e-38, %v456_v5  ;;  %vm455_vm8 = vcmp.eq.f32.partialorder %v454_v62, 8.507059e+37 }
  0xe6   :  { %v2619_v2 = vpop.eup %2618 }
  0xe7   :  { %v446_v3 = vmul.f32 %v2619_v2, %v444_v1  ;;  %vm451_vm5 = vweird.f32 %v2619_v2 }
  0xe8   :  { %vm452_vm7 = vmor %vm450_vm6, %vm451_vm5 }
  0xe9   :  { %v447_v0 = vsub.f32 1.0, %v446_v3 }
  0xeb   :  { %v448_v61 = vmul.f32 %v2619_v2, %v447_v0 }
  0xed   :  { %v449_v6 = vadd.f32 %v2619_v2, %v448_v61 }
  0xef   :  { %v453_v9 = vsel %vm452_vm7, %v2619_v2, %v449_v6 }
  0xf0   :  { %v458_v10 = vsel %vm455_vm8, %v457_v8, %v453_v9 }
  0xf1   :  { %v461_v11 = vmul.f32 %v460_v7, %v458_v10 }
  0xf3   :  { %v465_v14 = vadd.f32 %v463_v13, %v461_v11 }
  0xf5   :  { %2620 = vtanh.f32 %v465_v14 }
  0xfb   :  { %v2621_v15 = vpop.eup %2620 }
  0xfc   :  { %v467_v16 = vsub.f32 0.0, %v2621_v15 }
  0xfe   :  { %469 = vrot.lane.b32.xlu0 %v467_v16, %s2906_s3 }
 0x170   :  { %v470_v17 = vpop.permute.xlu0 %469 }
 0x171   :  { %v472_v18 = vmul.f32 %v470_v17, %v458_v10 }
 0x173   :  { %474 = vrot.lane.b32.xlu0 %v472_v18, %s2906_s3 }
 0x1e5   :  { %v475_v12 = vpop.permute.xlu0 %474 }
 0x1e6   :  { %v477_v19 = vadd.f32 %v2621_v15, %v475_v12 }
 0x1e8   :  { %479 = vst.msk [vmem:[#allocation2] sm:$0x3] %vm478_vm9, %v477_v19  ;;  %v488_v20 = vpack.c.bf16 %v477_v19, %v477_v19 }
 0x1e9   :  { %481 = vst [vmem:[#allocation1] ss:$4 sm:$0xff] %v477_v19 }
 0x1ea   :  { %2396 = vmatmul.msk.bf16.vlgmr.msrb.gmra.mxu2 %vm409_vm10, %v488_v20  ;;  %2397 = vmatmul.msk.bf16.vlgmr.msrb.gmra.mxu3 %vm409_vm10, %v488_v20 }
 0x1eb   :  { %812 = vmatpush.bf16.msrb.mxu2 %v3057_v30  ;;  %825 = vmatpush.bf16.msrb.mxu3 %v3086_v39 }
 0x1ef   :  { %813 = vmatpush.bf16.msrb.mxu2 %v3068_v33  ;;  %826 = vmatpush.bf16.msrb.mxu3 %v3102_v44 }
 0x1f0   :  { %v3219_v0 = vld.sshfl [vmem:[#allocation1] sm:$0xff pattern:$0x73625140] }
 0x1f3   :  { %814 = vmatpush.bf16.msrb.mxu2 %v3092_v41  ;;  %827 = vmatpush.bf16.msrb.mxu3 %v3116_v49 }
 0x1f7   :  { %815 = vmatpush.bf16.msrb.mxu2 %v3112_v47  ;;  %828 = vmatpush.bf16.msrb.mxu3 %v3133_v52 }
 0x26d   :  { %v501_v21 = vpop.f32.mrf.mxu2  ;;  %v514_v22 = vpop.f32.mrf.mxu3 }
 0x26e   :  { %v519_v23 = vadd.f32 %v3194_v57, %v501_v21  ;;  %v539_v48 = vadd.f32 %v3198_v4, %v514_v22  ;;  %v621_v22 = vrot.slane %v3196_v58, 2 }
 0x270   :  { %v2398_v24 = vmul.f32 -1.442695, %v519_v23 }
 0x272   :  { %2622 = vpow2.f32 %v2398_v24 }
 0x275   :  { %v503_v25 = vpop.f32.mrf.mxu2  ;;  %v516_v26 = vpop.f32.mrf.mxu3 }
 0x278   :  { %v2623_v27 = vpop.eup %2622 }
 0x279   :  { %v523_v34 = vadd.f32 1.0, %v2623_v27 }
 0x27b   :  { %2624 = vrcp.f32 %v523_v34  ;;  %v535_v38 = vand.u32 2147483648, %v523_v34  ;;  %v533_v42 = vand.u32 2147483647, %v523_v34  ;;  %vm529_vm12 = vweird.f32 %v523_v34 }
 0x27d   :  { %v536_v45 = vor.u32 1.1754944e-38, %v535_v38  ;;  %vm534_vm14 = vcmp.eq.f32.partialorder %v533_v42, 8.507059e+37 }
 0x281   :  { %v2625_v35 = vpop.eup %2624 }
 0x282   :  { %v525_v36 = vmul.f32 %v2625_v35, %v523_v34  ;;  %vm530_vm11 = vweird.f32 %v2625_v35 }
 0x283   :  { %vm531_vm13 = vmor %vm529_vm12, %vm530_vm11 }
 0x284   :  { %v526_v37 = vsub.f32 1.0, %v525_v36 }
 0x286   :  { %v527_v40 = vmul.f32 %v2625_v35, %v526_v37 }
 0x288   :  { %v528_v43 = vadd.f32 %v2625_v35, %v527_v40 }
 0x28a   :  { %v532_v46 = vsel %vm531_vm13, %v2625_v35, %v528_v43 }
 0x28b   :  { %v537_v50 = vsel %vm534_vm14, %v536_v45, %v532_v46 }
 0x28c   :  { %v540_v53 = vmul.f32 %v539_v48, %v537_v50 }
 0x28e   :  { %v544_v56 = vadd.f32 %v542_v51, %v540_v53 }
 0x290   :  { %2626 = vtanh.f32 %v544_v56 }
 0x296   :  { %v2627_v59 = vpop.eup %2626 }
 0x297   :  { %v546_v60 = vsub.f32 %v477_v19, %v2627_v59 }
 0x299   :  { %548 = vrot.lane.b32.xlu1 %v546_v60, %s2906_s3 }
 0x30b   :  { %v549_v63 = vpop.permute.xlu1 %548 }
 0x30c   :  { %v551_v1 = vmul.f32 %v549_v63, %v537_v50 }
 0x30e   :  { %553 = vrot.lane.b32.xlu1 %v551_v1, %s2906_s3 }
 0x380   :  { %v554_v2 = vpop.permute.xlu1 %553 }
 0x381   :  { %v556_v3 = vadd.f32 %v2627_v59, %v554_v2  ;;  %v700_v59 = vrot.slane %v3192_v55, 2 }
 0x383   :  { %558 = vst.msk [vmem:[#allocation2 + $0x2] sm:$0x3] %vm478_vm9, %v556_v3  ;;  %v567_v5 = vpack.c.bf16 %v556_v3, %v556_v3 }
 0x384   :  { %560 = vst [vmem:[#allocation1] ss:$4 sm:$0xff] %v556_v3 }
 0x385   :  { %2399 = vmatmul.msk.bf16.vlgmr.msra.gmra.mxu0 %vm409_vm10, %v567_v5  ;;  %2400 = vmatmul.msk.bf16.vlgmr.msra.gmra.mxu1 %vm409_vm10, %v567_v5 }
 0x386   :  { %891 = vmatpush.bf16.msra.mxu0 %v3057_v30  ;;  %904 = vmatpush.bf16.msra.mxu1 %v3086_v39 }
 0x38a   :  { %892 = vmatpush.bf16.msra.mxu0 %v3068_v33  ;;  %905 = vmatpush.bf16.msra.mxu1 %v3102_v44 }
 0x38b   :  { %v3237_v37 = vld.sshfl [vmem:[#allocation1] sm:$0xff pattern:$0x73625140] }
 0x38e   :  { %893 = vmatpush.bf16.msra.mxu0 %v3092_v41  ;;  %906 = vmatpush.bf16.msra.mxu1 %v3116_v49 }
 0x392   :  { %894 = vmatpush.bf16.msra.mxu0 %v3112_v47  ;;  %907 = vmatpush.bf16.msra.mxu1 %v3133_v52 }
 0x402   :  { %v580_v57 = vpop.f32.mrf.mxu0  ;;  %v593_v61 = vpop.f32.mrf.mxu1 }
 0x403   :  { %v598_v62 = vadd.f32 %v3196_v58, %v580_v57  ;;  %v618_v20 = vadd.f32 %v3198_v4, %v593_v61 }
 0x405   :  { %v2401_v6 = vmul.f32 -1.442695, %v598_v62 }
 0x407   :  { %2628 = vpow2.f32 %v2401_v6 }
 0x40a   :  { %v582_v7 = vpop.f32.mrf.mxu0  ;;  %v595_v8 = vpop.f32.mrf.mxu1 }
 0x40d   :  { %v2629_v9 = vpop.eup %2628 }
 0x40e   :  { %v602_v10 = vadd.f32 1.0, %v2629_v9 }
 0x410   :  { %2630 = vrcp.f32 %v602_v10  ;;  %v614_v15 = vand.u32 2147483648, %v602_v10  ;;  %v612_v17 = vand.u32 2147483647, %v602_v10  ;;  %vm608_vm0 = vweird.f32 %v602_v10 }
 0x412   :  { %v615_v12 = vor.u32 1.1754944e-38, %v614_v15  ;;  %vm613_vm6 = vcmp.eq.f32.partialorder %v612_v17, 8.507059e+37 }
 0x416   :  { %v2631_v11 = vpop.eup %2630 }
 0x417   :  { %v604_v13 = vmul.f32 %v2631_v11, %v602_v10  ;;  %vm609_vm15 = vweird.f32 %v2631_v11 }
 0x418   :  { %vm610_vm5 = vmor %vm608_vm0, %vm609_vm15 }
 0x419   :  { %v605_v14 = vsub.f32 1.0, %v604_v13 }
 0x41b   :  { %v606_v16 = vmul.f32 %v2631_v11, %v605_v14 }
 0x41d   :  { %v607_v18 = vadd.f32 %v2631_v11, %v606_v16 }
 0x41f   :  { %v611_v19 = vsel %vm610_vm5, %v2631_v11, %v607_v18 }
 0x420   :  { %v616_v21 = vsel %vm613_vm6, %v615_v12, %v611_v19 }
 0x421   :  { %v619_v23 = vmul.f32 %v618_v20, %v616_v21 }
 0x423   :  { %v623_v24 = vadd.f32 %v621_v22, %v619_v23 }
 0x425   :  { %2632 = vtanh.f32 %v623_v24 }
 0x42b   :  { %v2633_v25 = vpop.eup %2632 }
 0x42c   :  { %v625_v26 = vsub.f32 %v556_v3, %v2633_v25 }
 0x42e   :  { %627 = vrot.lane.b32.xlu2 %v625_v26, %s2906_s3 }
 0x488   :  { %v628_v27 = vpop.permute.xlu2 %627 }
 0x489   :  { %v630_v34 = vmul.f32 %v628_v27, %v616_v21 }
 0x48b   :  { %632 = vrot.lane.b32.xlu2 %v630_v34, %s2906_s3 }
 0x4e5   :  { %v633_v35 = vpop.permute.xlu2 %632 }
 0x4e6   :  { %v635_v36 = vadd.f32 %v2633_v25, %v633_v35  ;;  %v779_v25 = vrot.slane %v3181_v29, 2 }
 0x4e8   :  { %637 = vst.msk [vmem:[#allocation2 + $0x4] sm:$0x3] %vm478_vm9, %v635_v36  ;;  %v646_v38 = vpack.c.bf16 %v635_v36, %v635_v36 }
 0x4e9   :  { %639 = vst [vmem:[#allocation1] ss:$4 sm:$0xff] %v635_v36 }
 0x4ea   :  { %2402 = vmatmul.msk.bf16.vlgmr.msra.gmra.mxu2 %vm409_vm10, %v646_v38  ;;  %2403 = vmatmul.msk.bf16.vlgmr.msra.gmra.mxu3 %vm409_vm10, %v646_v38 }
 0x4eb   :  { %970 = vmatpush.bf16.msra.mxu2 %v3057_v30  ;;  %983 = vmatpush.bf16.msra.mxu3 %v3086_v39 }
 0x4ef   :  { %971 = vmatpush.bf16.msra.mxu2 %v3068_v33  ;;  %984 = vmatpush.bf16.msra.mxu3 %v3102_v44 }
 0x4f0   :  { %v3255_v62 = vld.sshfl [vmem:[#allocation1] sm:$0xff pattern:$0x73625140] }
 0x4f3   :  { %972 = vmatpush.bf16.msra.mxu2 %v3092_v41  ;;  %985 = vmatpush.bf16.msra.mxu3 %v3116_v49 }
 0x4f7   :  { %973 = vmatpush.bf16.msra.mxu2 %v3112_v47  ;;  %986 = vmatpush.bf16.msra.mxu3 %v3133_v52 }
 0x56d   :  { %v659_v58 = vpop.f32.mrf.mxu2  ;;  %v672_v40 = vpop.f32.mrf.mxu3 }
 0x56e   :  { %v677_v42 = vadd.f32 %v3192_v55, %v659_v58  ;;  %v697_v53 = vadd.f32 %v3198_v4, %v672_v40 }
 0x570   :  { %v2404_v43 = vmul.f32 -1.442695, %v677_v42 }
 0x572   :  { %2634 = vpow2.f32 %v2404_v43 }
 0x575   :  { %v661_v30 = vpop.f32.mrf.mxu2  ;;  %v674_v39 = vpop.f32.mrf.mxu3 }
 0x578   :  { %v2635_v45 = vpop.eup %2634 }
 0x579   :  { %v681_v33 = vadd.f32 1.0, %v2635_v45 }
 0x57b   :  { %2636 = vrcp.f32 %v681_v33  ;;  %v693_v48 = vand.u32 2147483648, %v681_v33  ;;  %v691_v47 = vand.u32 2147483647, %v681_v33  ;;  %vm687_vm8 = vweird.f32 %v681_v33 }
 0x57d   :  { %v694_v52 = vor.u32 1.1754944e-38, %v693_v48  ;;  %vm692_vm12 = vcmp.eq.f32.partialorder %v691_v47, 8.507059e+37 }
 0x581   :  { %v2637_v44 = vpop.eup %2636 }
 0x582   :  { %v683_v46 = vmul.f32 %v2637_v44, %v681_v33  ;;  %vm688_vm7 = vweird.f32 %v2637_v44 }
 0x583   :  { %vm689_vm11 = vmor %vm687_vm8, %vm688_vm7 }
 0x584   :  { %v684_v41 = vsub.f32 1.0, %v683_v46 }
 0x586   :  { %v685_v49 = vmul.f32 %v2637_v44, %v684_v41 }
 0x588   :  { %v686_v50 = vadd.f32 %v2637_v44, %v685_v49 }
 0x58a   :  { %v690_v51 = vsel %vm689_vm11, %v2637_v44, %v686_v50 }
 0x58b   :  { %v695_v56 = vsel %vm692_vm12, %v694_v52, %v690_v51 }
 0x58c   :  { %v698_v60 = vmul.f32 %v697_v53, %v695_v56 }
 0x58e   :  { %v702_v63 = vadd.f32 %v700_v59, %v698_v60 }
 0x590   :  { %2638 = vtanh.f32 %v702_v63 }
 0x596   :  { %v2639_v1 = vpop.eup %2638 }
 0x597   :  { %v704_v2 = vsub.f32 %v635_v36, %v2639_v1 }
 0x599   :  { %706 = vrot.lane.b32.xlu0 %v704_v2, %s2906_s3 }
 0x60b   :  { %v707_v3 = vpop.permute.xlu0 %706 }
 0x60c   :  { %v709_v5 = vmul.f32 %v707_v3, %v695_v56 }
 0x60e   :  { %711 = vrot.lane.b32.xlu1 %v709_v5, %s2906_s3 }
 0x680   :  { %v712_v57 = vpop.permute.xlu1 %711 }
 0x681   :  { %v714_v61 = vadd.f32 %v2639_v1, %v712_v57  ;;  %v858_v1 = vrot.slane %v3183_v31, 2 }
 0x683   :  { %716 = vst.msk [vmem:[#allocation2 + $0x6] sm:$0x3] %vm478_vm9, %v714_v61  ;;  %v725_v6 = vpack.c.bf16 %v714_v61, %v714_v61 }
 0x684   :  { %718 = vst [vmem:[#allocation1] ss:$4 sm:$0xff] %v714_v61 }
 0x685   :  { %2405 = vmatmul.msk.bf16.vlgmr.msrb.gmra.mxu0 %vm409_vm10, %v725_v6  ;;  %2406 = vmatmul.msk.bf16.vlgmr.msrb.gmra.mxu1 %vm409_vm10, %v725_v6 }
 0x68b   :  { %v3265_v42 = vld.sshfl [vmem:[#allocation1] sm:$0xff pattern:$0x73625140] }
 0x702   :  { %v738_v55 = vpop.f32.mrf.mxu0  ;;  %v751_v7 = vpop.f32.mrf.mxu1 }
 0x703   :  { %v756_v8 = vadd.f32 %v3181_v29, %v738_v55  ;;  %v776_v23 = vadd.f32 %v3198_v4, %v751_v7 }
 0x705   :  { %v2407_v9 = vmul.f32 -1.442695, %v756_v8 }
 0x707   :  { %2640 = vpow2.f32 %v2407_v9 }
 0x70a   :  { %v740_v10 = vpop.f32.mrf.mxu0  ;;  %v753_v11 = vpop.f32.mrf.mxu1 }
 0x70d   :  { %v2641_v13 = vpop.eup %2640 }
 0x70e   :  { %v760_v14 = vadd.f32 1.0, %v2641_v13 }
 0x710   :  { %2642 = vrcp.f32 %v760_v14  ;;  %v772_v18 = vand.u32 2147483648, %v760_v14  ;;  %v770_v19 = vand.u32 2147483647, %v760_v14  ;;  %vm766_vm14 = vweird.f32 %v760_v14 }
 0x712   :  { %v773_v21 = vor.u32 1.1754944e-38, %v772_v18  ;;  %vm771_vm0 = vcmp.eq.f32.partialorder %v770_v19, 8.507059e+37 }
 0x716   :  { %v2643_v15 = vpop.eup %2642 }
 0x717   :  { %v762_v16 = vmul.f32 %v2643_v15, %v760_v14  ;;  %vm767_vm13 = vweird.f32 %v2643_v15 }
 0x718   :  { %vm768_vm15 = vmor %vm766_vm14, %vm767_vm13 }
 0x719   :  { %v763_v17 = vsub.f32 1.0, %v762_v16 }
 0x71b   :  { %v764_v12 = vmul.f32 %v2643_v15, %v763_v17 }
 0x71d   :  { %v765_v20 = vadd.f32 %v2643_v15, %v764_v12 }
 0x71f   :  { %v769_v22 = vsel %vm768_vm15, %v2643_v15, %v765_v20 }
 0x720   :  { %v774_v24 = vsel %vm771_vm0, %v773_v21, %v769_v22 }
 0x721   :  { %v777_v26 = vmul.f32 %v776_v23, %v774_v24 }
 0x723   :  { %v781_v27 = vadd.f32 %v779_v25, %v777_v26 }
 0x725   :  { %2644 = vtanh.f32 %v781_v27 }
 0x72b   :  { %v2645_v34 = vpop.eup %2644 }
 0x72c   :  { %v783_v35 = vsub.f32 %v714_v61, %v2645_v34 }
 0x72e   :  { %785 = vrot.lane.b32.xlu2 %v783_v35, %s2906_s3 }
 0x788   :  { %v786_v36 = vpop.permute.xlu2 %785 }
 0x789   :  { %v788_v38 = vmul.f32 %v786_v36, %v774_v24 }
 0x78b   :  { %790 = vrot.lane.b32.xlu0 %v788_v38, %s2906_s3 }
 0x7fd   :  { %v791_v58 = vpop.permute.xlu0 %790 }
 0x7fe   :  { %v793_v40 = vadd.f32 %v2645_v34, %v791_v58  ;;  %v937_v34 = vrot.slane %v3185_v32, 2 }
 0x800   :  { %795 = vst.msk [vmem:[#allocation2 + $0x8] sm:$0x3] %vm478_vm9, %v793_v40  ;;  %v804_v43 = vpack.c.bf16 %v793_v40, %v793_v40 }
 0x801   :  { %797 = vst [vmem:[#allocation1] ss:$4 sm:$0xff] %v793_v40 }
 0x802   :  { %2408 = vmatmul.msk.bf16.vlgmr.msrb.gmra.mxu2 %vm409_vm10, %v804_v43  ;;  %2409 = vmatmul.msk.bf16.vlgmr.msrb.gmra.mxu3 %vm409_vm10, %v804_v43 }
 0x808   :  { %v3275_v8 = vld.sshfl [vmem:[#allocation1] sm:$0xff pattern:$0x73625140] }
 0x885   :  { %v817_v29 = vpop.f32.mrf.mxu2  ;;  %v830_v30 = vpop.f32.mrf.mxu3 }
 0x886   :  { %v835_v39 = vadd.f32 %v3183_v31, %v817_v29  ;;  %v855_v60 = vadd.f32 %v3198_v4, %v830_v30 }
 0x888   :  { %v2410_v45 = vmul.f32 -1.442695, %v835_v39 }
 0x88a   :  { %2646 = vpow2.f32 %v2410_v45 }
 0x88d   :  { %v819_v33 = vpop.f32.mrf.mxu2  ;;  %v832_v44 = vpop.f32.mrf.mxu3 }
 0x890   :  { %v2647_v46 = vpop.eup %2646 }
 0x891   :  { %v839_v41 = vadd.f32 1.0, %v2647_v46 }
 0x893   :  { %2648 = vrcp.f32 %v839_v41  ;;  %v851_v50 = vand.u32 2147483648, %v839_v41  ;;  %v849_v51 = vand.u32 2147483647, %v839_v41  ;;  %vm845_vm6 = vweird.f32 %v839_v41 }
 0x895   :  { %v852_v56 = vor.u32 1.1754944e-38, %v851_v50  ;;  %vm850_vm8 = vcmp.eq.f32.partialorder %v849_v51, 8.507059e+37 }
 0x899   :  { %v2649_v48 = vpop.eup %2648 }
 0x89a   :  { %v841_v49 = vmul.f32 %v2649_v48, %v839_v41  ;;  %vm846_vm5 = vweird.f32 %v2649_v48 }
 0x89b   :  { %vm847_vm7 = vmor %vm845_vm6, %vm846_vm5 }
 0x89c   :  { %v842_v47 = vsub.f32 1.0, %v841_v49 }
 0x89e   :  { %v843_v52 = vmul.f32 %v2649_v48, %v842_v47 }
 0x8a0   :  { %v844_v53 = vadd.f32 %v2649_v48, %v843_v52 }
 0x8a2   :  { %v848_v59 = vsel %vm847_vm7, %v2649_v48, %v844_v53  ;;  %vm1132_vm7 = vcmask 261120  }
 0x8a3   :  { %v853_v63 = vsel %vm850_vm8, %v852_v56, %v848_v59 }
 0x8a4   :  { %v856_v2 = vmul.f32 %v855_v60, %v853_v63 }
 0x8a6   :  { %v860_v3 = vadd.f32 %v858_v1, %v856_v2 }
 0x8a8   :  { %2650 = vtanh.f32 %v860_v3 }
 0x8ae   :  { %v2651_v5 = vpop.eup %2650 }
 0x8af   :  { %v862_v57 = vsub.f32 %v793_v40, %v2651_v5 }
 0x8b1   :  { %864 = vrot.lane.b32.xlu1 %v862_v57, %s2906_s3 }
 0x923   :  { %v865_v61 = vpop.permute.xlu1 %864 }
 0x924   :  { %v867_v6 = vmul.f32 %v865_v61, %v853_v63  ;;  %v1016_v61 = vrot.slane %v3179_v28, 2 }
 0x926   :  { %869 = vrot.lane.b32.xlu2 %v867_v6, %s2906_s3 }
 0x980   :  { %v870_v55 = vpop.permute.xlu2 %869 }
 0x981   :  { %v872_v7 = vadd.f32 %v2651_v5, %v870_v55 }
 0x983   :  { %874 = vst.msk [vmem:[#allocation2 + $0xa] sm:$0x3] %vm478_vm9, %v872_v7  ;;  %v883_v9 = vpack.c.bf16 %v872_v7, %v872_v7 }
 0x984   :  { %876 = vst [vmem:[#allocation1] ss:$4 sm:$0xff] %v872_v7 }
 0x985   :  { %2411 = vmatmul.msk.bf16.vlgmr.msra.gmra.mxu0 %vm409_vm10, %v883_v9  ;;  %2412 = vmatmul.msk.bf16.vlgmr.msra.gmra.mxu1 %vm409_vm10, %v883_v9 }
 0x98b   :  { %v877_v30 = vld.sshfl [vmem:[#allocation1] sm:$0xff pattern:$0x73625140] }
 0xa02   :  { %v896_v31 = vpop.f32.mrf.mxu0  ;;  %v909_v10 = vpop.f32.mrf.mxu1 }
 0xa03   :  { %v914_v11 = vadd.f32 %v3185_v32, %v896_v31  ;;  %v934_v26 = vadd.f32 %v3198_v4, %v909_v10 }
 0xa05   :  { %v2413_v13 = vmul.f32 -1.442695, %v914_v11 }
 0xa07   :  { %2652 = vpow2.f32 %v2413_v13 }
 0xa0a   :  { %v898_v14 = vpop.f32.mrf.mxu0  ;;  %v911_v15 = vpop.f32.mrf.mxu1 }
 0xa0d   :  { %v2653_v16 = vpop.eup %2652 }
 0xa0e   :  { %v918_v17 = vadd.f32 1.0, %v2653_v16 }
 0xa10   :  { %2654 = vrcp.f32 %v918_v17  ;;  %v930_v20 = vand.u32 2147483648, %v918_v17  ;;  %v928_v22 = vand.u32 2147483647, %v918_v17  ;;  %vm924_vm12 = vweird.f32 %v918_v17 }
 0xa12   :  { %v931_v24 = vor.u32 1.1754944e-38, %v930_v20  ;;  %vm929_vm14 = vcmp.eq.f32.partialorder %v928_v22, 8.507059e+37 }
 0xa16   :  { %v2655_v18 = vpop.eup %2654 }
 0xa17   :  { %v920_v12 = vmul.f32 %v2655_v18, %v918_v17  ;;  %vm925_vm11 = vweird.f32 %v2655_v18 }
 0xa18   :  { %vm926_vm13 = vmor %vm924_vm12, %vm925_vm11 }
 0xa19   :  { %v921_v19 = vsub.f32 1.0, %v920_v12 }
 0xa1b   :  { %v922_v21 = vmul.f32 %v2655_v18, %v921_v19 }
 0xa1d   :  { %v923_v23 = vadd.f32 %v2655_v18, %v922_v21 }
 0xa1f   :  { %v927_v25 = vsel %vm926_vm13, %v2655_v18, %v923_v23 }
 0xa20   :  { %v932_v27 = vsel %vm929_vm14, %v931_v24, %v927_v25 }
 0xa21   :  { %v935_v35 = vmul.f32 %v934_v26, %v932_v27 }
 0xa23   :  { %v939_v36 = vadd.f32 %v937_v34, %v935_v35  ;;  %v2580_v34 = vld [vmem:[#allocation13 + $0x34] sm:$0xf0]  ;;  %v2579_v35 = vld [vmem:[#allocation13 + $0x34] sm:$0xf] }
 0xa25   :  { %2656 = vtanh.f32 %v939_v36 }
 0xa2b   :  { %v2657_v38 = vpop.eup %2656 }
 0xa2c   :  { %v941_v58 = vsub.f32 %v872_v7, %v2657_v38 }
 0xa2e   :  { %943 = vrot.lane.b32.xlu0 %v941_v58, %s2906_s3 }
 0xaa0   :  { %v944_v40 = vpop.permute.xlu0 %943 }
 0xaa1   :  { %v946_v43 = vmul.f32 %v944_v40, %v932_v27  ;;  %v2427_v27 = vld [vmem:[#allocation13 + $0x30] sm:$0xf] }
 0xaa2   :  { %v2428_v36 = vor.u32 %v2580_v34, %v2427_v27 }
 0xaa3   :  { %948 = vrot.lane.b32.xlu1 %v946_v43, %s2906_s3  ;;  %v2419_v43 = vld [vmem:[#allocation13 + $0x20] sm:$0xf] }
 0xaa4   :  { %1141 = vmatpush.bf16.msrb.mxu0 %v2428_v36  ;;  %v2584_v36 = vld [vmem:[#allocation14 + $0x14] sm:$0xf0] }
 0xaab   :  { %483 = vrot.lane.b32.xlu1 %v3219_v0, %s2907_s22 }
 0xab3   :  { %720 = vrot.lane.b32.xlu1 %v3265_v42, %s2907_s22 }
 0xb15   :  { %v949_v29 = vpop.permute.xlu1 %948 }
 0xb16   :  { %v951_v32 = vadd.f32 %v2657_v38, %v949_v29  ;;  %v2429_v38 = vld [vmem:[#allocation13 + $0x38] sm:$0xf0]  ;;  %v2578_v29 = vld [vmem:[#allocation13 + $0x24] sm:$0xf0] }
 0xb17   :  { %v2432_v40 = vor.u32 %v2579_v35, %v2429_v38  ;;  %v2481_v35 = vld [vmem:[#allocation14 + $0x10] sm:$0xf] }
 0xb18   :  { %953 = vst.msk [vmem:[#allocation2 + $0xc] sm:$0x3] %vm478_vm9, %v951_v32  ;;  %v962_v39 = vpack.c.bf16 %v951_v32, %v951_v32 }
 0xb19   :  { %955 = vst [vmem:[#allocation1] ss:$4 sm:$0xff] %v951_v32  ;;  %1155 = vmatpush.bf16.msrb.mxu1 %v2432_v40  ;;  %v2581_v40 = vld [vmem:[#allocation14 + $0x4] sm:$0xf] }
 0xb1a   :  { %2414 = vmatmul.msk.bf16.vlgmr.msra.gmra.mxu2 %vm409_vm10, %v962_v39  ;;  %2415 = vmatmul.msk.bf16.vlgmr.msra.gmra.mxu3 %vm409_vm10, %v962_v39  ;;  %v2421_v39 = vld [vmem:[#allocation13 + $0x28] sm:$0xf0] }
 0xb1d   :  { %v484_v45 = vpop.permute.xlu1 %483 }
 0xb1e   :  { %487 = vst.msk [vmem:[#allocation3 + $0xe] sm:$0x3] %vm478_vm9, %v484_v45 }
 0xb20   :  { %v956_v33 = vld.sshfl [vmem:[#allocation1] sm:$0xff pattern:$0x73625140] }
 0xb21   :  { %957 = vrot.lane.b32.xlu1 %v956_v33, %s2907_s22  ;;  %v2575_v33 = vld [vmem:[#allocation13 + $0x14] sm:$0xf] }
 0xb25   :  { %v721_v0 = vpop.permute.xlu1 %720 }
 0xb26   :  { %724 = vst.msk [vmem:[#allocation3 + $0x8] sm:$0x3] %vm478_vm9, %v721_v0  ;;  %v2447_v0 = vld [vmem:[#allocation13 + $0x18] sm:$0xf0] }
 0xb2d   :  { %v1060_v15 = vld [vmem:[#allocation3 + $0x8] sm:$0x3] }
 0xb2e   :  { %v3316_v19 = vpack.c.bf16 %v1060_v15, %v1060_v15  ;;  %v1046_v15 = vld [vmem:[#allocation2 + $0xc] sm:$0x3] }
 0xb2f   :  { %v3357_v27 = vpack.c.bf16 %v1046_v15, %v1046_v15 }
 0xb93   :  { %v958_v42 = vpop.permute.xlu1 %957 }
 0xb94   :  { %961 = vst.msk [vmem:[#allocation3 + $0x2] sm:$0x3] %vm478_vm9, %v958_v42  ;;  %v2445_v42 = vld [vmem:[#allocation13 + $0x10] sm:$0xf] }
 0xb9d   :  { %v975_v44 = vpop.f32.mrf.mxu2  ;;  %v988_v46 = vpop.f32.mrf.mxu3 }
 0xb9e   :  { %v993_v41 = vadd.f32 %v3179_v28, %v975_v44  ;;  %v1013_v5 = vadd.f32 %v3198_v4, %v988_v46  ;;  %v2450_v44 = vor.u32 %v2575_v33, %v2447_v0  ;;  %v2576_v46 = vld [vmem:[#allocation13 + $0x14] sm:$0xf0] }
 0xb9f   :  { %v2596_v33 = vld [vmem:[#allocation16 + $0x34] sm:$0xf0] }
 0xba0   :  { %v2416_v48 = vmul.f32 -1.442695, %v993_v41  ;;  %1229 = vmatpush.bf16.msrb.mxu3 %v2450_v44  ;;  %v2594_v44 = vld [vmem:[#allocation16 + $0x24] sm:$0xf0] }
 0xba2   :  { %2658 = vpow2.f32 %v2416_v48  ;;  %v2446_v48 = vor.u32 %v2576_v46, %v2445_v42  ;;  %v2507_v42 = vld [vmem:[#allocation16 + $0x20] sm:$0xf] }
 0xba4   :  { %1215 = vmatpush.bf16.msrb.mxu2 %v2446_v48  ;;  %v2499_v48 = vld [vmem:[#allocation16 + $0x10] sm:$0xf] }
 0xba5   :  { %v977_v49 = vpop.f32.mrf.mxu2  ;;  %v990_v47 = vpop.f32.mrf.mxu3 }
 0xba6   :  { %v2573_v47 = vld [vmem:[#allocation13 + $0x4] sm:$0xf] }
 0xba8   :  { %v2659_v50 = vpop.eup %2658 }
 0xba9   :  { %v997_v52 = vadd.f32 1.0, %v2659_v50  ;;  %v2439_v50 = vld [vmem:[#allocation13 + $0x8] sm:$0xf0] }
 0xbab   :  { %2660 = vrcp.f32 %v997_v52  ;;  %v1009_v59 = vand.u32 2147483648, %v997_v52  ;;  %v1007_v63 = vand.u32 2147483647, %v997_v52  ;;  %vm1003_vm0 = vweird.f32 %v997_v52 }
 0xbad   :  { %v1010_v2 = vor.u32 1.1754944e-38, %v1009_v59  ;;  %vm1008_vm6 = vcmp.eq.f32.partialorder %v1007_v63, 8.507059e+37  ;;  %v1040_v59 = vld [vmem:[#allocation2] sm:$0x3]  ;;  %v2588_v63 = vld [vmem:[#allocation14 + $0x34] sm:$0xf0] }
 0xbb1   :  { %v2661_v51 = vpop.eup %2660 }
 0xbb2   :  { %v999_v53 = vmul.f32 %v2661_v51, %v997_v52  ;;  %vm1004_vm15 = vweird.f32 %v2661_v51  ;;  %v2437_v52 = vld [vmem:[#allocation13] sm:$0xf] }
 0xbb3   :  { %vm1005_vm5 = vmor %vm1003_vm0, %vm1004_vm15 }
 0xbb4   :  { %v1000_v56 = vsub.f32 1.0, %v999_v53  ;;  %v2574_v53 = vld [vmem:[#allocation13 + $0x4] sm:$0xf0] }
 0xbb6   :  { %v1001_v60 = vmul.f32 %v2661_v51, %v1000_v56  ;;  %v2438_v56 = vor.u32 %v2574_v53, %v2437_v52  ;;  %v2517_v52 = vld [vmem:[#allocation16 + $0x38] sm:$0xf0] }
 0xbb8   :  { %v1002_v1 = vadd.f32 %v2661_v51, %v1001_v60  ;;  %1216 = vmatpush.bf16.msrb.mxu2 %v2438_v56  ;;  %v2463_v60 = vld [vmem:[#allocation14 + $0x30] sm:$0xf] }
 0xbba   :  { %v1006_v3 = vsel %vm1005_vm5, %v2661_v51, %v1002_v1  ;;  %v2442_v51 = vor.u32 %v2573_v47, %v2439_v50  ;;  %v2587_v1 = vld [vmem:[#allocation14 + $0x34] sm:$0xf]  ;;  %v2592_v47 = vld [vmem:[#allocation16 + $0x14] sm:$0xf0] }
 0xbbb   :  { %v1011_v57 = vsel %vm1008_vm6, %v1010_v2, %v1006_v3  ;;  %v1041_v2 = vld [vmem:[#allocation2 + $0x2] sm:$0x3]  ;;  %v2464_v3 = vor.u32 %v2588_v63, %v2463_v60  ;;  %v2595_v50 = vld [vmem:[#allocation16 + $0x34] sm:$0xf]  ;;  %v3377_v53 = vor.u32 %v2592_v47, %v2499_v48  ;;  %v2590_v60 = vld [vmem:[#allocation16 + $0x4] sm:$0xf0] }
 0xbbc   :  { %v1014_v6 = vmul.f32 %v1013_v5, %v1011_v57  ;;  %1230 = vmatpush.bf16.msrb.mxu3 %v2442_v51  ;;  %v2465_v5 = vld [vmem:[#allocation14 + $0x38] sm:$0xf0]  ;;  %v2593_v51 = vld [vmem:[#allocation16 + $0x24] sm:$0xf]  ;;  %v3379_v56 = vor.u32 %v2595_v50, %v2517_v52 }
 0xbbd   :  { %v2501_v63 = vld [vmem:[#allocation16 + $0x18] sm:$0xf0] }
 0xbbe   :  { %v1018_v55 = vadd.f32 %v1016_v61, %v1014_v6  ;;  %v2468_v61 = vor.u32 %v2587_v1, %v2465_v5  ;;  %v3339_v6 = vpack.c.bf16 %v1040_v59, %v1040_v59  ;;  %v2491_v59 = vld [vmem:[#allocation16] sm:$0xf]  ;;  %v2589_v1 = vld [vmem:[#allocation16 + $0x4] sm:$0xf]  ;;  %v1237_v5 = vld [vmem:[%s3660_s9] sm:$0x3] }
 0xbc0   :  { %2662 = vtanh.f32 %v1018_v55  ;;  %v1043_v55 = vld [vmem:[#allocation2 + $0x6] sm:$0x3] }
 0xbc6   :  { %v2663_v7 = vpop.eup %2662 }
 0xbc7   :  { %v1020_v9 = vsub.f32 %v951_v32, %v2663_v7  ;;  %v2577_v32 = vld [vmem:[#allocation13 + $0x24] sm:$0xf] }
 0xbc8   :  { %v2424_v45 = vor.u32 %v2577_v32, %v2421_v39  ;;  %v2473_v32 = vld [vmem:[#allocation14] sm:$0xf] }
 0xbc9   :  { %1022 = vrot.lane.b32.xlu2 %v1020_v9, %s2906_s3  ;;  %v1045_v9 = vld [vmem:[#allocation2 + $0xa] sm:$0x3] }
 0xbca   :  { %1156 = vmatpush.bf16.msrb.mxu1 %v2424_v45  ;;  %v2515_v45 = vld [vmem:[#allocation16 + $0x30] sm:$0xf] }
 0xbcb   :  { %v3365_v0 = vor.u32 %v2596_v33, %v2515_v45 }
 0xbce   :  { %1333 = vmatpush.bf16.msra.mxu1 %v2468_v61  ;;  %v1240_v61 = vperm.slane %v1237_v5, 1 }
 0xbd1   :  { %562 = vrot.lane.b32.xlu2 %v3237_v37, %s2907_s22 }
 0xbd9   :  { %799 = vrot.lane.b32.xlu2 %v3275_v8, %s2907_s22  ;;  %v1057_v8 = vld [vmem:[#allocation3 + $0x2] sm:$0x3] }
 0xbda   :  { %v3312_v16 = vpack.c.bf16 %v1057_v8, %v1057_v8  ;;  %v2585_v8 = vld [vmem:[#allocation14 + $0x24] sm:$0xf] }
 0xc23   :  { %v1023_v31 = vpop.permute.xlu2 %1022 }
 0xc24   :  { %v1025_v10 = vmul.f32 %v1023_v31, %v1011_v57  ;;  %v1042_v57 = vld [vmem:[#allocation2 + $0x4] sm:$0x3]  ;;  %v3341_v31 = vpack.c.bf16 %v1041_v2, %v1041_v2 }
 0xc26   :  { %1027 = vrot.lane.b32.xlu0 %v1025_v10, %s2906_s3 }
 0xc2b   :  { %v563_v4 = vpop.permute.xlu2 %562 }
 0xc2c   :  { %566 = vst.msk [vmem:[#allocation3 + $0xc] sm:$0x3] %vm478_vm9, %v563_v4  ;;  %v2455_v4 = vld [vmem:[#allocation14 + $0x20] sm:$0xf] }
 0xc2e   :  { %641 = vrot.lane.b32.xlu0 %v3255_v62, %s2907_s22  ;;  %v1063_v62 = vld [vmem:[#allocation3 + $0xe] sm:$0x3] }
 0xc2f   :  { %v3323_v21 = vpack.c.bf16 %v1063_v62, %v1063_v62 }
 0xc33   :  { %v800_v28 = vpop.permute.xlu2 %799  ;;  %v1062_v17 = vld [vmem:[#allocation3 + $0xc] sm:$0x3] }
 0xc34   :  { %803 = vst.msk [vmem:[#allocation3 + $0x6] sm:$0x3] %vm478_vm9, %v800_v28  ;;  %v3320_v20 = vpack.c.bf16 %v1062_v17, %v1062_v17  ;;  %v2586_v28 = vld [vmem:[#allocation14 + $0x24] sm:$0xf0] }
 0xc36   :  { %878 = vrot.lane.b32.xlu0 %v877_v30, %s2907_s22  ;;  %v2420_v30 = vor.u32 %v2578_v29, %v2419_v43  ;;  %v2475_v43 = vld [vmem:[#allocation14 + $0x8] sm:$0xf0] }
 0xc37   :  { %v2478_v29 = vor.u32 %v2581_v40, %v2475_v43 }
 0xc38   :  { %1142 = vmatpush.bf16.msrb.mxu0 %v2420_v30  ;;  %v2582_v30 = vld [vmem:[#allocation14 + $0x4] sm:$0xf0] }
 0xc39   :  { %v2474_v39 = vor.u32 %v2582_v30, %v2473_v32 }
 0xc3b   :  { %v1059_v13 = vld [vmem:[#allocation3 + $0x6] sm:$0x3] }
 0xc3c   :  { %v3314_v18 = vpack.c.bf16 %v1059_v13, %v1059_v13  ;;  %1319 = vmatpush.bf16.msra.mxu0 %v2464_v3  ;;  %v2457_v13 = vld [vmem:[#allocation14 + $0x28] sm:$0xf0] }
 0xc3d   :  { %v2460_v17 = vor.u32 %v2585_v8, %v2457_v13 }
 0xc3f   :  { %1334 = vmatpush.bf16.msra.mxu1 %v2460_v17 }
 0xc98   :  { %v1028_v11 = vpop.permute.xlu0 %1027 }
 0xc99   :  { %v1030_v37 = vadd.f32 %v2663_v7, %v1028_v11  ;;  %v1044_v7 = vld [vmem:[#allocation2 + $0x8] sm:$0x3]  ;;  %v3343_v11 = vpack.c.bf16 %v1042_v57, %v1042_v57 }
 0xc9a   :  { %v3351_v62 = vpack.c.bf16 %v1044_v7, %v1044_v7 }
 0xc9b   :  { %1032 = vst.msk [vmem:[#allocation2 + $0xe] sm:$0x3] %vm478_vm9, %v1030_v37 }
 0xc9c   :  { %1034 = vst [vmem:[#allocation1] ss:$4 sm:$0xff] %v1030_v37  ;;  %v2456_v37 = vor.u32 %v2586_v28, %v2455_v4 }
 0xc9e   :  { %1320 = vmatpush.bf16.msra.mxu0 %v2456_v37 }
 0xca0   :  { %v642_v14 = vpop.permute.xlu0 %641 }
 0xca1   :  { %645 = vst.msk [vmem:[#allocation3 + $0xa] sm:$0x3] %vm478_vm9, %v642_v14  ;;  %v3348_v14 = vpack.c.bf16 %v1043_v55, %v1043_v55 }
 0xca3   :  { %v1035_v12 = vld.sshfl [vmem:[#allocation1] sm:$0xff pattern:$0x73625140] }
 0xca4   :  { %1092 = vst [vmem:[#allocation1 + $0x1] ss:$9 sm:$0xff] %v3312_v16  ;;  %1036 = vrot.lane.b32.xlu2 %v1035_v12, %s2907_s22  ;;  %v1047_v12 = vld [vmem:[#allocation2 + $0xe] sm:$0x3] }
 0xca5   :  { %1098 = vst [vmem:[#allocation1 + $0x3] ss:$9 sm:$0xff] %v3314_v18  ;;  %v3360_v38 = vpack.c.bf16 %v1047_v12, %v1047_v12 }
 0xca6   :  { %1101 = vst [vmem:[#allocation1 + $0x4] ss:$9 sm:$0xff] %v3316_v19 }
 0xca7   :  { %1107 = vst [vmem:[#allocation1 + $0x6] ss:$9 sm:$0xff] %v3320_v20 }
 0xca8   :  { %1110 = vst [vmem:[#allocation1 + $0x7] ss:$9 sm:$0xff] %v3323_v21  ;;  %v1061_v22 = vld [vmem:[#allocation3 + $0xa] sm:$0x3]  ;;  %v879_v23 = vpop.permute.xlu0 %878 }
 0xca9   :  { %v3328_v24 = vpack.c.bf16 %v1061_v22, %v1061_v22  ;;  %882 = vst.msk [vmem:[#allocation3 + $0x4] sm:$0x3] %vm478_vm9, %v879_v23  ;;  %v3354_v22 = vpack.c.bf16 %v1045_v9, %v1045_v9  ;;  %v2583_v23 = vld [vmem:[#allocation14 + $0x14] sm:$0xf] }
 0xcab   :  { %1104 = vst [vmem:[#allocation1 + $0x5] ss:$9 sm:$0xff] %v3328_v24 }
 0xcb0   :  { %v1058_v25 = vld [vmem:[#allocation3 + $0x4] sm:$0x3] }
 0xcb1   :  { %v3332_v26 = vpack.c.bf16 %v1058_v25, %v1058_v25  ;;  %v2483_v25 = vld [vmem:[#allocation14 + $0x18] sm:$0xf0] }
 0xcb2   :  { %v2486_v34 = vor.u32 %v2583_v23, %v2483_v25 }
 0xcb3   :  { %1095 = vst [vmem:[#allocation1 + $0x2] ss:$9 sm:$0xff] %v3332_v26 }
 0xcb4   :  { %1399 = vmatpush.bf16.msra.mxu3 %v2486_v34 }
 0xcb8   :  { %1400 = vmatpush.bf16.msra.mxu3 %v2478_v29 }
 0xcfe   :  { %v1037_v58 = vpop.permute.xlu2 %1036 }
 0xcff   :  { %1039 = vst.msk [vmem:[#allocation3] sm:$0x3] %vm478_vm9, %v1037_v58  ;;  %v2482_v58 = vor.u32 %v2584_v36, %v2481_v35 }
 0xd01   :  { %1385 = vmatpush.bf16.msra.mxu2 %v2482_v58 }
 0xd05   :  { %1386 = vmatpush.bf16.msra.mxu2 %v2474_v39 }
 0xd06   :  { %v1056_v41 = vld [vmem:[#allocation3] sm:$0x3] }
 0xd07   :  { %v3336_v49 = vpack.c.bf16 %v1056_v41, %v1056_v41  ;;  %v3368_v41 = vor.u32 %v2594_v44, %v2507_v42 }
 0xd09   :  { %1089 = vst [vmem:[#allocation1] ss:$9 sm:$0xff] %v3336_v49 }
 0xd10   :  { %v1111_v10 = vld [vmem:[#allocation1] sm:$0xff] }
 0xd11   :  { %1164 = vst [vmem:[#allocation1] ss:$9 sm:$0xff] %v3339_v6  ;;  %2433 = vmatmul.msk.bf16.vlgmr.msrb.gmra.mxu0 %vm1132_vm7, %v1111_v10  ;;  %2434 = vmatmul.msk.bf16.vlgmr.msrb.gmra.mxu1 %vm1132_vm7, %v1111_v10 }
 0xd12   :  { %1167 = vst [vmem:[#allocation1 + $0x1] ss:$9 sm:$0xff] %v3341_v31  ;;  %1491 = vmatpush.bf16.msrb.mxu0 %v3365_v0  ;;  %1504 = vmatpush.bf16.msrb.mxu1 %v3379_v56 }
 0xd13   :  { %1170 = vst [vmem:[#allocation1 + $0x2] ss:$9 sm:$0xff] %v3343_v11 }
 0xd14   :  { %1173 = vst [vmem:[#allocation1 + $0x3] ss:$9 sm:$0xff] %v3348_v14 }
 0xd15   :  { %1176 = vst [vmem:[#allocation1 + $0x4] ss:$9 sm:$0xff] %v3351_v62 }
 0xd16   :  { %1179 = vst [vmem:[#allocation1 + $0x5] ss:$9 sm:$0xff] %v3354_v22  ;;  %1492 = vmatpush.bf16.msrb.mxu0 %v3368_v41 }
 0xd17   :  { %1182 = vst [vmem:[#allocation1 + $0x6] ss:$9 sm:$0xff] %v3357_v27 }
 0xd18   :  { %1185 = vst [vmem:[#allocation1 + $0x7] ss:$9 sm:$0xff] %v3360_v38 }
 0xd1a   :  { %1493 = vmatpush.bf16.msrb.mxu0 %v3377_v53 }
 0xd1f   :  { %v1186_v46 = vld [vmem:[#allocation1] sm:$0xff] }
 0xd20   :  { %1275 = vst [vmem:[#allocation1] ss:$9 sm:$0xff] %v3336_v49  ;;  %2451 = vmatmul.msk.bf16.vlgmr.msrb.gmra.mxu2 %vm1132_vm7, %v1186_v46  ;;  %2452 = vmatmul.msk.bf16.vlgmr.msrb.gmra.mxu3 %vm1132_vm7, %v1186_v46  ;;  %v2509_v49 = vld [vmem:[#allocation16 + $0x28] sm:$0xf0] }
 0xd21   :  { %1277 = vst [vmem:[#allocation1 + $0x1] ss:$9 sm:$0xff] %v3312_v16  ;;  %1569 = vmatpush.bf16.msrb.mxu2 %v3365_v0  ;;  %v3384_v16 = vor.u32 %v2593_v51, %v2509_v49  ;;  %1582 = vmatpush.bf16.msrb.mxu3 %v3379_v56 }
 0xd22   :  { %1279 = vst [vmem:[#allocation1 + $0x2] ss:$9 sm:$0xff] %v3332_v26  ;;  %v2591_v26 = vld [vmem:[#allocation16 + $0x14] sm:$0xf] }
 0xd23   :  { %1281 = vst [vmem:[#allocation1 + $0x3] ss:$9 sm:$0xff] %v3314_v18  ;;  %v3391_v18 = vor.u32 %v2590_v60, %v2491_v59  ;;  %1505 = vmatpush.bf16.msrb.mxu1 %v3384_v16 }
 0xd24   :  { %1283 = vst [vmem:[#allocation1 + $0x4] ss:$9 sm:$0xff] %v3316_v19  ;;  %v3395_v19 = vor.u32 %v2591_v26, %v2501_v63 }
 0xd25   :  { %1285 = vst [vmem:[#allocation1 + $0x5] ss:$9 sm:$0xff] %v3328_v24  ;;  %1570 = vmatpush.bf16.msrb.mxu2 %v3368_v41  ;;  %1583 = vmatpush.bf16.msrb.mxu3 %v3384_v16  ;;  %v2493_v24 = vld [vmem:[#allocation16 + $0x8] sm:$0xf0] }
 0xd26   :  { %1287 = vst [vmem:[#allocation1 + $0x6] ss:$9 sm:$0xff] %v3320_v20  ;;  %1494 = vmatpush.bf16.msrb.mxu0 %v3391_v18  ;;  %v3401_v20 = vor.u32 %v2589_v1, %v2493_v24 }
 0xd27   :  { %1289 = vst [vmem:[#allocation1 + $0x7] ss:$9 sm:$0xff] %v3323_v21  ;;  %1506 = vmatpush.bf16.msrb.mxu1 %v3395_v19 }
 0xd29   :  { %1571 = vmatpush.bf16.msrb.mxu2 %v3377_v53  ;;  %1584 = vmatpush.bf16.msrb.mxu3 %v3395_v19 }
 0xd2b   :  { %1507 = vmatpush.bf16.msrb.mxu1 %v3401_v20 }
 0xd2d   :  { %1572 = vmatpush.bf16.msrb.mxu2 %v3391_v18  ;;  %1585 = vmatpush.bf16.msrb.mxu3 %v3401_v20 }
 0xd2e   :  { %v1290_v21 = vld [vmem:[#allocation1] sm:$0xff] }
 0xd2f   :  { %1341 = vst [vmem:[#allocation1] ss:$9 sm:$0xff] %v3339_v6  ;;  %2469 = vmatmul.msk.bf16.vlgmr.msra.gmra.mxu0 %vm1132_vm7, %v1290_v21  ;;  %2470 = vmatmul.msk.bf16.vlgmr.msra.gmra.mxu1 %vm1132_vm7, %v1290_v21 }
 0xd30   :  { %1343 = vst [vmem:[#allocation1 + $0x1] ss:$9 sm:$0xff] %v3341_v31  ;;  %1648 = vmatpush.bf16.msra.mxu0 %v3365_v0  ;;  %1661 = vmatpush.bf16.msra.mxu1 %v3379_v56  ;;  %v1239_v31 = vperm.slane %v1237_v5, 0 }
 0xd31   :  { %1345 = vst [vmem:[#allocation1 + $0x2] ss:$9 sm:$0xff] %v3343_v11 }
 0xd32   :  { %1347 = vst [vmem:[#allocation1 + $0x3] ss:$9 sm:$0xff] %v3348_v14 }
 0xd33   :  { %1349 = vst [vmem:[#allocation1 + $0x4] ss:$9 sm:$0xff] %v3351_v62 }
 0xd34   :  { %1351 = vst [vmem:[#allocation1 + $0x5] ss:$9 sm:$0xff] %v3354_v22  ;;  %1649 = vmatpush.bf16.msra.mxu0 %v3368_v41  ;;  %1662 = vmatpush.bf16.msra.mxu1 %v3384_v16 }
 0xd35   :  { %1353 = vst [vmem:[#allocation1 + $0x6] ss:$9 sm:$0xff] %v3357_v27 }
 0xd36   :  { %1355 = vst [vmem:[#allocation1 + $0x7] ss:$9 sm:$0xff] %v3360_v38 }
 0xd38   :  { %1650 = vmatpush.bf16.msra.mxu0 %v3377_v53  ;;  %1663 = vmatpush.bf16.msra.mxu1 %v3395_v19 }
 0xd3c   :  { %1651 = vmatpush.bf16.msra.mxu0 %v3391_v18  ;;  %1664 = vmatpush.bf16.msra.mxu1 %v3401_v20 }
 0xd3d   :  { %v1356_v2 = vld [vmem:[#allocation1] sm:$0xff] }
 0xd3e   :  { %2487 = vmatmul.msk.bf16.vlgmr.msra.gmra.mxu2 %vm1132_vm7, %v1356_v2  ;;  %2488 = vmatmul.msk.bf16.vlgmr.msra.gmra.mxu3 %vm1132_vm7, %v1356_v2 }
 0xd3f   :  { %1495 = vmatmul.bf16.vlgmr.msrb.gmra.mxu0 %v2905_v54  ;;  %1508 = vmatmul.bf16.vlgmr.msrb.gmra.mxu1 %v2905_v54 }
 0xd40   :  { %1727 = vmatpush.bf16.msra.mxu2 %v3365_v0  ;;  %1740 = vmatpush.bf16.msra.mxu3 %v3379_v56 }
 0xd41   :  { %1806 = vmatpush.bf16.msrb.mxu0 %v3365_v0  ;;  %1819 = vmatpush.bf16.msrb.mxu1 %v3379_v56 }
 0xd44   :  { %1728 = vmatpush.bf16.msra.mxu2 %v3368_v41  ;;  %1741 = vmatpush.bf16.msra.mxu3 %v3384_v16 }
 0xd45   :  { %1807 = vmatpush.bf16.msrb.mxu0 %v3368_v41  ;;  %1820 = vmatpush.bf16.msrb.mxu1 %v3384_v16 }
 0xd48   :  { %1729 = vmatpush.bf16.msra.mxu2 %v3377_v53  ;;  %1742 = vmatpush.bf16.msra.mxu3 %v3395_v19 }
 0xd49   :  { %1808 = vmatpush.bf16.msrb.mxu0 %v3377_v53  ;;  %1821 = vmatpush.bf16.msrb.mxu1 %v3395_v19 }
 0xd4c   :  { %1730 = vmatpush.bf16.msra.mxu2 %v3391_v18  ;;  %1743 = vmatpush.bf16.msra.mxu3 %v3401_v20 }
 0xd4d   :  { %1809 = vmatpush.bf16.msrb.mxu0 %v3391_v18  ;;  %1822 = vmatpush.bf16.msrb.mxu1 %v3401_v20 }
 0xd8e   :  { %v1144_v54 = vpop.f32.mrf.mxu0  ;;  %v1158_v3 = vpop.f32.mrf.mxu1 }
 0xd96   :  { %v1146_v57 = vpop.f32.mrf.mxu0  ;;  %v1160_v7 = vpop.f32.mrf.mxu1 }
 0xda3   :  { %v1218_v6 = vpop.f32.mrf.mxu2  ;;  %v1232_v55 = vpop.f32.mrf.mxu3 }
 0xda4   :  { %v1219_v9 = vadd.f32 %v1218_v6, %v1144_v54  ;;  %v1233_v10 = vadd.f32 %v1232_v55, %v1158_v3 }
 0xda6   :  { %v1244_v4 = vadd.f32 %v1240_v61, %v1233_v10  ;;  %v1243_v28 = vadd.f32 %v1239_v31, %v1219_v9 }
 0xda8   :  { %v1251_v11 = vrot.slane %v1244_v4, 6 }
 0xdaa   :  { %v1254_v37 = vsel %vm247_vm2, %v1243_v28, %v1251_v11  ;;  %v1256_v8 = vsel %vm250_vm3, %v1243_v28, %v1251_v11  ;;  %v1258_v13 = vsel %vm253_vm1, %v1251_v11, %v1243_v28 }
 0xdab   :  { %v1220_v14 = vpop.f32.mrf.mxu2  ;;  %v1234_v15 = vpop.f32.mrf.mxu3  ;;  %v1259_v6 = vrot.slane %v1258_v13, 6 }
 0xdac   :  { %v1322_v17 = vpop.f32.mrf.mxu0  ;;  %v1221_v62 = vadd.f32 %v1220_v14, %v1146_v57  ;;  %v1235_v12 = vadd.f32 %v1234_v15, %v1160_v7  ;;  %v1336_v22 = vpop.f32.mrf.mxu1  ;;  %v1257_v14 = vrot.slane %v1256_v8, 4  ;;  %v3481_v8 = vld [vmem:[%s3661_s10] ss:$0 sm:$0xff] }
 0xdae   :  { %v1245_v23 = vadd.f32 %v1239_v31, %v1221_v62  ;;  %v1246_v25 = vadd.f32 %v1240_v61, %v1235_v12  ;;  %v1255_v61 = vrot.slane %v1254_v37, 2 }
 0xdb0   :  { %v1252_v27 = vrot.slane %v1246_v25, 6 }
 0xdb2   :  { %v1260_v34 = vsel %vm245_vm4, %v1245_v23, %v1252_v27  ;;  %v1261_v35 = vsel %vm247_vm2, %v1245_v23, %v1252_v27  ;;  %v1263_v36 = vsel %vm250_vm3, %v1245_v23, %v1252_v27  ;;  %v1265_v38 = vsel %vm253_vm1, %v1252_v27, %v1245_v23 }
 0xdb3   :  { %v1262_v44 = vrot.slane %v1261_v35, 2  ;;  %v1264_v46 = vrot.slane %v1263_v36, 4  ;;  %v1266_v48 = vrot.slane %v1265_v38, 6 }
 0xdb4   :  { %v1324_v58 = vpop.f32.mrf.mxu0  ;;  %v1338_v40 = vpop.f32.mrf.mxu1 }
 0xdbc   :  { %v1496_v43 = vpop.f32.mrf.mxu0  ;;  %v1509_v29 = vpop.f32.mrf.mxu1 }
 0xdc1   :  { %v1388_v32 = vpop.f32.mrf.mxu2  ;;  %v1402_v30 = vpop.f32.mrf.mxu3 }
 0xdc2   :  { %v1389_v39 = vadd.f32 %v1388_v32, %v1322_v17  ;;  %v1403_v45 = vadd.f32 %v1402_v30, %v1336_v22  ;;  %v1253_v17 = vsel %vm245_vm4, %v1243_v28, %v1251_v11 }
 0xdc4   :  { %v1411_v33 = vrot.slane %v1403_v45, 6  ;;  %v1498_v42 = vpop.f32.mrf.mxu0  ;;  %v1511_v63 = vpop.f32.mrf.mxu1 }
 0xdc6   :  { %v1418_v47 = vsel %vm253_vm1, %v1411_v33, %v1389_v39  ;;  %v1416_v50 = vsel %vm250_vm3, %v1389_v39, %v1411_v33  ;;  %v1414_v52 = vsel %vm247_vm2, %v1389_v39, %v1411_v33  ;;  %v1413_v51 = vsel %vm245_vm4, %v1389_v39, %v1411_v33 }
 0xdc7   :  { %v1419_v49 = vrot.slane %v1418_v47, 6  ;;  %v1417_v59 = vrot.slane %v1416_v50, 4  ;;  %v1415_v60 = vrot.slane %v1414_v52, 2  ;;  %v3459_v26 = vadd.f32 %v1413_v51, %v1266_v48 }
 0xdc9   :  { %v1390_v1 = vpop.f32.mrf.mxu2  ;;  %v1404_v24 = vpop.f32.mrf.mxu3  ;;  %v3461_v21 = vadd.f32 %v1419_v49, %v1260_v34  ;;  %v3463_v2 = vadd.f32 %v1417_v59, %v1262_v44  ;;  %v3465_v54 = vadd.f32 %v1415_v60, %v1264_v46 }
 0xdca   :  { %v1405_v3 = vadd.f32 %v1404_v24, %v1338_v40  ;;  %v1391_v5 = vadd.f32 %v1390_v1, %v1324_v58  ;;  %v1534_v40 = vadd.f32 %v3481_v8, %v1509_v29 }
 0xdcc   :  { %v1412_v57 = vrot.slane %v1405_v3, 6 }
 0xdce   :  { %v1425_v55 = vsel %vm253_vm1, %v1412_v57, %v1391_v5  ;;  %v1423_v7 = vsel %vm250_vm3, %v1391_v5, %v1412_v57  ;;  %v1421_v9 = vsel %vm247_vm2, %v1391_v5, %v1412_v57  ;;  %v1420_v31 = vsel %vm245_vm4, %v1391_v5, %v1412_v57 }
 0xdcf   :  { %v1426_v10 = vrot.slane %v1425_v55, 6  ;;  %v1424_v4 = vrot.slane %v1423_v7, 4  ;;  %v1422_v15 = vrot.slane %v1421_v9, 2  ;;  %v3472_v62 = vadd.f32 %v1420_v31, %v1259_v6 }
 0xdd1   :  { %v1513_v12 = vadd.f32 %v1426_v10, %v1253_v17  ;;  %v3474_v22 = vadd.f32 %v1424_v4, %v1255_v61  ;;  %v3476_v37 = vadd.f32 %v1422_v15, %v1257_v14 }
 0xdd3   :  { %v1514_v13 = vadd.f32 %v1513_v12, %v1496_v43  ;;  %v1537_v39 = vrot.slane %v1513_v12, 2  ;;  %v1615_v14 = vrot.slane %v3474_v22, 2 }
 0xdd5   :  { %v2521_v23 = vmul.f32 -1.442695, %v1514_v13 }
 0xdd7   :  { %2664 = vpow2.f32 %v2521_v23 }
 0xddd   :  { %v2665_v25 = vpop.eup %2664 }
 0xdde   :  { %v1518_v27 = vadd.f32 1.0, %v2665_v25 }
 0xde0   :  { %2666 = vrcp.f32 %v1518_v27  ;;  %v1530_v11 = vand.u32 2147483648, %v1518_v27  ;;  %v1528_v38 = vand.u32 2147483647, %v1518_v27  ;;  %vm1524_vm2 = vweird.f32 %v1518_v27 }
 0xde2   :  { %v1531_v43 = vor.u32 1.1754944e-38, %v1530_v11  ;;  %vm1529_vm4 = vcmp.eq.f32.partialorder %v1528_v38, 8.507059e+37 }
 0xde6   :  { %v2667_v34 = vpop.eup %2666 }
 0xde7   :  { %v1520_v35 = vmul.f32 %v2667_v34, %v1518_v27  ;;  %vm1525_vm1 = vweird.f32 %v2667_v34 }
 0xde8   :  { %vm1526_vm3 = vmor %vm1524_vm2, %vm1525_vm1 }
 0xde9   :  { %v1521_v28 = vsub.f32 1.0, %v1520_v35 }
 0xdeb   :  { %v1522_v36 = vmul.f32 %v2667_v34, %v1521_v28 }
 0xded   :  { %v1523_v58 = vadd.f32 %v2667_v34, %v1522_v36 }
 0xdef   :  { %v1527_v32 = vsel %vm1526_vm3, %v2667_v34, %v1523_v58 }
 0xdf0   :  { %v1532_v30 = vsel %vm1529_vm4, %v1531_v43, %v1527_v32 }
 0xdf1   :  { %v1535_v45 = vmul.f32 %v1534_v40, %v1532_v30 }
 0xdf3   :  { %v1539_v33 = vadd.f32 %v1537_v39, %v1535_v45 }
 0xdf5   :  { %2668 = vtanh.f32 %v1539_v33 }
 0xdfb   :  { %v2669_v42 = vpop.eup %2668 }
 0xdfc   :  { %v1541_v44 = vsub.f32 0.0, %v2669_v42 }
 0xdfe   :  { %1543 = vrot.lane.b32.xlu0 %v1541_v44, %s2906_s3 }
 0xe70   :  { %v1544_v46 = vpop.permute.xlu0 %1543 }
 0xe71   :  { %v1546_v48 = vmul.f32 %v1544_v46, %v1532_v30 }
 0xe73   :  { %1548 = vrot.lane.b32.xlu1 %v1546_v48, %s2906_s3 }
 0xee5   :  { %v1549_v47 = vpop.permute.xlu1 %1548 }
 0xee6   :  { %v1551_v50 = vadd.f32 %v2669_v42, %v1549_v47 }
 0xee8   :  { %1552 = vst.msk [vmem:[#allocation4] sm:$0x3] %vm478_vm9, %v1551_v50  ;;  %v1561_v29 = vpack.c.bf16 %v1551_v50, %v1551_v50 }
 0xee9   :  { %1554 = vst [vmem:[#allocation1] ss:$4 sm:$0xff] %v1551_v50 }
 0xeea   :  { %2522 = vmatmul.msk.bf16.vlgmr.msrb.gmra.mxu2 %vm409_vm10, %v1561_v29  ;;  %2523 = vmatmul.msk.bf16.vlgmr.msrb.gmra.mxu3 %vm409_vm10, %v1561_v29 }
 0xeeb   :  { %1885 = vmatpush.bf16.msrb.mxu2 %v3365_v0  ;;  %1898 = vmatpush.bf16.msrb.mxu3 %v3379_v56 }
 0xeef   :  { %1886 = vmatpush.bf16.msrb.mxu2 %v3368_v41  ;;  %1899 = vmatpush.bf16.msrb.mxu3 %v3384_v16 }
 0xef0   :  { %v3502_v35 = vld.sshfl [vmem:[#allocation1] sm:$0xff pattern:$0x73625140] }
 0xef3   :  { %1887 = vmatpush.bf16.msrb.mxu2 %v3377_v53  ;;  %1900 = vmatpush.bf16.msrb.mxu3 %v3395_v19 }
 0xef7   :  { %1888 = vmatpush.bf16.msrb.mxu2 %v3391_v18  ;;  %1901 = vmatpush.bf16.msrb.mxu3 %v3401_v20 }
 0xf6d   :  { %v1574_v52 = vpop.f32.mrf.mxu2  ;;  %v1587_v51 = vpop.f32.mrf.mxu3 }
 0xf6e   :  { %v1592_v49 = vadd.f32 %v3474_v22, %v1574_v52  ;;  %v1612_v10 = vadd.f32 %v3481_v8, %v1587_v51  ;;  %v1694_v52 = vrot.slane %v3476_v37, 2 }
 0xf70   :  { %v2524_v59 = vmul.f32 -1.442695, %v1592_v49 }
 0xf72   :  { %2670 = vpow2.f32 %v2524_v59 }
 0xf75   :  { %v1576_v60 = vpop.f32.mrf.mxu2  ;;  %v1589_v63 = vpop.f32.mrf.mxu3 }
 0xf78   :  { %v2671_v1 = vpop.eup %2670 }
 0xf79   :  { %v1596_v24 = vadd.f32 1.0, %v2671_v1 }
 0xf7b   :  { %2672 = vrcp.f32 %v1596_v24  ;;  %v1608_v61 = vand.u32 2147483648, %v1596_v24  ;;  %v1606_v55 = vand.u32 2147483647, %v1596_v24  ;;  %vm1602_vm11 = vweird.f32 %v1596_v24 }
 0xf7d   :  { %v1609_v9 = vor.u32 1.1754944e-38, %v1608_v61  ;;  %vm1607_vm13 = vcmp.eq.f32.partialorder %v1606_v55, 8.507059e+37 }
 0xf81   :  { %v2673_v3 = vpop.eup %2672 }
 0xf82   :  { %v1598_v5 = vmul.f32 %v2673_v3, %v1596_v24  ;;  %vm1603_vm8 = vweird.f32 %v2673_v3 }
 0xf83   :  { %vm1604_vm12 = vmor %vm1602_vm11, %vm1603_vm8 }
 0xf84   :  { %v1599_v57 = vsub.f32 1.0, %v1598_v5 }
 0xf86   :  { %v1600_v6 = vmul.f32 %v2673_v3, %v1599_v57 }
 0xf88   :  { %v1601_v7 = vadd.f32 %v2673_v3, %v1600_v6 }
 0xf8a   :  { %v1605_v31 = vsel %vm1604_vm12, %v2673_v3, %v1601_v7 }
 0xf8b   :  { %v1610_v4 = vsel %vm1607_vm13, %v1609_v9, %v1605_v31 }
 0xf8c   :  { %v1613_v15 = vmul.f32 %v1612_v10, %v1610_v4 }
 0xf8e   :  { %v1617_v17 = vadd.f32 %v1615_v14, %v1613_v15 }
 0xf90   :  { %2674 = vtanh.f32 %v1617_v17  ;;  %v1773_v17 = vrot.slane %v3472_v62, 2 }
 0xf96   :  { %v2675_v12 = vpop.eup %2674 }
 0xf97   :  { %v1619_v13 = vsub.f32 %v1551_v50, %v2675_v12 }
 0xf99   :  { %1621 = vrot.lane.b32.xlu2 %v1619_v13, %s2906_s3 }
 0xff3   :  { %v1622_v23 = vpop.permute.xlu2 %1621 }
 0xff4   :  { %v1624_v25 = vmul.f32 %v1622_v23, %v1610_v4 }
 0xff6   :  { %1626 = vrot.lane.b32.xlu0 %v1624_v25, %s2906_s3 }
0x1068   :  { %v1627_v27 = vpop.permute.xlu0 %1626 }
0x1069   :  { %v1629_v34 = vadd.f32 %v2675_v12, %v1627_v27 }
0x106b   :  { %1631 = vst.msk [vmem:[#allocation4 + $0x2] sm:$0x3] %vm478_vm9, %v1629_v34  ;;  %v1640_v28 = vpack.c.bf16 %v1629_v34, %v1629_v34 }
0x106c   :  { %1633 = vst [vmem:[#allocation1] ss:$4 sm:$0xff] %v1629_v34 }
0x106d   :  { %2525 = vmatmul.msk.bf16.vlgmr.msra.gmra.mxu0 %vm409_vm10, %v1640_v28  ;;  %2526 = vmatmul.msk.bf16.vlgmr.msra.gmra.mxu1 %vm409_vm10, %v1640_v28 }
0x106e   :  { %1964 = vmatpush.bf16.msra.mxu0 %v3365_v0  ;;  %1977 = vmatpush.bf16.msra.mxu1 %v3379_v56 }
0x1072   :  { %1965 = vmatpush.bf16.msra.mxu0 %v3368_v41  ;;  %1978 = vmatpush.bf16.msra.mxu1 %v3384_v16 }
0x1073   :  { %v3520_v5 = vld.sshfl [vmem:[#allocation1] sm:$0xff pattern:$0x73625140] }
0x1076   :  { %1966 = vmatpush.bf16.msra.mxu0 %v3377_v53  ;;  %1979 = vmatpush.bf16.msra.mxu1 %v3395_v19 }
0x107a   :  { %1967 = vmatpush.bf16.msra.mxu0 %v3391_v18  ;;  %1980 = vmatpush.bf16.msra.mxu1 %v3401_v20 }
0x10ea   :  { %v1653_v22 = vpop.f32.mrf.mxu0  ;;  %v1666_v11 = vpop.f32.mrf.mxu1 }
0x10eb   :  { %v1671_v36 = vadd.f32 %v3476_v37, %v1653_v22  ;;  %v1691_v50 = vadd.f32 %v3481_v8, %v1666_v11 }
0x10ed   :  { %v2527_v38 = vmul.f32 -1.442695, %v1671_v36 }
0x10ef   :  { %2676 = vpow2.f32 %v2527_v38 }
0x10f2   :  { %v1655_v58 = vpop.f32.mrf.mxu0  ;;  %v1668_v40 = vpop.f32.mrf.mxu1 }
0x10f5   :  { %v2677_v43 = vpop.eup %2676 }
0x10f6   :  { %v1675_v32 = vadd.f32 1.0, %v2677_v43 }
0x10f8   :  { %2678 = vrcp.f32 %v1675_v32  ;;  %v1687_v33 = vand.u32 2147483648, %v1675_v32  ;;  %v1685_v44 = vand.u32 2147483647, %v1675_v32  ;;  %vm1681_vm15 = vweird.f32 %v1675_v32 }
0x10fa   :  { %v1688_v48 = vor.u32 1.1754944e-38, %v1687_v33  ;;  %vm1686_vm5 = vcmp.eq.f32.partialorder %v1685_v44, 8.507059e+37 }
0x10fe   :  { %v2679_v30 = vpop.eup %2678 }
0x10ff   :  { %v1677_v39 = vmul.f32 %v2679_v30, %v1675_v32  ;;  %vm1682_vm14 = vweird.f32 %v2679_v30 }
0x1100   :  { %vm1683_vm0 = vmor %vm1681_vm15, %vm1682_vm14 }
0x1101   :  { %v1678_v45 = vsub.f32 1.0, %v1677_v39 }
0x1103   :  { %v1679_v42 = vmul.f32 %v2679_v30, %v1678_v45 }
0x1105   :  { %v1680_v46 = vadd.f32 %v2679_v30, %v1679_v42 }
0x1107   :  { %v1684_v47 = vsel %vm1683_vm0, %v2679_v30, %v1680_v46 }
0x1108   :  { %v1689_v29 = vsel %vm1686_vm5, %v1688_v48, %v1684_v47 }
0x1109   :  { %v1692_v51 = vmul.f32 %v1691_v50, %v1689_v29 }
0x110b   :  { %v1696_v49 = vadd.f32 %v1694_v52, %v1692_v51 }
0x110d   :  { %2680 = vtanh.f32 %v1696_v49  ;;  %v1852_v49 = vrot.slane %v3461_v21, 2 }
0x1113   :  { %v2681_v59 = vpop.eup %2680 }
0x1114   :  { %v1698_v60 = vsub.f32 %v1629_v34, %v2681_v59 }
0x1116   :  { %1700 = vrot.lane.b32.xlu1 %v1698_v60, %s2906_s3 }
0x1188   :  { %v1701_v63 = vpop.permute.xlu1 %1700 }
0x1189   :  { %v1703_v1 = vmul.f32 %v1701_v63, %v1689_v29 }
0x118b   :  { %1705 = vrot.lane.b32.xlu2 %v1703_v1, %s2906_s3 }
0x11e5   :  { %v1706_v24 = vpop.permute.xlu2 %1705 }
0x11e6   :  { %v1708_v3 = vadd.f32 %v2681_v59, %v1706_v24 }
0x11e8   :  { %1710 = vst.msk [vmem:[#allocation4 + $0x4] sm:$0x3] %vm478_vm9, %v1708_v3  ;;  %v1719_v57 = vpack.c.bf16 %v1708_v3, %v1708_v3 }
0x11e9   :  { %1712 = vst [vmem:[#allocation1] ss:$4 sm:$0xff] %v1708_v3 }
0x11ea   :  { %2528 = vmatmul.msk.bf16.vlgmr.msra.gmra.mxu2 %vm409_vm10, %v1719_v57  ;;  %2529 = vmatmul.msk.bf16.vlgmr.msra.gmra.mxu3 %vm409_vm10, %v1719_v57 }
0x11eb   :  { %2043 = vmatpush.bf16.msra.mxu2 %v3365_v0  ;;  %2056 = vmatpush.bf16.msra.mxu3 %v3379_v56 }
0x11ef   :  { %2044 = vmatpush.bf16.msra.mxu2 %v3368_v41  ;;  %2057 = vmatpush.bf16.msra.mxu3 %v3384_v16 }
0x11f0   :  { %v3538_v11 = vld.sshfl [vmem:[#allocation1] sm:$0xff pattern:$0x73625140] }
0x11f3   :  { %2045 = vmatpush.bf16.msra.mxu2 %v3377_v53  ;;  %2058 = vmatpush.bf16.msra.mxu3 %v3395_v19 }
0x11f7   :  { %2046 = vmatpush.bf16.msra.mxu2 %v3391_v18  ;;  %2059 = vmatpush.bf16.msra.mxu3 %v3401_v20 }
0x126d   :  { %v1732_v37 = vpop.f32.mrf.mxu2  ;;  %v1745_v61 = vpop.f32.mrf.mxu3 }
0x126e   :  { %v1750_v6 = vadd.f32 %v3472_v62, %v1732_v37  ;;  %v1770_v14 = vadd.f32 %v3481_v8, %v1745_v61 }
0x1270   :  { %v2530_v55 = vmul.f32 -1.442695, %v1750_v6 }
0x1272   :  { %2682 = vpow2.f32 %v2530_v55 }
0x1275   :  { %v1734_v0 = vpop.f32.mrf.mxu2  ;;  %v1747_v56 = vpop.f32.mrf.mxu3 }
0x1278   :  { %v2683_v7 = vpop.eup %2682 }
0x1279   :  { %v1754_v41 = vadd.f32 1.0, %v2683_v7 }
0x127b   :  { %2684 = vrcp.f32 %v1754_v41  ;;  %v1766_v31 = vand.u32 2147483648, %v1754_v41  ;;  %v1764_v18 = vand.u32 2147483647, %v1754_v41  ;;  %vm1760_vm1 = vweird.f32 %v1754_v41 }
0x127d   :  { %v1767_v20 = vor.u32 1.1754944e-38, %v1766_v31  ;;  %vm1765_vm3 = vcmp.eq.f32.partialorder %v1764_v18, 8.507059e+37 }
0x1281   :  { %v2685_v16 = vpop.eup %2684 }
0x1282   :  { %v1756_v9 = vmul.f32 %v2685_v16, %v1754_v41  ;;  %vm1761_vm6 = vweird.f32 %v2685_v16 }
0x1283   :  { %vm1762_vm2 = vmor %vm1760_vm1, %vm1761_vm6 }
0x1284   :  { %v1757_v53 = vsub.f32 1.0, %v1756_v9 }
0x1286   :  { %v1758_v19 = vmul.f32 %v2685_v16, %v1757_v53 }
0x1288   :  { %v1759_v10 = vadd.f32 %v2685_v16, %v1758_v19 }
0x128a   :  { %v1763_v4 = vsel %vm1762_vm2, %v2685_v16, %v1759_v10 }
0x128b   :  { %v1768_v15 = vsel %vm1765_vm3, %v1767_v20, %v1763_v4 }
0x128c   :  { %v1771_v12 = vmul.f32 %v1770_v14, %v1768_v15 }
0x128e   :  { %v1775_v13 = vadd.f32 %v1773_v17, %v1771_v12 }
0x1290   :  { %2686 = vtanh.f32 %v1775_v13  ;;  %v1931_v13 = vrot.slane %v3463_v2, 2 }
0x1296   :  { %v2687_v23 = vpop.eup %2686 }
0x1297   :  { %v1777_v25 = vsub.f32 %v1708_v3, %v2687_v23 }
0x1299   :  { %1779 = vrot.lane.b32.xlu0 %v1777_v25, %s2906_s3 }
0x130b   :  { %v1780_v27 = vpop.permute.xlu0 %1779 }
0x130c   :  { %v1782_v34 = vmul.f32 %v1780_v27, %v1768_v15 }
0x130e   :  { %1784 = vrot.lane.b32.xlu1 %v1782_v34, %s2906_s3 }
0x1380   :  { %v1785_v28 = vpop.permute.xlu1 %1784 }
0x1381   :  { %v1787_v22 = vadd.f32 %v2687_v23, %v1785_v28 }
0x1383   :  { %1789 = vst.msk [vmem:[#allocation4 + $0x6] sm:$0x3] %vm478_vm9, %v1787_v22  ;;  %v1798_v36 = vpack.c.bf16 %v1787_v22, %v1787_v22 }
0x1384   :  { %1791 = vst [vmem:[#allocation1] ss:$4 sm:$0xff] %v1787_v22 }
0x1385   :  { %2531 = vmatmul.msk.bf16.vlgmr.msrb.gmra.mxu0 %vm409_vm10, %v1798_v36  ;;  %2532 = vmatmul.msk.bf16.vlgmr.msrb.gmra.mxu1 %vm409_vm10, %v1798_v36 }
0x138b   :  { %v3549_v6 = vld.sshfl [vmem:[#allocation1] sm:$0xff pattern:$0x73625140] }
0x1402   :  { %v1811_v62 = vpop.f32.mrf.mxu0  ;;  %v1824_v38 = vpop.f32.mrf.mxu1 }
0x1403   :  { %v1829_v58 = vadd.f32 %v3461_v21, %v1811_v62  ;;  %v1849_v52 = vadd.f32 %v3481_v8, %v1824_v38 }
0x1405   :  { %v2533_v40 = vmul.f32 -1.442695, %v1829_v58 }
0x1407   :  { %2688 = vpow2.f32 %v2533_v40 }
0x140a   :  { %v1813_v43 = vpop.f32.mrf.mxu0  ;;  %v1826_v32 = vpop.f32.mrf.mxu1 }
0x140d   :  { %v2689_v30 = vpop.eup %2688 }
0x140e   :  { %v1833_v39 = vadd.f32 1.0, %v2689_v30 }
0x1410   :  { %2690 = vrcp.f32 %v1833_v39  ;;  %v1845_v44 = vand.u32 2147483648, %v1833_v39  ;;  %v1843_v48 = vand.u32 2147483647, %v1833_v39  ;;  %vm1839_vm8 = vweird.f32 %v1833_v39 }
0x1412   :  { %v1846_v50 = vor.u32 1.1754944e-38, %v1845_v44  ;;  %vm1844_vm12 = vcmp.eq.f32.partialorder %v1843_v48, 8.507059e+37 }
0x1416   :  { %v2691_v45 = vpop.eup %2690 }
0x1417   :  { %v1835_v33 = vmul.f32 %v2691_v45, %v1833_v39  ;;  %vm1840_vm4 = vweird.f32 %v2691_v45 }
0x1418   :  { %vm1841_vm11 = vmor %vm1839_vm8, %vm1840_vm4 }
0x1419   :  { %v1836_v42 = vsub.f32 1.0, %v1835_v33 }
0x141b   :  { %v1837_v46 = vmul.f32 %v2691_v45, %v1836_v42 }
0x141d   :  { %v1838_v47 = vadd.f32 %v2691_v45, %v1837_v46 }
0x141f   :  { %v1842_v29 = vsel %vm1841_vm11, %v2691_v45, %v1838_v47 }
0x1420   :  { %v1847_v51 = vsel %vm1844_vm12, %v1846_v50, %v1842_v29 }
0x1421   :  { %v1850_v59 = vmul.f32 %v1849_v52, %v1847_v51 }
0x1423   :  { %v1854_v60 = vadd.f32 %v1852_v49, %v1850_v59 }
0x1425   :  { %2692 = vtanh.f32 %v1854_v60  ;;  %v2010_v60 = vrot.slane %v3465_v54, 2 }
0x142b   :  { %v2693_v63 = vpop.eup %2692 }
0x142c   :  { %v1856_v1 = vsub.f32 %v1787_v22, %v2693_v63 }
0x142e   :  { %1858 = vrot.lane.b32.xlu2 %v1856_v1, %s2906_s3 }
0x1488   :  { %v1859_v24 = vpop.permute.xlu2 %1858 }
0x1489   :  { %v1861_v3 = vmul.f32 %v1859_v24, %v1847_v51 }
0x148b   :  { %1863 = vrot.lane.b32.xlu0 %v1861_v3, %s2906_s3 }
0x14fd   :  { %v1864_v57 = vpop.permute.xlu0 %1863 }
0x14fe   :  { %v1866_v37 = vadd.f32 %v2693_v63, %v1864_v57 }
0x1500   :  { %1868 = vst.msk [vmem:[#allocation4 + $0x8] sm:$0x3] %vm478_vm9, %v1866_v37  ;;  %v1877_v61 = vpack.c.bf16 %v1866_v37, %v1866_v37 }
0x1501   :  { %1870 = vst [vmem:[#allocation1] ss:$4 sm:$0xff] %v1866_v37 }
0x1502   :  { %2534 = vmatmul.msk.bf16.vlgmr.msrb.gmra.mxu2 %vm409_vm10, %v1877_v61  ;;  %2535 = vmatmul.msk.bf16.vlgmr.msrb.gmra.mxu3 %vm409_vm10, %v1877_v61 }
0x1508   :  { %v3559_v58 = vld.sshfl [vmem:[#allocation1] sm:$0xff pattern:$0x73625140] }
0x1585   :  { %v1890_v21 = vpop.f32.mrf.mxu2  ;;  %v1903_v55 = vpop.f32.mrf.mxu3 }
0x1586   :  { %v1908_v0 = vadd.f32 %v3463_v2, %v1890_v21  ;;  %v1928_v17 = vadd.f32 %v3481_v8, %v1903_v55 }
0x1588   :  { %v2536_v56 = vmul.f32 -1.442695, %v1908_v0 }
0x158a   :  { %2694 = vpow2.f32 %v2536_v56 }
0x158d   :  { %v1892_v7 = vpop.f32.mrf.mxu2  ;;  %v1905_v41 = vpop.f32.mrf.mxu3 }
0x1590   :  { %v2695_v16 = vpop.eup %2694 }
0x1591   :  { %v1912_v9 = vadd.f32 1.0, %v2695_v16 }
0x1593   :  { %2696 = vrcp.f32 %v1912_v9  ;;  %v1924_v18 = vand.u32 2147483648, %v1912_v9  ;;  %v1922_v20 = vand.u32 2147483647, %v1912_v9  ;;  %vm1918_vm14 = vweird.f32 %v1912_v9 }
0x1595   :  { %v1925_v14 = vor.u32 1.1754944e-38, %v1924_v18  ;;  %vm1923_vm0 = vcmp.eq.f32.partialorder %v1922_v20, 8.507059e+37 }
0x1599   :  { %v2697_v53 = vpop.eup %2696 }
0x159a   :  { %v1914_v31 = vmul.f32 %v2697_v53, %v1912_v9  ;;  %vm1919_vm13 = vweird.f32 %v2697_v53 }
0x159b   :  { %vm1920_vm15 = vmor %vm1918_vm14, %vm1919_vm13  ;;  %vm2326_vm14 = vcmask 33792  }
0x159c   :  { %v1915_v19 = vsub.f32 1.0, %v1914_v31 }
0x159e   :  { %v1916_v10 = vmul.f32 %v2697_v53, %v1915_v19 }
0x15a0   :  { %v1917_v4 = vadd.f32 %v2697_v53, %v1916_v10 }
0x15a2   :  { %v1921_v15 = vsel %vm1920_vm15, %v2697_v53, %v1917_v4 }
0x15a3   :  { %v1926_v12 = vsel %vm1923_vm0, %v1925_v14, %v1921_v15 }
0x15a4   :  { %v1929_v23 = vmul.f32 %v1928_v17, %v1926_v12 }
0x15a6   :  { %v1933_v25 = vadd.f32 %v1931_v13, %v1929_v23 }
0x15a8   :  { %2698 = vtanh.f32 %v1933_v25 }
0x15ae   :  { %v2699_v27 = vpop.eup %2698 }
0x15af   :  { %v1935_v34 = vsub.f32 %v1866_v37, %v2699_v27 }
0x15b1   :  { %1937 = vrot.lane.b32.xlu1 %v1935_v34, %s2906_s3  ;;  %v2089_v34 = vrot.slane %v3459_v26, 2 }
0x1623   :  { %v1938_v28 = vpop.permute.xlu1 %1937 }
0x1624   :  { %v1940_v22 = vmul.f32 %v1938_v28, %v1926_v12 }
0x1626   :  { %1942 = vrot.lane.b32.xlu2 %v1940_v22, %s2906_s3 }
0x1680   :  { %v1943_v36 = vpop.permute.xlu2 %1942 }
0x1681   :  { %v1945_v62 = vadd.f32 %v2699_v27, %v1943_v36 }
0x1683   :  { %1947 = vst.msk [vmem:[#allocation4 + $0xa] sm:$0x3] %vm478_vm9, %v1945_v62  ;;  %v1956_v38 = vpack.c.bf16 %v1945_v62, %v1945_v62 }
0x1684   :  { %1949 = vst [vmem:[#allocation1] ss:$4 sm:$0xff] %v1945_v62 }
0x1685   :  { %2537 = vmatmul.msk.bf16.vlgmr.msra.gmra.mxu0 %vm409_vm10, %v1956_v38  ;;  %2538 = vmatmul.msk.bf16.vlgmr.msra.gmra.mxu1 %vm409_vm10, %v1956_v38 }
0x168b   :  { %v1950_v55 = vld.sshfl [vmem:[#allocation1] sm:$0xff pattern:$0x73625140] }
0x1702   :  { %v1969_v2 = vpop.f32.mrf.mxu0  ;;  %v1982_v40 = vpop.f32.mrf.mxu1 }
0x1703   :  { %v1987_v43 = vadd.f32 %v3465_v54, %v1969_v2  ;;  %v2007_v49 = vadd.f32 %v3481_v8, %v1982_v40 }
0x1705   :  { %v2539_v32 = vmul.f32 -1.442695, %v1987_v43 }
0x1707   :  { %2700 = vpow2.f32 %v2539_v32 }
0x170a   :  { %v1971_v30 = vpop.f32.mrf.mxu0  ;;  %v1984_v39 = vpop.f32.mrf.mxu1 }
0x170d   :  { %v2701_v45 = vpop.eup %2700 }
0x170e   :  { %v1991_v33 = vadd.f32 1.0, %v2701_v45 }
0x1710   :  { %2702 = vrcp.f32 %v1991_v33  ;;  %v2003_v48 = vand.u32 2147483648, %v1991_v33  ;;  %v2001_v50 = vand.u32 2147483647, %v1991_v33  ;;  %vm1997_vm6 = vweird.f32 %v1991_v33 }
0x1712   :  { %v2004_v52 = vor.u32 1.1754944e-38, %v2003_v48  ;;  %vm2002_vm2 = vcmp.eq.f32.partialorder %v2001_v50, 8.507059e+37 }
0x1716   :  { %v2703_v42 = vpop.eup %2702 }
0x1717   :  { %v1993_v44 = vmul.f32 %v2703_v42, %v1991_v33  ;;  %vm1998_vm5 = vweird.f32 %v2703_v42 }
0x1718   :  { %vm1999_vm1 = vmor %vm1997_vm6, %vm1998_vm5 }
0x1719   :  { %v1994_v46 = vsub.f32 1.0, %v1993_v44 }
0x171b   :  { %v1995_v47 = vmul.f32 %v2703_v42, %v1994_v46 }
0x171d   :  { %v1996_v29 = vadd.f32 %v2703_v42, %v1995_v47 }
0x171f   :  { %v2000_v51 = vsel %vm1999_vm1, %v2703_v42, %v1996_v29 }
0x1720   :  { %v2005_v59 = vsel %vm2002_vm2, %v2004_v52, %v2000_v51 }
0x1721   :  { %v2008_v63 = vmul.f32 %v2007_v49, %v2005_v59  ;;  %v2600_v49 = vld [vmem:[%s3662_s11 + $0x18] sm:$0xff] }
0x1722   :  { %2197 = vmatpush.bf16.msrb.mxu0 %v2600_v49 }
0x1723   :  { %v2012_v1 = vadd.f32 %v2010_v60, %v2008_v63  ;;  %v2599_v60 = vld [vmem:[%s3662_s11 + $0x10] sm:$0xff]  ;;  %v2597_v63 = vld [vmem:[%s3662_s11] sm:$0xff] }
0x1725   :  { %2704 = vtanh.f32 %v2012_v1 }
0x1726   :  { %2198 = vmatpush.bf16.msrb.mxu0 %v2599_v60 }
0x172b   :  { %v2705_v24 = vpop.eup %2704 }
0x172c   :  { %v2014_v3 = vsub.f32 %v1945_v62, %v2705_v24 }
0x172e   :  { %2016 = vrot.lane.b32.xlu0 %v2014_v3, %s2906_s3 }
0x17a0   :  { %v2017_v57 = vpop.permute.xlu0 %2016 }
0x17a1   :  { %v2019_v37 = vmul.f32 %v2017_v57, %v2005_v59  ;;  %v2598_v59 = vld [vmem:[%s3662_s11 + $0x8] sm:$0xff] }
0x17a2   :  { %2249 = vmatpush.bf16.msrb.mxu1 %v2598_v59  ;;  %v2113_v57 = vld [vmem:[#allocation4] sm:$0x3] }
0x17a3   :  { %2021 = vrot.lane.b32.xlu1 %v2019_v37, %s2906_s3  ;;  %v2114_v37 = vld [vmem:[#allocation4 + $0x2] sm:$0x3] }
0x17a6   :  { %2250 = vmatpush.bf16.msrb.mxu1 %v2597_v63 }
0x17ab   :  { %1556 = vrot.lane.b32.xlu1 %v3502_v35, %s2907_s22 }
0x17b3   :  { %1793 = vrot.lane.b32.xlu1 %v3549_v6, %s2907_s22 }
0x1815   :  { %v2022_v61 = vpop.permute.xlu1 %2021 }
0x1816   :  { %v2024_v21 = vadd.f32 %v2705_v24, %v2022_v61  ;;  %v2115_v61 = vld [vmem:[#allocation4 + $0x4] sm:$0x3] }
0x1818   :  { %2026 = vst.msk [vmem:[#allocation4 + $0xc] sm:$0x3] %vm478_vm9, %v2024_v21  ;;  %v2035_v54 = vpack.c.bf16 %v2024_v21, %v2024_v21 }
0x1819   :  { %2028 = vst [vmem:[#allocation1] ss:$4 sm:$0xff] %v2024_v21 }
0x181a   :  { %2540 = vmatmul.msk.bf16.vlgmr.msra.gmra.mxu2 %vm409_vm10, %v2035_v54  ;;  %2541 = vmatmul.msk.bf16.vlgmr.msra.gmra.mxu3 %vm409_vm10, %v2035_v54  ;;  %v2116_v54 = vld [vmem:[#allocation4 + $0x6] sm:$0x3] }
0x181d   :  { %v1557_v0 = vpop.permute.xlu1 %1556 }
0x181e   :  { %1560 = vst.msk [vmem:[#allocation5 + $0xe] sm:$0x3] %vm478_vm9, %v1557_v0  ;;  %v2117_v0 = vld [vmem:[#allocation4 + $0x8] sm:$0x3] }
0x1820   :  { %v2029_v56 = vld.sshfl [vmem:[#allocation1] sm:$0xff pattern:$0x73625140] }
0x1821   :  { %2030 = vrot.lane.b32.xlu1 %v2029_v56, %s2907_s22 }
0x1825   :  { %v1794_v35 = vpop.permute.xlu1 %1793  ;;  %v2136_v33 = vld [vmem:[#allocation5 + $0xe] sm:$0x3] }
0x1826   :  { %1797 = vst.msk [vmem:[#allocation5 + $0x8] sm:$0x3] %vm478_vm9, %v1794_v35  ;;  %v2144_v48 = vpack.c.bf16 %v2136_v33, %v2136_v33  ;;  %v2123_v35 = vpack.c.bf16 %v2115_v61, %v2115_v61 }
0x182d   :  { %v2133_v30 = vld [vmem:[#allocation5 + $0x8] sm:$0x3] }
0x182e   :  { %v2141_v44 = vpack.c.bf16 %v2133_v30, %v2133_v30 }
0x1893   :  { %v2031_v6 = vpop.permute.xlu1 %2030 }
0x1894   :  { %2034 = vst.msk [vmem:[#allocation5 + $0x2] sm:$0x3] %vm478_vm9, %v2031_v6  ;;  %v2118_v6 = vld [vmem:[#allocation4 + $0xa] sm:$0x3] }
0x189d   :  { %v2048_v7 = vpop.f32.mrf.mxu2  ;;  %v2061_v41 = vpop.f32.mrf.mxu3 }
0x189e   :  { %v2066_v16 = vadd.f32 %v3459_v26, %v2048_v7  ;;  %v2086_v25 = vadd.f32 %v3481_v8, %v2061_v41  ;;  %v2124_v7 = vpack.c.bf16 %v2116_v54, %v2116_v54  ;;  %v2119_v41 = vld [vmem:[#allocation4 + $0xc] sm:$0x3] }
0x18a0   :  { %v2542_v9 = vmul.f32 -1.442695, %v2066_v16  ;;  %v2125_v16 = vpack.c.bf16 %v2117_v0, %v2117_v0 }
0x18a2   :  { %2706 = vpow2.f32 %v2542_v9 }
0x18a5   :  { %v2050_v53 = vpop.f32.mrf.mxu2  ;;  %v2063_v31 = vpop.f32.mrf.mxu3 }
0x18a6   :  { %v2126_v53 = vpack.c.bf16 %v2118_v6, %v2118_v6  ;;  %v2127_v31 = vpack.c.bf16 %v2119_v41, %v2119_v41 }
0x18a8   :  { %v2707_v19 = vpop.eup %2706 }
0x18a9   :  { %v2070_v18 = vadd.f32 1.0, %v2707_v19 }
0x18ab   :  { %2708 = vrcp.f32 %v2070_v18  ;;  %v2082_v14 = vand.u32 2147483648, %v2070_v18  ;;  %v2080_v17 = vand.u32 2147483647, %v2070_v18  ;;  %vm2076_vm3 = vweird.f32 %v2070_v18 }
0x18ad   :  { %v2083_v13 = vor.u32 1.1754944e-38, %v2082_v14  ;;  %vm2081_vm8 = vcmp.eq.f32.partialorder %v2080_v17, 8.507059e+37 }
0x18b1   :  { %v2709_v10 = vpop.eup %2708 }
0x18b2   :  { %v2072_v20 = vmul.f32 %v2709_v10, %v2070_v18  ;;  %vm2077_vm10 = vweird.f32 %v2709_v10 }
0x18b3   :  { %vm2078_vm4 = vmor %vm2076_vm3, %vm2077_vm10 }
0x18b4   :  { %v2073_v4 = vsub.f32 1.0, %v2072_v20  ;;  %v2615_v20 = vld [vmem:[%s3663_s12] ss:$0 sm:$0xff] }
0x18b6   :  { %v2074_v15 = vmul.f32 %v2709_v10, %v2073_v4 }
0x18b8   :  { %v2075_v12 = vadd.f32 %v2709_v10, %v2074_v15 }
0x18ba   :  { %v2079_v23 = vsel %vm2078_vm4, %v2709_v10, %v2075_v12 }
0x18bb   :  { %v2084_v27 = vsel %vm2081_vm8, %v2083_v13, %v2079_v23 }
0x18bc   :  { %v2087_v28 = vmul.f32 %v2086_v25, %v2084_v27 }
0x18be   :  { %v2091_v22 = vadd.f32 %v2089_v34, %v2087_v28 }
0x18c0   :  { %2710 = vtanh.f32 %v2091_v22 }
0x18c6   :  { %v2711_v36 = vpop.eup %2710 }
0x18c7   :  { %v2093_v62 = vsub.f32 %v2024_v21, %v2711_v36  ;;  %v2121_v21 = vpack.c.bf16 %v2113_v57, %v2113_v57 }
0x18c9   :  { %2095 = vrot.lane.b32.xlu2 %v2093_v62, %s2906_s3 }
0x18d1   :  { %1635 = vrot.lane.b32.xlu2 %v3520_v5, %s2907_s22 }
0x18d9   :  { %1872 = vrot.lane.b32.xlu2 %v3559_v58, %s2907_s22  ;;  %v2130_v58 = vld [vmem:[#allocation5 + $0x2] sm:$0x3] }
0x18da   :  { %v2138_v39 = vpack.c.bf16 %v2130_v58, %v2130_v58 }
0x1923   :  { %v2096_v38 = vpop.permute.xlu2 %2095 }
0x1924   :  { %v2098_v2 = vmul.f32 %v2096_v38, %v2084_v27 }
0x1926   :  { %2100 = vrot.lane.b32.xlu0 %v2098_v2, %s2906_s3 }
0x192b   :  { %v1636_v8 = vpop.permute.xlu2 %1635 }
0x192c   :  { %1639 = vst.msk [vmem:[#allocation5 + $0xc] sm:$0x3] %vm478_vm9, %v1636_v8 }
0x192e   :  { %1714 = vrot.lane.b32.xlu0 %v3538_v11, %s2907_s22 }
0x1933   :  { %v1873_v26 = vpop.permute.xlu2 %1872  ;;  %v2135_v45 = vld [vmem:[#allocation5 + $0xc] sm:$0x3] }
0x1934   :  { %1876 = vst.msk [vmem:[#allocation5 + $0x6] sm:$0x3] %vm478_vm9, %v1873_v26  ;;  %v2143_v46 = vpack.c.bf16 %v2135_v45, %v2135_v45 }
0x1936   :  { %1951 = vrot.lane.b32.xlu0 %v1950_v55, %s2907_s22  ;;  %v2122_v55 = vpack.c.bf16 %v2114_v37, %v2114_v37 }
0x193b   :  { %v2132_v43 = vld [vmem:[#allocation5 + $0x6] sm:$0x3] }
0x193c   :  { %v2140_v11 = vpack.c.bf16 %v2132_v43, %v2132_v43 }
0x1998   :  { %v2101_v40 = vpop.permute.xlu0 %2100 }
0x1999   :  { %v2103_v5 = vadd.f32 %v2711_v36, %v2101_v40 }
0x199b   :  { %2105 = vst.msk [vmem:[#allocation4 + $0xe] sm:$0x3] %vm478_vm9, %v2103_v5 }
0x199c   :  { %2107 = vst [vmem:[#allocation1] ss:$4 sm:$0xff] %v2103_v5 }
0x19a0   :  { %v1715_v32 = vpop.permute.xlu0 %1714 }
0x19a1   :  { %1718 = vst.msk [vmem:[#allocation5 + $0xa] sm:$0x3] %vm478_vm9, %v1715_v32 }
0x19a2   :  { %v2120_v9 = vld [vmem:[#allocation4 + $0xe] sm:$0x3] }
0x19a3   :  { %v2108_v42 = vld.sshfl [vmem:[#allocation1] sm:$0xff pattern:$0x73625140]  ;;  %v2128_v19 = vpack.c.bf16 %v2120_v9, %v2120_v9 }
0x19a4   :  { %2109 = vrot.lane.b32.xlu2 %v2108_v42, %s2907_s22  ;;  %2157 = vst [vmem:[#allocation1 + $0x1] ss:$9 sm:$0xff] %v2138_v39 }
0x19a5   :  { %2163 = vst [vmem:[#allocation1 + $0x3] ss:$9 sm:$0xff] %v2140_v11 }
0x19a6   :  { %2166 = vst [vmem:[#allocation1 + $0x4] ss:$9 sm:$0xff] %v2141_v44 }
0x19a7   :  { %2172 = vst [vmem:[#allocation1 + $0x6] ss:$9 sm:$0xff] %v2143_v46 }
0x19a8   :  { %v2134_v47 = vld [vmem:[#allocation5 + $0xa] sm:$0x3]  ;;  %2175 = vst [vmem:[#allocation1 + $0x7] ss:$9 sm:$0xff] %v2144_v48  ;;  %v1952_v50 = vpop.permute.xlu0 %1951 }
0x19a9   :  { %v2142_v29 = vpack.c.bf16 %v2134_v47, %v2134_v47  ;;  %1955 = vst.msk [vmem:[#allocation5 + $0x4] sm:$0x3] %vm478_vm9, %v1952_v50 }
0x19ab   :  { %2169 = vst [vmem:[#allocation1 + $0x5] ss:$9 sm:$0xff] %v2142_v29 }
0x19b0   :  { %v2131_v52 = vld [vmem:[#allocation5 + $0x4] sm:$0x3] }
0x19b1   :  { %v2139_v51 = vpack.c.bf16 %v2131_v52, %v2131_v52 }
0x19b3   :  { %2160 = vst [vmem:[#allocation1 + $0x2] ss:$9 sm:$0xff] %v2139_v51 }
0x19fe   :  { %v2110_v1 = vpop.permute.xlu2 %2109 }
0x19ff   :  { %2112 = vst.msk [vmem:[#allocation5] sm:$0x3] %vm478_vm9, %v2110_v1  ;;  %vm2263_vm9 = vcmask 39936  }
0x1a06   :  { %v2129_v24 = vld [vmem:[#allocation5] sm:$0x3] }
0x1a07   :  { %v2137_v3 = vpack.c.bf16 %v2129_v24, %v2129_v24 }
0x1a09   :  { %2154 = vst [vmem:[#allocation1] ss:$9 sm:$0xff] %v2137_v3 }
0x1a10   :  { %v2176_v56 = vld [vmem:[#allocation1] sm:$0xff] }
0x1a11   :  { %2551 = vmatmul.msk.bf16.vlgmr.msrb.gmra.mxu0 %vm1132_vm7, %v2176_v56  ;;  %2206 = vst [vmem:[#allocation1] ss:$9 sm:$0xff] %v2121_v21 }
0x1a12   :  { %2209 = vst [vmem:[#allocation1 + $0x1] ss:$9 sm:$0xff] %v2122_v55 }
0x1a13   :  { %2212 = vst [vmem:[#allocation1 + $0x2] ss:$9 sm:$0xff] %v2123_v35 }
0x1a14   :  { %2215 = vst [vmem:[#allocation1 + $0x3] ss:$9 sm:$0xff] %v2124_v7 }
0x1a15   :  { %2218 = vst [vmem:[#allocation1 + $0x4] ss:$9 sm:$0xff] %v2125_v16 }
0x1a16   :  { %2221 = vst [vmem:[#allocation1 + $0x5] ss:$9 sm:$0xff] %v2126_v53 }
0x1a17   :  { %2224 = vst [vmem:[#allocation1 + $0x6] ss:$9 sm:$0xff] %v2127_v31 }
0x1a18   :  { %2227 = vst [vmem:[#allocation1 + $0x7] ss:$9 sm:$0xff] %v2128_v19 }
0x1a1f   :  { %v2228_v18 = vld [vmem:[#allocation1] sm:$0xff] }
0x1a20   :  { %2560 = vmatmul.msk.bf16.vlgmr.msrb.gmra.mxu1 %vm1132_vm7, %v2228_v18 }
0x1a8e   :  { %v2200_v10 = vpop.f32.mrf.mxu0 }
0x1a96   :  { %v2202_v12 = vpop.f32.mrf.mxu0 }
0x1a9d   :  { %v2252_v4 = vpop.f32.mrf.mxu1 }
0x1a9e   :  { %v2253_v14 = vadd.f32 %v2252_v4, %v2200_v10 }
0x1aa0   :  { %v2261_v15 = vadd.f32 %v2615_v20, %v2253_v14 }
0x1aa2   :  { %v2264_v17 = vsel %vm2263_vm9, %v2261_v15, -inf }
0x1aa3   :  { %2265 = vmax.xlane.f32.xlu0 %v2264_v17 }
0x1aa5   :  { %v2254_v13 = vpop.f32.mrf.mxu1 }
0x1aa6   :  { %v2255_v23 = vadd.f32 %v2254_v13, %v2202_v12 }
0x1aa8   :  { %v2262_v25 = vadd.f32 %v2615_v20, %v2255_v23 }
0x1aaa   :  { %v2267_v27 = vsel %vm2263_vm9, %v2262_v25, -inf }
0x1aab   :  { %2268 = vmax.xlane.f32.xlu1 %v2267_v27 }
0x1b16   :  { %v2266_v34 = vpop.xlane.xlu0 %2265 }
0x1b17   :  { %v2270_v28 = vsub.f32 %v2261_v15, %v2266_v34 }
0x1b19   :  { %v2272_v22 = vmul.f32 1.442695, %v2270_v28 }
0x1b1b   :  { %2712 = vpow2.f32 %v2272_v22 }
0x1b1e   :  { %v2269_v36 = vpop.xlane.xlu1 %2268 }
0x1b1f   :  { %v2271_v62 = vsub.f32 %v2262_v25, %v2269_v36 }
0x1b21   :  { %v2713_v38 = vpop.eup %2712  ;;  %v2274_v2 = vmul.f32 1.442695, %v2271_v62 }
0x1b22   :  { %v2276_v8 = vsel %vm2263_vm9, %v2713_v38, 0.0 }
0x1b23   :  { %2714 = vpow2.f32 %v2274_v2  ;;  %2277 = vadd.xlane.f32.xlu2 %v2276_v8 }
0x1b29   :  { %v2715_v26 = vpop.eup %2714 }
0x1b2a   :  { %v2279_v40 = vsel %vm2263_vm9, %v2715_v26, 0.0 }
0x1b2b   :  { %2280 = vadd.xlane.f32.xlu2 %v2279_v40 }
0x1b96   :  { %v2278_v5 = vpop.xlane.xlu2 %2277 }
0x1b97   :  { %2716 = vrcp.f32 %v2278_v5  ;;  %v2293_v39 = vand.u32 2147483648, %v2278_v5  ;;  %v2291_v33 = vand.u32 2147483647, %v2278_v5  ;;  %vm2287_vm11 = vweird.f32 %v2278_v5 }
0x1b99   :  { %v2294_v44 = vor.u32 1.1754944e-38, %v2293_v39  ;;  %vm2292_vm13 = vcmp.eq.f32.partialorder %v2291_v33, 8.507059e+37 }
0x1b9d   :  { %v2717_v58 = vpop.eup %2716 }
0x1b9e   :  { %v2283_v43 = vmul.f32 %v2717_v58, %v2278_v5  ;;  %v2281_v32 = vpop.xlane.xlu2 %2280  ;;  %vm2288_vm7 = vweird.f32 %v2717_v58 }
0x1b9f   :  { %2718 = vrcp.f32 %v2281_v32  ;;  %vm2289_vm12 = vmor %vm2287_vm11, %vm2288_vm7  ;;  %v2306_v52 = vand.u32 2147483647, %v2281_v32  ;;  %v2308_v51 = vand.u32 2147483648, %v2281_v32  ;;  %vm2302_vm0 = vweird.f32 %v2281_v32 }
0x1ba0   :  { %v2284_v30 = vsub.f32 1.0, %v2283_v43 }
0x1ba1   :  { %v2309_v24 = vor.u32 1.1754944e-38, %v2308_v51  ;;  %vm2307_vm6 = vcmp.eq.f32.partialorder %v2306_v52, 8.507059e+37 }
0x1ba2   :  { %v2285_v45 = vmul.f32 %v2717_v58, %v2284_v30 }
0x1ba4   :  { %v2286_v11 = vadd.f32 %v2717_v58, %v2285_v45 }
0x1ba5   :  { %v2719_v42 = vpop.eup %2718 }
0x1ba6   :  { %v2290_v46 = vsel %vm2289_vm12, %v2717_v58, %v2286_v11  ;;  %v2298_v48 = vmul.f32 %v2719_v42, %v2281_v32  ;;  %vm2303_vm15 = vweird.f32 %v2719_v42 }
0x1ba7   :  { %v2295_v47 = vsel %vm2292_vm13, %v2294_v44, %v2290_v46  ;;  %vm2304_vm5 = vmor %vm2302_vm0, %vm2303_vm15 }
0x1ba8   :  { %v2296_v50 = vmul.f32 %v2713_v38, %v2295_v47  ;;  %v2299_v29 = vsub.f32 1.0, %v2298_v48 }
0x1baa   :  { %v2314_v49 = vrot.slane %v2296_v50, 2  ;;  %v2315_v59 = vrot.slane %v2296_v50, 4  ;;  %v2316_v60 = vrot.slane %v2296_v50, 6  ;;  %2327 = vst.msk [vmem:[%s3664_s13] sm:$0x3] %vm2326_vm14, %v2296_v50  ;;  %v2300_v63 = vmul.f32 %v2719_v42, %v2299_v29 }
0x1bac   :  { %2328 = vst.msk [vmem:[%s3664_s13 + $0x2] sm:$0x3] %vm2326_vm14, %v2314_v49  ;;  %v2301_v1 = vadd.f32 %v2719_v42, %v2300_v63 }
0x1bad   :  { %2329 = vst.msk [vmem:[%s3664_s13 + $0x4] sm:$0x3] %vm2326_vm14, %v2315_v59 }
0x1bae   :  { %2330 = vst.msk [vmem:[%s3664_s13 + $0x6] sm:$0x3] %vm2326_vm14, %v2316_v60  ;;  %v2305_v3 = vsel %vm2304_vm5, %v2719_v42, %v2301_v1 }
0x1baf   :  { %v2310_v57 = vsel %vm2307_vm6, %v2309_v24, %v2305_v3 }
0x1bb0   :  { %v2311_v37 = vmul.f32 %v2715_v26, %v2310_v57 }
0x1bb2   :  { %v2317_v61 = vrot.slane %v2311_v37, 2  ;;  %v2318_v21 = vrot.slane %v2311_v37, 4  ;;  %v2319_v54 = vrot.slane %v2311_v37, 6  ;;  %2331 = vst.msk [vmem:[%s3664_s13 + $0x8] sm:$0x3] %vm2326_vm14, %v2311_v37 }
0x1bb4   :  { %2332 = vst.msk [vmem:[%s3664_s13 + $0xa] sm:$0x3] %vm2326_vm14, %v2317_v61 }
0x1bb5   :  { %2333 = vst.msk [vmem:[%s3664_s13 + $0xc] sm:$0x3] %vm2326_vm14, %v2318_v21 }
0x1bb6   :  { %2334 = vst.msk [vmem:[%s3664_s13 + $0xe] sm:$0x3] %vm2326_vm14, %v2319_v54 }
0x1bb7   :  { %2339 = vsyncpa [#allocation7], 1 }
0x1bb8   :  { %2340 = vsyncpa [#allocation9], 1 }
0x1bb9   :  { %2341 = vsyncpa [#allocation12], 1 }
0x1bba   :  { %2342 = vsyncpa [#allocation15], 1 }

</bundles_post_ra>
